<compile_context>
chip_gen: v5e
topology: v5e:2x2
jax: 0.10.0
libtpu: 0.0.40
codegen_flags: <defaults>
</compile_context>

<pallas_src>
import functools
import math

import jax
import jax.numpy as jnp
from jax.experimental import pallas as pl
from jax.experimental.pallas import tpu as pltpu

_BN_EPS = 1e-5
_INV_SQRT2 = 1.0 / math.sqrt(2.0)
_VMEM_LIMIT_BYTES = 32 * 1024 * 1024


def _round_up(x: int, m: int) -> int:
    return (x + m - 1) // m * m


def _gelu_exact(h):
    # nn.GELU default (approximate='none'): erf-based exact GELU.
    return 0.5 * h * (1.0 + jax.lax.erf(h * _INV_SQRT2))


def _layer1_gelu_t(x_ref, w1c_ref, b1_ref):
    """hT = gelu(w1^T x + b1) in transposed, lane-dense (H, tile_m) layout.

    x_ref  : (A, tile_m) f32   lane-dense rows of the input
    w1c_ref: (H, A)      f32   columns of w1
    b1_ref : (H, 1)      f32
    returns (H, tile_m)  f32
    """
    x = x_ref[...]
    w1c = w1c_ref[...]
    n_agents = w1c.shape[1]
    hT = w1c[:, 0:1] * x[0:1, :]           # (H,1)*(1,tile_m) -> (H,tile_m)
    for a in range(1, n_agents):           # static unroll, A is tiny
        hT = hT + w1c[:, a:a + 1] * x[a:a + 1, :]
    hT = hT + b1_ref[...]                  # (H,1) lane-broadcast
    return _gelu_exact(hT)


def _stats_kernel(x_ref, w1c_ref, b1_ref, sum_ref, sq_ref):
    """Pass 1: per-tile per-channel partial sum / sum-of-squares of gelu(x@w1+b1)."""
    hT = _layer1_gelu_t(x_ref, w1c_ref, b1_ref)          # (H, tile_m)
    sum_ref[...] = jnp.sum(hT, axis=1, keepdims=True)     # (H, 1) lane reduce
    sq_ref[...] = jnp.sum(hT * hT, axis=1, keepdims=True)


def _apply_kernel(x_ref, w1c_ref, b1_ref, sum_ref, sq_ref, gamma_ref, beta_ref,
                  w2t_ref, b2_ref, o_ref, *, inv_m):
    """Pass 2: BatchNorm (stats folded into scale/shift) + second linear."""
    mean = sum_ref[...] * inv_m                                   # (H, 1)
    var = jnp.maximum(sq_ref[...] * inv_m - mean * mean, 0.0)     # biased var
    scale = gamma_ref[...] * jax.lax.rsqrt(var + _BN_EPS)         # (H, 1)
    shift = beta_ref[...] - mean * scale                          # (H, 1)

    hT = _layer1_gelu_t(x_ref, w1c_ref, b1_ref)                   # (H, tile_m)
    hT = hT * scale + shift                                       # normalized

    # (Cp, H) @ (H, tile_m) -> (Cp, tile_m), f32 accumulation on the MXU.
    oT = jnp.dot(w2t_ref[...], hT, preferred_element_type=jnp.float32)
    o_ref[...] = (oT + b2_ref[...]).astype(o_ref.dtype)


def prediction_forward(cell_state, w1_t, b1, w2_t, b2, gamma=None, beta=None,
                       *, tile_m=2048):
    """cell_state: (L, N, n_agents) -> (L, N, n_class)."""
    L, N, A = cell_state.shape
    H = w1_t.shape[1]
    C = w2_t.shape[1]
    M = L * N

    if gamma is None:
        gamma = jnp.ones((H,), jnp.float32)
    if beta is None:
        beta = jnp.zeros((H,), jnp.float32)

    # tile_m is the lane dimension of every block -> multiple of 128.
    tile_m = max(128, min(tile_m, _round_up(M, 128)))
    tile_m = _round_up(tile_m, 128)
    M_pad = _round_up(M, tile_m)
    num_tiles = M_pad // tile_m
    Cp = _round_up(C, 8)                        # sublane-aligned class dim

    # Lane-dense transposed input: (A, M_pad).
    xT = jnp.transpose(cell_state.reshape(M, A).astype(jnp.float32))
    if M_pad != M:
        xT = jnp.pad(xT, ((0, 0), (0, M_pad - M)))

    w1c = jnp.transpose(w1_t.astype(jnp.float32))               # (H, A)
    b1c = b1.astype(jnp.float32).reshape(H, 1)
    gammac = gamma.astype(jnp.float32).reshape(H, 1)
    betac = beta.astype(jnp.float32).reshape(H, 1)
    w2t = jnp.pad(jnp.transpose(w2_t.astype(jnp.float32)),      # (Cp, H)
                  ((0, Cp - C), (0, 0)))
    b2c = jnp.pad(b2.astype(jnp.float32), (0, Cp - C)).reshape(Cp, 1)

    cparams = pltpu.CompilerParams(
        dimension_semantics=("parallel",), vmem_limit_bytes=_VMEM_LIMIT_BYTES)

    # ------------- Pass 1: per-tile partial batch statistics (parallel) -------------
    sums_p, sqs_p = pl.pallas_call(
        _stats_kernel,
        out_shape=(jax.ShapeDtypeStruct((num_tiles, H, 1), jnp.float32),
                   jax.ShapeDtypeStruct((num_tiles, H, 1), jnp.float32)),
        grid=(num_tiles,),
        in_specs=[
            pl.BlockSpec((A, tile_m), lambda i: (0, i)),
            pl.BlockSpec((H, A), lambda i: (0, 0)),      # weights VMEM-resident
            pl.BlockSpec((H, 1), lambda i: (0, 0)),
        ],
        out_specs=(pl.BlockSpec((None, H, 1), lambda i: (i, 0, 0)),
                   pl.BlockSpec((None, H, 1), lambda i: (i, 0, 0))),
        compiler_params=cparams,
    )(xT, w1c, b1c)

    sum_tot = jnp.sum(sums_p, axis=0)            # (H, 1)
    sq_tot = jnp.sum(sqs_p, axis=0)              # (H, 1)
    if M_pad != M:
        # Zero-padded columns contribute exactly gelu(b1) per channel.
        pad = float(M_pad - M)
        gb = _gelu_exact(b1.astype(jnp.float32)).reshape(H, 1)
        sum_tot = sum_tot - pad * gb
        sq_tot = sq_tot - pad * (gb * gb)

    # ------------- Pass 2: normalize + second linear, minimal output slab -------------
    out_t = pl.pallas_call(
        functools.partial(_apply_kernel, inv_m=1.0 / M),
        out_shape=jax.ShapeDtypeStruct((Cp, M_pad), jnp.float32),
        grid=(num_tiles,),
        in_specs=[
            pl.BlockSpec((A, tile_m), lambda i: (0, i)),
            pl.BlockSpec((H, A), lambda i: (0, 0)),
            pl.BlockSpec((H, 1), lambda i: (0, 0)),
            pl.BlockSpec((H, 1), lambda i: (0, 0)),      # sum_tot
            pl.BlockSpec((H, 1), lambda i: (0, 0)),      # sq_tot
            pl.BlockSpec((H, 1), lambda i: (0, 0)),      # gamma
            pl.BlockSpec((H, 1), lambda i: (0, 0)),      # beta
            pl.BlockSpec((Cp, H), lambda i: (0, 0)),     # w2^T
            pl.BlockSpec((Cp, 1), lambda i: (0, 0)),     # b2
        ],
        out_specs=pl.BlockSpec((Cp, tile_m), lambda i: (0, i)),
        compiler_params=cparams,
    )(xT, w1c, b1c, sum_tot, sq_tot, gammac, betac, w2t, b2c)

    return jnp.transpose(out_t[:C, :M]).reshape(L, N, C)


def init_params(key, n_agents, n_class, hidden_size):
    """Xavier-uniform weights, zero biases (matching the module __init__)."""
    k1, k2 = jax.random.split(key)
    bound1 = math.sqrt(6.0 / (n_agents + hidden_size))
    w1_t = jax.random.uniform(k1, (n_agents, hidden_size), jnp.float32,
                              minval=-bound1, maxval=bound1)
    b1 = jnp.zeros((hidden_size,), jnp.float32)

    bound2 = math.sqrt(6.0 / (hidden_size + n_class))
    w2_t = jax.random.uniform(k2, (hidden_size, n_class), jnp.float32,
                              minval=-bound2, maxval=bound2)
    b2 = jnp.zeros((n_class,), jnp.float32)
    return w1_t, b1, w2_t, b2


def reference_forward(cell_state, w1_t, b1, w2_t, b2, gamma, beta):
    """Pure-JAX f32 reference mirroring the PyTorch forward (training-mode BN)."""
    h = jnp.einsum("lna,ah->lnh", cell_state, w1_t) + b1
    h = 0.5 * h * (1.0 + jax.lax.erf(h * _INV_SQRT2))
    mean = jnp.mean(h, axis=(0, 1), keepdims=True)
    var = jnp.mean((h - mean) ** 2, axis=(0, 1), keepdims=True)  # biased
    h = (h - mean) / jnp.sqrt(var + _BN_EPS) * gamma + beta
    return jnp.einsum("lnh,hc->lnc", h, w2_t) + b2


if __name__ == "__main__":
    # Small shapes consistent with the module: (seq L, batch N, n_agents).
    n_agents, n_class, hidden_size = 4, 5, 32
    L, N = 32, 32            # M = L*N = 1024 rows

    key = jax.random.PRNGKey(0)
    k_x, k_p = jax.random.split(key)
    cell_state = jax.random.normal(k_x, (L, N, n_agents), jnp.float32)
    w1_t, b1, w2_t, b2 = init_params(k_p, n_agents, n_class, hidden_size)
    gamma = jnp.ones((hidden_size,), jnp.float32)   # BatchNorm1d affine defaults
    beta = jnp.zeros((hidden_size,), jnp.float32)

    fwd = jax.jit(functools.partial(prediction_forward, tile_m=2048))
    out = jax.block_until_ready(fwd(cell_state, w1_t, b1, w2_t, b2, gamma, beta))

    ref = reference_forward(cell_state, w1_t, b1, w2_t, b2, gamma, beta)
    assert out.shape == (L, N, n_class)
    max_err = float(jnp.max(jnp.abs(out - ref)))
    assert jnp.allclose(out, ref, atol=3e-2, rtol=3e-2), (
        "mismatch vs reference: max|diff|=%g" % max_err)

    print("KERNEL_OK")
</pallas_src>

<mosaic_0001>
module attributes {stable_mosaic.version = 11 : i64} {
  func.func @_stats_kernel(%arg0: i32, %arg1: memref<4x1024xf32, #tpu.memory_space<vmem>>, %arg2: memref<32x4xf32, #tpu.memory_space<vmem>>, %arg3: memref<32x1xf32, #tpu.memory_space<vmem>>, %arg4: memref<1x32x1xf32, #tpu.memory_space<vmem>>, %arg5: memref<1x32x1xf32, #tpu.memory_space<vmem>>) attributes {dimension_semantics = [#tpu.dimension_semantics<parallel>], iteration_bounds = array<i64: 1>, scalar_prefetch = 0 : i64, scratch_operands = 0 : i64, tpu.core_type = #tpu.core_type<tc>, window_params = [{transform_indices = @transform_0, window_bounds = array<i64: 4, 1024>}, {pipeline_mode = #tpu.pipeline_mode<synchronous>, transform_indices = @transform_1, window_bounds = array<i64: 32, 4>}, {pipeline_mode = #tpu.pipeline_mode<synchronous>, transform_indices = @transform_2, window_bounds = array<i64: 32, 1>}, {transform_indices = @transform_3, window_bounds = array<i64: 1, 32, 1>}, {transform_indices = @transform_4, window_bounds = array<i64: 1, 32, 1>}]} {
    %c0 = arith.constant 0 : index
    %c0_0 = arith.constant 0 : index
    %0 = vector.load %arg1[%c0, %c0_0] : memref<4x1024xf32, #tpu.memory_space<vmem>>, vector<4x1024xf32>
    %c0_1 = arith.constant 0 : index
    %c0_2 = arith.constant 0 : index
    %1 = vector.load %arg2[%c0_1, %c0_2] : memref<32x4xf32, #tpu.memory_space<vmem>>, vector<32x4xf32>
    %2 = vector.extract_strided_slice %1 {offsets = [0, 0], sizes = [32, 1], strides = [1, 1]} : vector<32x4xf32> to vector<32x1xf32>
    %3 = vector.extract_strided_slice %0 {offsets = [0, 0], sizes = [1, 1024], strides = [1, 1]} : vector<4x1024xf32> to vector<1x1024xf32>
    %4 = vector.broadcast %2 : vector<32x1xf32> to vector<32x1024xf32>
    %5 = vector.broadcast %3 : vector<1x1024xf32> to vector<32x1024xf32>
    %6 = arith.mulf %4, %5 : vector<32x1024xf32>
    %7 = vector.extract_strided_slice %1 {offsets = [0, 1], sizes = [32, 1], strides = [1, 1]} : vector<32x4xf32> to vector<32x1xf32>
    %8 = vector.extract_strided_slice %0 {offsets = [1, 0], sizes = [1, 1024], strides = [1, 1]} : vector<4x1024xf32> to vector<1x1024xf32>
    %9 = vector.broadcast %7 : vector<32x1xf32> to vector<32x1024xf32>
    %10 = vector.broadcast %8 : vector<1x1024xf32> to vector<32x1024xf32>
    %11 = arith.mulf %9, %10 : vector<32x1024xf32>
    %12 = arith.addf %6, %11 : vector<32x1024xf32>
    %13 = vector.extract_strided_slice %1 {offsets = [0, 2], sizes = [32, 1], strides = [1, 1]} : vector<32x4xf32> to vector<32x1xf32>
    %14 = vector.extract_strided_slice %0 {offsets = [2, 0], sizes = [1, 1024], strides = [1, 1]} : vector<4x1024xf32> to vector<1x1024xf32>
    %15 = vector.broadcast %13 : vector<32x1xf32> to vector<32x1024xf32>
    %16 = vector.broadcast %14 : vector<1x1024xf32> to vector<32x1024xf32>
    %17 = arith.mulf %15, %16 : vector<32x1024xf32>
    %18 = arith.addf %12, %17 : vector<32x1024xf32>
    %19 = vector.extract_strided_slice %1 {offsets = [0, 3], sizes = [32, 1], strides = [1, 1]} : vector<32x4xf32> to vector<32x1xf32>
    %20 = vector.extract_strided_slice %0 {offsets = [3, 0], sizes = [1, 1024], strides = [1, 1]} : vector<4x1024xf32> to vector<1x1024xf32>
    %21 = vector.broadcast %19 : vector<32x1xf32> to vector<32x1024xf32>
    %22 = vector.broadcast %20 : vector<1x1024xf32> to vector<32x1024xf32>
    %23 = arith.mulf %21, %22 : vector<32x1024xf32>
    %24 = arith.addf %18, %23 : vector<32x1024xf32>
    %c0_3 = arith.constant 0 : index
    %c0_4 = arith.constant 0 : index
    %25 = vector.load %arg3[%c0_3, %c0_4] : memref<32x1xf32, #tpu.memory_space<vmem>>, vector<32x1xf32>
    %26 = vector.broadcast %25 : vector<32x1xf32> to vector<32x1024xf32>
    %27 = arith.addf %24, %26 : vector<32x1024xf32>
    %cst = arith.constant 5.000000e-01 : f32
    %28 = vector.broadcast %cst : f32 to vector<32x1024xf32>
    %29 = arith.mulf %28, %27 : vector<32x1024xf32>
    %cst_5 = arith.constant 0.707106769 : f32
    %30 = vector.broadcast %cst_5 : f32 to vector<32x1024xf32>
    %31 = arith.mulf %27, %30 : vector<32x1024xf32>
    %32 = math.erf %31 : vector<32x1024xf32>
    %cst_6 = arith.constant 1.000000e+00 : f32
    %33 = vector.broadcast %cst_6 : f32 to vector<32x1024xf32>
    %34 = arith.addf %33, %32 : vector<32x1024xf32>
    %35 = arith.mulf %29, %34 : vector<32x1024xf32>
    %cst_7 = arith.constant dense<0.000000e+00> : vector<32xf32>
    %36 = vector.multi_reduction <add>, %35, %cst_7 [1] : vector<32x1024xf32> to vector<32xf32>
    %37 = vector.shape_cast %36 : vector<32xf32> to vector<32x1xf32>
    %c0_8 = arith.constant 0 : index
    %c0_9 = arith.constant 0 : index
    %c0_10 = arith.constant 0 : index
    %38 = vector.load %arg4[%c0_8, %c0_9, %c0_10] : memref<1x32x1xf32, #tpu.memory_space<vmem>>, vector<1x32x1xf32>
    %39 = vector.shape_cast %38 : vector<1x32x1xf32> to vector<32x1xf32>
    %40 = vector.shape_cast %37 : vector<32x1xf32> to vector<1x32x1xf32>
    tpu.vector_store %arg4[%c0_8, %c0_9, %c0_10], %40 {strides = array<i32>} : memref<1x32x1xf32, #tpu.memory_space<vmem>>, vector<1x32x1xf32>,
    %41 = arith.mulf %35, %35 : vector<32x1024xf32>
    %cst_11 = arith.constant dense<0.000000e+00> : vector<32xf32>
    %42 = vector.multi_reduction <add>, %41, %cst_11 [1] : vector<32x1024xf32> to vector<32xf32>
    %43 = vector.shape_cast %42 : vector<32xf32> to vector<32x1xf32>
    %c0_12 = arith.constant 0 : index
    %c0_13 = arith.constant 0 : index
    %c0_14 = arith.constant 0 : index
    %44 = vector.load %arg5[%c0_12, %c0_13, %c0_14] : memref<1x32x1xf32, #tpu.memory_space<vmem>>, vector<1x32x1xf32>
    %45 = vector.shape_cast %44 : vector<1x32x1xf32> to vector<32x1xf32>
    %46 = vector.shape_cast %43 : vector<32x1xf32> to vector<1x32x1xf32>
    tpu.vector_store %arg5[%c0_12, %c0_13, %c0_14], %46 {strides = array<i32>} : memref<1x32x1xf32, #tpu.memory_space<vmem>>, vector<1x32x1xf32>,
    return
  }
  func.func @transform_0(%arg0: i32) -> (i32, i32) {
    %c0_i32 = arith.constant 0 : i32
    %c0_i32_0 = arith.constant 0 : i32
    return %c0_i32, %arg0 : i32, i32
  }
  func.func @transform_1(%arg0: i32) -> (i32, i32) {
    %c0_i32 = arith.constant 0 : i32
    %c0_i32_0 = arith.constant 0 : i32
    %c0_i32_1 = arith.constant 0 : i32
    return %c0_i32, %c0_i32_0 : i32, i32
  }
  func.func @transform_2(%arg0: i32) -> (i32, i32) {
    %c0_i32 = arith.constant 0 : i32
    %c0_i32_0 = arith.constant 0 : i32
    %c0_i32_1 = arith.constant 0 : i32
    return %c0_i32, %c0_i32_0 : i32, i32
  }
  func.func @transform_3(%arg0: i32) -> (i32, i32, i32) {
    %c0_i32 = arith.constant 0 : i32
    %c0_i32_0 = arith.constant 0 : i32
    %c0_i32_1 = arith.constant 0 : i32
    return %arg0, %c0_i32, %c0_i32_0 : i32, i32, i32
  }
  func.func @transform_4(%arg0: i32) -> (i32, i32, i32) {
    %c0_i32 = arith.constant 0 : i32
    %c0_i32_0 = arith.constant 0 : i32
    %c0_i32_1 = arith.constant 0 : i32
    return %arg0, %c0_i32, %c0_i32_0 : i32, i32, i32
  }
}

module attributes {stable_mosaic.version = 11 : i64} {
  func.func @_apply_kernel(%arg0: i32, %arg1: memref<4x1024xf32, #tpu.memory_space<vmem>>, %arg2: memref<32x4xf32, #tpu.memory_space<vmem>>, %arg3: memref<32x1xf32, #tpu.memory_space<vmem>>, %arg4: memref<32x1xf32, #tpu.memory_space<vmem>>, %arg5: memref<32x1xf32, #tpu.memory_space<vmem>>, %arg6: memref<32x1xf32, #tpu.memory_space<vmem>>, %arg7: memref<32x1xf32, #tpu.memory_space<vmem>>, %arg8: memref<8x32xf32, #tpu.memory_space<vmem>>, %arg9: memref<8x1xf32, #tpu.memory_space<vmem>>, %arg10: memref<8x1024xf32, #tpu.memory_space<vmem>>) attributes {dimension_semantics = [#tpu.dimension_semantics<parallel>], iteration_bounds = array<i64: 1>, scalar_prefetch = 0 : i64, scratch_operands = 0 : i64, tpu.core_type = #tpu.core_type<tc>, window_params = [{transform_indices = @transform_0, window_bounds = array<i64: 4, 1024>}, {pipeline_mode = #tpu.pipeline_mode<synchronous>, transform_indices = @transform_1, window_bounds = array<i64: 32, 4>}, {pipeline_mode = #tpu.pipeline_mode<synchronous>, transform_indices = @transform_2, window_bounds = array<i64: 32, 1>}, {pipeline_mode = #tpu.pipeline_mode<synchronous>, transform_indices = @transform_3, window_bounds = array<i64: 32, 1>}, {pipeline_mode = #tpu.pipeline_mode<synchronous>, transform_indices = @transform_4, window_bounds = array<i64: 32, 1>}, {pipeline_mode = #tpu.pipeline_mode<synchronous>, transform_indices = @transform_5, window_bounds = array<i64: 32, 1>}, {pipeline_mode = #tpu.pipeline_mode<synchronous>, transform_indices = @transform_6, window_bounds = array<i64: 32, 1>}, {pipeline_mode = #tpu.pipeline_mode<synchronous>, transform_indices = @transform_7, window_bounds = array<i64: 8, 32>}, {pipeline_mode = #tpu.pipeline_mode<synchronous>, transform_indices = @transform_8, window_bounds = array<i64: 8, 1>}, {transform_indices = @transform_9, window_bounds = array<i64: 8, 1024>}]} {
    %c0 = arith.constant 0 : index
    %c0_0 = arith.constant 0 : index
    %0 = vector.load %arg4[%c0, %c0_0] : memref<32x1xf32, #tpu.memory_space<vmem>>, vector<32x1xf32>
    %cst = arith.constant 9.765625E-4 : f32
    %1 = vector.broadcast %cst : f32 to vector<32x1xf32>
    %2 = arith.mulf %0, %1 : vector<32x1xf32>
    %c0_1 = arith.constant 0 : index
    %c0_2 = arith.constant 0 : index
    %3 = vector.load %arg5[%c0_1, %c0_2] : memref<32x1xf32, #tpu.memory_space<vmem>>, vector<32x1xf32>
    %cst_3 = arith.constant 9.765625E-4 : f32
    %4 = vector.broadcast %cst_3 : f32 to vector<32x1xf32>
    %5 = arith.mulf %3, %4 : vector<32x1xf32>
    %6 = arith.mulf %2, %2 : vector<32x1xf32>
    %7 = arith.subf %5, %6 : vector<32x1xf32>
    %cst_4 = arith.constant 0.000000e+00 : f32
    %8 = vector.broadcast %cst_4 : f32 to vector<32x1xf32>
    %9 = arith.maximumf %7, %8 : vector<32x1xf32>
    %c0_5 = arith.constant 0 : index
    %c0_6 = arith.constant 0 : index
    %10 = vector.load %arg6[%c0_5, %c0_6] : memref<32x1xf32, #tpu.memory_space<vmem>>, vector<32x1xf32>
    %cst_7 = arith.constant 9.99999974E-6 : f32
    %11 = vector.broadcast %cst_7 : f32 to vector<32x1xf32>
    %12 = arith.addf %9, %11 : vector<32x1xf32>
    %13 = math.rsqrt %12 : vector<32x1xf32>
    %14 = arith.mulf %10, %13 : vector<32x1xf32>
    %c0_8 = arith.constant 0 : index
    %c0_9 = arith.constant 0 : index
    %15 = vector.load %arg7[%c0_8, %c0_9] : memref<32x1xf32, #tpu.memory_space<vmem>>, vector<32x1xf32>
    %16 = arith.mulf %2, %14 : vector<32x1xf32>
    %17 = arith.subf %15, %16 : vector<32x1xf32>
    %c0_10 = arith.constant 0 : index
    %c0_11 = arith.constant 0 : index
    %18 = vector.load %arg1[%c0_10, %c0_11] : memref<4x1024xf32, #tpu.memory_space<vmem>>, vector<4x1024xf32>
    %c0_12 = arith.constant 0 : index
    %c0_13 = arith.constant 0 : index
    %19 = vector.load %arg2[%c0_12, %c0_13] : memref<32x4xf32, #tpu.memory_space<vmem>>, vector<32x4xf32>
    %20 = vector.extract_strided_slice %19 {offsets = [0, 0], sizes = [32, 1], strides = [1, 1]} : vector<32x4xf32> to vector<32x1xf32>
    %21 = vector.extract_strided_slice %18 {offsets = [0, 0], sizes = [1, 1024], strides = [1, 1]} : vector<4x1024xf32> to vector<1x1024xf32>
    %22 = vector.broadcast %20 : vector<32x1xf32> to vector<32x1024xf32>
    %23 = vector.broadcast %21 : vector<1x1024xf32> to vector<32x1024xf32>
    %24 = arith.mulf %22, %23 : vector<32x1024xf32>
    %25 = vector.extract_strided_slice %19 {offsets = [0, 1], sizes = [32, 1], strides = [1, 1]} : vector<32x4xf32> to vector<32x1xf32>
    %26 = vector.extract_strided_slice %18 {offsets = [1, 0], sizes = [1, 1024], strides = [1, 1]} : vector<4x1024xf32> to vector<1x1024xf32>
    %27 = vector.broadcast %25 : vector<32x1xf32> to vector<32x1024xf32>
    %28 = vector.broadcast %26 : vector<1x1024xf32> to vector<32x1024xf32>
    %29 = arith.mulf %27, %28 : vector<32x1024xf32>
    %30 = arith.addf %24, %29 : vector<32x1024xf32>
    %31 = vector.extract_strided_slice %19 {offsets = [0, 2], sizes = [32, 1], strides = [1, 1]} : vector<32x4xf32> to vector<32x1xf32>
    %32 = vector.extract_strided_slice %18 {offsets = [2, 0], sizes = [1, 1024], strides = [1, 1]} : vector<4x1024xf32> to vector<1x1024xf32>
    %33 = vector.broadcast %31 : vector<32x1xf32> to vector<32x1024xf32>
    %34 = vector.broadcast %32 : vector<1x1024xf32> to vector<32x1024xf32>
    %35 = arith.mulf %33, %34 : vector<32x1024xf32>
    %36 = arith.addf %30, %35 : vector<32x1024xf32>
    %37 = vector.extract_strided_slice %19 {offsets = [0, 3], sizes = [32, 1], strides = [1, 1]} : vector<32x4xf32> to vector<32x1xf32>
    %38 = vector.extract_strided_slice %18 {offsets = [3, 0], sizes = [1, 1024], strides = [1, 1]} : vector<4x1024xf32> to vector<1x1024xf32>
    %39 = vector.broadcast %37 : vector<32x1xf32> to vector<32x1024xf32>
    %40 = vector.broadcast %38 : vector<1x1024xf32> to vector<32x1024xf32>
    %41 = arith.mulf %39, %40 : vector<32x1024xf32>
    %42 = arith.addf %36, %41 : vector<32x1024xf32>
    %c0_14 = arith.constant 0 : index
    %c0_15 = arith.constant 0 : index
    %43 = vector.load %arg3[%c0_14, %c0_15] : memref<32x1xf32, #tpu.memory_space<vmem>>, vector<32x1xf32>
    %44 = vector.broadcast %43 : vector<32x1xf32> to vector<32x1024xf32>
    %45 = arith.addf %42, %44 : vector<32x1024xf32>
    %cst_16 = arith.constant 5.000000e-01 : f32
    %46 = vector.broadcast %cst_16 : f32 to vector<32x1024xf32>
    %47 = arith.mulf %46, %45 : vector<32x1024xf32>
    %cst_17 = arith.constant 0.707106769 : f32
    %48 = vector.broadcast %cst_17 : f32 to vector<32x1024xf32>
    %49 = arith.mulf %45, %48 : vector<32x1024xf32>
    %50 = math.erf %49 : vector<32x1024xf32>
    %cst_18 = arith.constant 1.000000e+00 : f32
    %51 = vector.broadcast %cst_18 : f32 to vector<32x1024xf32>
    %52 = arith.addf %51, %50 : vector<32x1024xf32>
    %53 = arith.mulf %47, %52 : vector<32x1024xf32>
    %54 = vector.broadcast %14 : vector<32x1xf32> to vector<32x1024xf32>
    %55 = arith.mulf %53, %54 : vector<32x1024xf32>
    %56 = vector.broadcast %17 : vector<32x1xf32> to vector<32x1024xf32>
    %57 = arith.addf %55, %56 : vector<32x1024xf32>
    %c0_19 = arith.constant 0 : index
    %c0_20 = arith.constant 0 : index
    %58 = vector.load %arg8[%c0_19, %c0_20] : memref<8x32xf32, #tpu.memory_space<vmem>>, vector<8x32xf32>
    %cst_21 = arith.constant dense<0.000000e+00> : vector<8x1024xf32>
    %59 = tpu.matmul %58, %57, %cst_21 {dimension_numbers = #tpu.dot_dimension_numbers<[1], [0], [0], [1], [0, 0, 1, 1], [], []>} : vector<8x32xf32>, vector<32x1024xf32>, vector<8x1024xf32> -> vector<8x1024xf32>
    %c0_22 = arith.constant 0 : index
    %c0_23 = arith.constant 0 : index
    %60 = vector.load %arg9[%c0_22, %c0_23] : memref<8x1xf32, #tpu.memory_space<vmem>>, vector<8x1xf32>
    %61 = vector.broadcast %60 : vector<8x1xf32> to vector<8x1024xf32>
    %62 = arith.addf %59, %61 : vector<8x1024xf32>
    %c0_24 = arith.constant 0 : index
    %c0_25 = arith.constant 0 : index
    %63 = vector.load %arg10[%c0_24, %c0_25] : memref<8x1024xf32, #tpu.memory_space<vmem>>, vector<8x1024xf32>
    tpu.vector_store %arg10[%c0_24, %c0_25], %62 {strides = array<i32>} : memref<8x1024xf32, #tpu.memory_space<vmem>>, vector<8x1024xf32>,
    return
  }
  func.func @transform_0(%arg0: i32) -> (i32, i32) {
    %c0_i32 = arith.constant 0 : i32
    %c0_i32_0 = arith.constant 0 : i32
    return %c0_i32, %arg0 : i32, i32
  }
  func.func @transform_1(%arg0: i32) -> (i32, i32) {
    %c0_i32 = arith.constant 0 : i32
    %c0_i32_0 = arith.constant 0 : i32
    %c0_i32_1 = arith.constant 0 : i32
    return %c0_i32, %c0_i32_0 : i32, i32
  }
  func.func @transform_2(%arg0: i32) -> (i32, i32) {
    %c0_i32 = arith.constant 0 : i32
    %c0_i32_0 = arith.constant 0 : i32
    %c0_i32_1 = arith.constant 0 : i32
    return %c0_i32, %c0_i32_0 : i32, i32
  }
  func.func @transform_3(%arg0: i32) -> (i32, i32) {
    %c0_i32 = arith.constant 0 : i32
    %c0_i32_0 = arith.constant 0 : i32
    %c0_i32_1 = arith.constant 0 : i32
    return %c0_i32, %c0_i32_0 : i32, i32
  }
  func.func @transform_4(%arg0: i32) -> (i32, i32) {
    %c0_i32 = arith.constant 0 : i32
    %c0_i32_0 = arith.constant 0 : i32
    %c0_i32_1 = arith.constant 0 : i32
    return %c0_i32, %c0_i32_0 : i32, i32
  }
  func.func @transform_5(%arg0: i32) -> (i32, i32) {
    %c0_i32 = arith.constant 0 : i32
    %c0_i32_0 = arith.constant 0 : i32
    %c0_i32_1 = arith.constant 0 : i32
    return %c0_i32, %c0_i32_0 : i32, i32
  }
  func.func @transform_6(%arg0: i32) -> (i32, i32) {
    %c0_i32 = arith.constant 0 : i32
    %c0_i32_0 = arith.constant 0 : i32
    %c0_i32_1 = arith.constant 0 : i32
    return %c0_i32, %c0_i32_0 : i32, i32
  }
  func.func @transform_7(%arg0: i32) -> (i32, i32) {
    %c0_i32 = arith.constant 0 : i32
    %c0_i32_0 = arith.constant 0 : i32
    %c0_i32_1 = arith.constant 0 : i32
    return %c0_i32, %c0_i32_0 : i32, i32
  }
  func.func @transform_8(%arg0: i32) -> (i32, i32) {
    %c0_i32 = arith.constant 0 : i32
    %c0_i32_0 = arith.constant 0 : i32
    %c0_i32_1 = arith.constant 0 : i32
    return %c0_i32, %c0_i32_0 : i32, i32
  }
  func.func @transform_9(%arg0: i32) -> (i32, i32) {
    %c0_i32 = arith.constant 0 : i32
    %c0_i32_0 = arith.constant 0 : i32
    return %c0_i32, %arg0 : i32, i32
  }
}

</mosaic_0001>

<bundles_post_ra>
// kernel: prediction_forward.2
= control target key start
LH: loop header
LB: loop body
LE: loop exit
PB: predicated region body
PF: predicated region fallthrough
CT: control target
= control target key end

     0   :  { %v2113_v0 = vmov 1   ;;  %v2114_v1 = vmov 0   ;;  %v2115_v6 = vmov 2   ;;  %v2116_v8 = vmov 3   ;;  %s4319_s1 = inlined_call_operand.vmem [shape: f32[32,4], index: 1, kind: input, shape index: {}]   ;;  %s4320_s2 = inlined_call_operand.vmem [shape: f32[32,1], index: 2, kind: input, shape index: {}]   ;;  %s4321_s0 = inlined_call_operand.vmem [shape: f32[4,1024], index: 0, kind: input, shape index: {}]   ;;  %s4322_s3 = inlined_call_operand.vmem [shape: f32[1,32,1], index: 3, kind: output, shape index: {0}]   ;;  %s4323_s4 = inlined_call_operand.vmem [shape: f32[1,32,1], index: 4, kind: output, shape index: {1}]  }
   0x1   :  { %2039 = vset.pattern.permute.xlu0 %v2113_v0  ;;  %2037 = vset.pattern.permute.xlu1 %v2114_v1  ;;  %v22_v2 = vld [vmem:[%s4319_s1 + $0x10] sm:$0xff]  ;;  %v20_v3 = vld [vmem:[%s4319_s1] sm:$0xff]  ;;  %v23_v4 = vld [vmem:[%s4319_s1 + $0x18] sm:$0xff] }
   0x2   :  { %2038 = vset.pattern.permute.xlu2 %v2113_v0  ;;  %113 = vperm.xlu0 %2039, %v22_v2   ;;  %v21_v5 = vld [vmem:[%s4319_s1 + $0x8] sm:$0xff]  ;;  %v416_v7 = vld [vmem:[%s4320_s2] sm:$0xff]  ;;  %v418_v10 = vld [vmem:[%s4320_s2 + $0x10] sm:$0xff] }
   0x3   :  { %36 = vperm.xlu1 %2037, %v22_v2   ;;  %105 = vperm.xlu2 %2038, %v20_v3   ;;  %v417_v9 = vld [vmem:[%s4320_s2 + $0x8] sm:$0xff]  ;;  %v419_v11 = vld [vmem:[%s4320_s2 + $0x18] sm:$0xff]  ;;  %v2173_v14 = vld [vmem:[%s4321_s0] sm:$0xff] }
   0x4   :  { %v2178_v15 = vld [vmem:[%s4321_s0 + $0x8] sm:$0xff]  ;;  %v2183_v16 = vld [vmem:[%s4321_s0 + $0x10] sm:$0xff]  ;;  %v120_v17 = vperm.slane %v2173_v14, 1  ;;  %v121_v18 = vperm.slane %v2173_v14, 5  ;;  %v48_v22 = vperm.slane %v2173_v14, 0  ;;  %v49_v23 = vperm.slane %v2173_v14, 4 }
   0x5   :  { %v122_v19 = vperm.slane %v2178_v15, 1  ;;  %v123_v20 = vperm.slane %v2178_v15, 5  ;;  %v124_v21 = vperm.slane %v2183_v16, 1  ;;  %v50_v24 = vperm.slane %v2178_v15, 0 }
   0x6   :  { %v51_v26 = vperm.slane %v2178_v15, 4  ;;  %v52_v27 = vperm.slane %v2183_v16, 0  ;;  %v224_v28 = vperm.slane %v2173_v14, 2  ;;  %v225_v29 = vperm.slane %v2173_v14, 6 }
   0x7   :  { %v2199_v30 = vperm.slane %v120_v17, 1  ;;  %v2201_v31 = vperm.slane %v121_v18, 1  ;;  %v2203_v32 = vperm.slane %v122_v19, 1  ;;  %v2205_v33 = vperm.slane %v123_v20, 1 }
   0x8   :  { %v2207_v34 = vperm.slane %v124_v21, 1  ;;  %v2209_v35 = vperm.slane %v48_v22, 0  ;;  %v2211_v36 = vperm.slane %v49_v23, 0  ;;  %v2213_v37 = vperm.slane %v50_v24, 0 }
   0x9   :  { %4393 = vst [vmem:[#allocation3_spill] sm:$0xff] %v2205_v33  ;;  %v2215_v38 = vperm.slane %v51_v26, 0  ;;  %v2217_v39 = vperm.slane %v52_v27, 0  ;;  %v2219_v40 = vperm.slane %v224_v28, 2  ;;  %v2221_v41 = vperm.slane %v225_v29, 2 }
   0xa   :  { %2043 = vset.pattern.permute.xlu0 %v2115_v6  ;;  %4394 = vst [vmem:[#allocation4_spill] sm:$0xff] %v2207_v34  ;;  %v228_v17 = vperm.slane %v2183_v16, 2  ;;  %v229_v18 = vperm.slane %v2183_v16, 6 }
   0xb   :  { %41 = vperm.xlu1 %2037, %v23_v4   ;;  %221 = vperm.xlu0 %2043, %v23_v4   ;;  %4395 = vst [vmem:[#allocation5_spill] sm:$0xff] %v2215_v38 }
   0xc   :  { %109 = vperm.xlu2 %2038, %v21_v5   ;;  %4396 = vst [vmem:[#allocation6_spill] sm:$0xff] %v2217_v39 }
   0xd   :  { %4397 = vst [vmem:[#allocation7_spill] sm:$0xff] %v2219_v40 }
   0xe   :  { %4398 = vst [vmem:[#allocation8_spill] sm:$0xff] %v2221_v41 }
  0x13   :  { %2040 = vset.pattern.permute.xlu1 %v2113_v0  ;;  %2044 = vset.pattern.permute.xlu0 %v2114_v1  ;;  %v226_v0 = vperm.slane %v2178_v15, 2 }
  0x14   :  { %117 = vperm.xlu1 %2040, %v23_v4   ;;  %2041 = vset.pattern.permute.xlu2 %v2115_v6 }
  0x15   :  { %26 = vperm.xlu0 %2044, %v20_v3   ;;  %209 = vperm.xlu2 %2041, %v20_v3  }
  0x1c   :  { %2042 = vset.pattern.permute.xlu1 %v2115_v6 }
  0x1d   :  { %213 = vperm.xlu1 %2042, %v21_v5   ;;  %31 = vperm.xlu0 %2044, %v21_v5  }
  0x1e   :  { %217 = vperm.xlu2 %2041, %v22_v2  }
  0x25   :  { %2045 = vset.pattern.permute.xlu1 %v2116_v8  ;;  %422 = vperm.xlu0 %2044, %v416_v7  }
  0x26   :  { %313 = vperm.xlu1 %2045, %v20_v3   ;;  %2046 = vset.pattern.permute.xlu2 %v2116_v8  ;;  %v2277_v3 = vld [vmem:[%s4321_s0 + $0x18] sm:$0xff] }
  0x27   :  { %317 = vperm.xlu2 %2046, %v21_v5   ;;  %v54_v6 = vperm.slane %v2277_v3, 0  ;;  %v55_v7 = vperm.slane %v2277_v3, 4  ;;  %v230_v22 = vperm.slane %v2277_v3, 2  ;;  %v231_v23 = vperm.slane %v2277_v3, 6 }
  0x2e   :  { %321 = vperm.xlu1 %2045, %v22_v2   ;;  %v53_v2 = vperm.slane %v2183_v16, 4 }
  0x2f   :  { %325 = vperm.xlu2 %2046, %v23_v4   ;;  %v2279_v4 = vperm.slane %v226_v0, 2  ;;  %v2328_v0 = vperm.slane %v228_v17, 2  ;;  %v330_v17 = vperm.slane %v2178_v15, 3 }
  0x30   :  { %v2285_v8 = vperm.slane %v53_v2, 0 }
  0x31   :  { %4403 = vst [vmem:[#allocation13_spill] sm:$0xff] %v2279_v4 }
  0x32   :  { %4405 = vst [vmem:[#allocation15_spill] sm:$0xff] %v2285_v8 }
  0x33   :  { %4415 = vst [vmem:[#allocation25_spill] sm:$0xff] %v2328_v0 }
  0x36   :  { %2047 = vset.pattern.permute.xlu1 %v2114_v1 }
  0x37   :  { %427 = vperm.xlu1 %2047, %v417_v9   ;;  %2048 = vset.pattern.permute.xlu2 %v2114_v1  ;;  %v227_v1 = vperm.slane %v2178_v15, 6  ;;  %v125_v9 = vperm.slane %v2183_v16, 5 }
  0x38   :  { %432 = vperm.xlu2 %2048, %v418_v10   ;;  %v126_v10 = vperm.slane %v2277_v3, 1 }
  0x39   :  { %v2281_v5 = vperm.slane %v227_v1, 2  ;;  %v2330_v1 = vperm.slane %v229_v18, 2 }
  0x3b   :  { %4404 = vst [vmem:[#allocation14_spill] sm:$0xff] %v2281_v5 }
  0x3c   :  { %4416 = vst [vmem:[#allocation26_spill] sm:$0xff] %v2330_v1 }
  0x3f   :  { %437 = vperm.xlu1 %2047, %v419_v11   ;;  %v127_v11 = vperm.slane %v2277_v3, 5 }
  0x5d   :  { %v2166_v12 = vpop.permute.xlu2 %105 }
  0x5e   :  { %v144_v2 = vmul.f32 %v2199_v30, %v2166_v12 }
  0x66   :  { %v2168_v13 = vpop.permute.xlu2 %109 }
  0x67   :  { %4392 = vst [vmem:[#allocation2_spill] sm:$0xff] %v2168_v13  ;;  %v152_v18 = vmul.f32 %v2199_v30, %v2168_v13 }
  0x6f   :  { %v2193_v25 = vpop.permute.xlu2 %209 }
  0x74   :  { %v2223_v42 = vpop.permute.xlu0 %113 }
  0x75   :  { %v160_v43 = vmul.f32 %v2199_v30, %v2223_v42  ;;  %v161_v44 = vmul.f32 %v2201_v31, %v2223_v42  ;;  %v162_v45 = vmul.f32 %v2203_v32, %v2223_v42  ;;  %v2233_v46 = vmul.f32 %v2205_v33, %v2223_v42  ;;  %v2235_v47 = vpop.permute.xlu1 %36 }
  0x76   :  { %v2239_v48 = vmul.f32 %v2207_v34, %v2223_v42  ;;  %v88_v49 = vmul.f32 %v2209_v35, %v2235_v47  ;;  %v89_v50 = vmul.f32 %v2211_v36, %v2235_v47  ;;  %v90_v51 = vmul.f32 %v2213_v37, %v2235_v47 }
  0x77   :  { %v2249_v52 = vmul.f32 %v2215_v38, %v2235_v47  ;;  %v2253_v53 = vmul.f32 %v2217_v39, %v2235_v47 }
  0x78   :  { %v192_v54 = vadd.f32 %v160_v43, %v88_v49  ;;  %v193_v55 = vadd.f32 %v161_v44, %v89_v50  ;;  %v2255_v56 = vadd.f32 %v162_v45, %v90_v51  ;;  %v2257_v57 = vpop.permute.xlu2 %217  ;;  %v328_v43 = vperm.slane %v2173_v14, 3 }
  0x79   :  { %v264_v58 = vmul.f32 %v2219_v40, %v2257_v57  ;;  %v265_v59 = vmul.f32 %v2221_v41, %v2257_v57  ;;  %v2311_v44 = vperm.slane %v54_v6, 0  ;;  %v2313_v45 = vperm.slane %v55_v7, 0 }
  0x7a   :  { %v2315_v49 = vperm.slane %v125_v9, 1  ;;  %v329_v50 = vperm.slane %v2173_v14, 7  ;;  %v145_v14 = vmul.f32 %v2201_v31, %v2166_v12  ;;  %v2336_v6 = vperm.slane %v230_v22, 2 }
  0x7b   :  { %v2263_v60 = vadd.f32 %v264_v58, %v192_v54  ;;  %v2265_v61 = vadd.f32 %v265_v59, %v193_v55  ;;  %4407 = vst [vmem:[#allocation17_spill] sm:$0xff] %v2311_v44  ;;  %v2324_v58 = vperm.slane %v126_v10, 1  ;;  %v2326_v59 = vperm.slane %v127_v11, 1 }
  0x7c   :  { %4408 = vst [vmem:[#allocation18_spill] sm:$0xff] %v2313_v45  ;;  %v2338_v7 = vperm.slane %v231_v23, 2  ;;  %v146_v9 = vmul.f32 %v2203_v32, %v2166_v12  ;;  %v147_v10 = vmul.f32 %v2205_v33, %v2166_v12  ;;  %v2346_v11 = vmul.f32 %v2207_v34, %v2166_v12 }
  0x7d   :  { %4399 = vst [vmem:[#allocation9_spill] sm:$0xff] %v2263_v60  ;;  %v2267_v62 = vpop.permute.xlu1 %41  ;;  %v2269_v63 = vpop.permute.xlu0 %221  ;;  %v153_v23 = vmul.f32 %v2201_v31, %v2168_v13 }
  0x7e   :  { %4400 = vst [vmem:[#allocation10_spill] sm:$0xff] %v2265_v61  ;;  %v96_v19 = vmul.f32 %v2209_v35, %v2267_v62  ;;  %v97_v20 = vmul.f32 %v2211_v36, %v2267_v62  ;;  %v98_v24 = vmul.f32 %v2213_v37, %v2267_v62 }
  0x7f   :  { %4401 = vst [vmem:[#allocation11_spill] sm:$0xff] %v2267_v62 }
  0x80   :  { %4402 = vst [vmem:[#allocation12_spill] sm:$0xff] %v2269_v63  ;;  %v93_v63 = vmul.f32 %v2285_v8, %v2235_v47 }
  0x81   :  { %4409 = vst [vmem:[#allocation19_spill] sm:$0xff] %v2315_v49 }
  0x82   :  { %4413 = vst [vmem:[#allocation23_spill] sm:$0xff] %v2324_v58 }
  0x83   :  { %4414 = vst [vmem:[#allocation24_spill] sm:$0xff] %v2326_v59 }
  0x84   :  { %4417 = vst [vmem:[#allocation27_spill] sm:$0xff] %v2336_v6 }
  0x85   :  { %4418 = vst [vmem:[#allocation28_spill] sm:$0xff] %v2338_v7 }
  0x86   :  { %v2296_v21 = vpop.permute.xlu1 %117  ;;  %4419 = vst [vmem:[#allocation29_spill] sm:$0xff] %v2346_v11 }
  0x87   :  { %4406 = vst [vmem:[#allocation16_spill] sm:$0xff] %v2296_v21  ;;  %v168_v26 = vmul.f32 %v2199_v30, %v2296_v21  ;;  %v169_v27 = vmul.f32 %v2201_v31, %v2296_v21  ;;  %v170_v28 = vmul.f32 %v2203_v32, %v2296_v21  ;;  %v2308_v29 = vpop.permute.xlu0 %26  ;;  %v154_v30 = vmul.f32 %v2203_v32, %v2168_v13 }
  0x88   :  { %v72_v22 = vmul.f32 %v2209_v35, %v2308_v29  ;;  %v266_v32 = vmul.f32 %v2279_v4, %v2257_v57  ;;  %v267_v21 = vmul.f32 %v2281_v5, %v2257_v57 }
  0x89   :  { %v2318_v51 = vadd.f32 %v168_v26, %v96_v19  ;;  %v2320_v54 = vadd.f32 %v169_v27, %v97_v20  ;;  %v2322_v55 = vadd.f32 %v170_v28, %v98_v24  ;;  %v2351_v19 = vperm.slane %v328_v43, 3 }
  0x8a   :  { %v2353_v20 = vperm.slane %v329_v50, 3  ;;  %v73_v24 = vmul.f32 %v2211_v36, %v2308_v29  ;;  %v74_v26 = vmul.f32 %v2213_v37, %v2308_v29  ;;  %v75_v27 = vmul.f32 %v2215_v38, %v2308_v29 }
  0x8b   :  { %4410 = vst [vmem:[#allocation20_spill] sm:$0xff] %v2318_v51  ;;  %v248_v28 = vmul.f32 %v2219_v40, %v2193_v25  ;;  %v249_v43 = vmul.f32 %v2221_v41, %v2193_v25  ;;  %v251_v51 = vmul.f32 %v2281_v5, %v2193_v25  ;;  %v176_v61 = vadd.f32 %v144_v2, %v72_v22 }
  0x8c   :  { %4411 = vst [vmem:[#allocation21_spill] sm:$0xff] %v2320_v54  ;;  %v250_v54 = vmul.f32 %v2279_v4, %v2193_v25  ;;  %v177_v11 = vadd.f32 %v145_v14, %v73_v24  ;;  %v178_v41 = vadd.f32 %v146_v9, %v74_v26  ;;  %v179_v40 = vadd.f32 %v147_v10, %v75_v27 }
  0x8d   :  { %4412 = vst [vmem:[#allocation22_spill] sm:$0xff] %v2322_v55  ;;  %v331_v55 = vperm.slane %v2178_v15, 7  ;;  %v166_v14 = vmul.f32 %v2324_v58, %v2223_v42  ;;  %v167_v9 = vmul.f32 %v2326_v59, %v2223_v42  ;;  %v2408_v10 = vperm.slane %v330_v17, 3 }
  0x8e   :  { %4420 = vst [vmem:[#allocation30_spill] sm:$0xff] %v2351_v19  ;;  %v2415_v22 = vadd.f32 %v2239_v48, %v2253_v53  ;;  %v2428_v27 = vadd.f32 %v266_v32, %v2255_v56  ;;  %v280_v48 = vadd.f32 %v248_v28, %v176_v61  ;;  %v281_v53 = vadd.f32 %v249_v43, %v177_v11 }
  0x8f   :  { %4421 = vst [vmem:[#allocation31_spill] sm:$0xff] %v2353_v20  ;;  %v2371_v50 = vpop.permute.xlu1 %213  ;;  %v2373_v31 = vpop.permute.xlu0 %31  ;;  %v2425_v17 = vperm.slane %v331_v55, 3  ;;  %v150_v61 = vmul.f32 %v2324_v58, %v2166_v12  ;;  %v151_v32 = vmul.f32 %v2326_v59, %v2166_v12 }
  0x90   :  { %4422 = vst [vmem:[#allocation32_spill] sm:$0xff] %v2371_v50  ;;  %v80_v50 = vmul.f32 %v2209_v35, %v2373_v31  ;;  %v81_v60 = vmul.f32 %v2211_v36, %v2373_v31  ;;  %v82_v15 = vmul.f32 %v2213_v37, %v2373_v31  ;;  %v94_v35 = vmul.f32 %v2311_v44, %v2235_v47 }
  0x91   :  { %4423 = vst [vmem:[#allocation33_spill] sm:$0xff] %v2373_v31  ;;  %v95_v36 = vmul.f32 %v2313_v45, %v2235_v47  ;;  %v165_v37 = vmul.f32 %v2315_v49, %v2223_v42  ;;  %v333_v47 = vperm.slane %v2183_v16, 7  ;;  %v334_v42 = vperm.slane %v2277_v3, 3 }
  0x92   :  { %v2392_v4 = vadd.f32 %v152_v18, %v80_v50  ;;  %v2394_v38 = vadd.f32 %v153_v23, %v81_v60  ;;  %v2396_v2 = vadd.f32 %v154_v30, %v82_v15  ;;  %4427 = vst [vmem:[#allocation37_spill] sm:$0xff] %v2408_v10  ;;  %v332_v60 = vperm.slane %v2183_v16, 3 }
  0x93   :  { %v195_v18 = vadd.f32 %v2233_v46, %v2249_v52  ;;  %v2418_v23 = vadd.f32 %v165_v37, %v93_v63  ;;  %v2420_v24 = vadd.f32 %v166_v14, %v94_v35  ;;  %v2422_v26 = vadd.f32 %v167_v9, %v95_v36 }
  0x94   :  { %4424 = vst [vmem:[#allocation34_spill] sm:$0xff] %v2392_v4  ;;  %v282_v16 = vadd.f32 %v250_v54, %v178_v41  ;;  %v283_v63 = vadd.f32 %v251_v51, %v179_v40  ;;  %v2448_v41 = vmul.f32 %v2207_v34, %v2168_v13  ;;  %v149_v40 = vmul.f32 %v2315_v49, %v2166_v12  ;;  %v4443_v34 = vld [vmem:[#allocation29_spill] sm:$0xff] }
  0x95   :  { %4425 = vst [vmem:[#allocation35_spill] sm:$0xff] %v2394_v38  ;;  %v2430_v46 = vadd.f32 %v267_v21, %v195_v18  ;;  %v2444_v21 = vmul.f32 %v2205_v33, %v2168_v13  ;;  %v335_v15 = vperm.slane %v2277_v3, 7  ;;  %v2459_v35 = vperm.slane %v332_v60, 3 }
  0x96   :  { %4426 = vst [vmem:[#allocation36_spill] sm:$0xff] %v2396_v2  ;;  %v2461_v36 = vperm.slane %v333_v47, 3  ;;  %v76_v37 = vmul.f32 %v2217_v39, %v2308_v29  ;;  %v252_v14 = vmul.f32 %v2328_v0, %v2193_v25  ;;  %v2467_v9 = vperm.slane %v334_v42, 3 }
  0x97   :  { %4428 = vst [vmem:[#allocation38_spill] sm:$0xff] %v2422_v26  ;;  %v2454_v43 = vpop.permute.xlu0 %422  ;;  %v77_v12 = vmul.f32 %v2285_v8, %v2308_v29  ;;  %v253_v42 = vmul.f32 %v2330_v1, %v2193_v25 }
  0x98   :  { %v2432_v52 = vpop.permute.xlu1 %313  ;;  %4429 = vst [vmem:[#allocation39_spill] sm:$0xff] %v2444_v21  ;;  %v180_v33 = vadd.f32 %v4443_v34, %v76_v37 }
  0x99   :  { %v352_v30 = vmul.f32 %v2351_v19, %v2432_v52  ;;  %v353_v50 = vmul.f32 %v2353_v20, %v2432_v52  ;;  %v354_v55 = vmul.f32 %v2408_v10, %v2432_v52  ;;  %v355_v56 = vmul.f32 %v2425_v17, %v2432_v52  ;;  %4430 = vst [vmem:[#allocation40_spill] sm:$0xff] %v2448_v41 }
  0x9a   :  { %4431 = vst [vmem:[#allocation41_spill] sm:$0xff] %v2459_v35 }
  0x9b   :  { %v384_v51 = vadd.f32 %v352_v30, %v280_v48  ;;  %v385_v54 = vadd.f32 %v353_v50, %v281_v53  ;;  %v386_v11 = vadd.f32 %v354_v55, %v282_v16  ;;  %v387_v28 = vadd.f32 %v355_v56, %v283_v63  ;;  %4432 = vst [vmem:[#allocation42_spill] sm:$0xff] %v2461_v36  ;;  %v4434_v63 = vld [vmem:[#allocation5_spill] sm:$0xff] }
  0x9c   :  { %4433 = vst [vmem:[#allocation43_spill] sm:$0xff] %v2467_v9  ;;  %v78_v48 = vmul.f32 %v2311_v44, %v2308_v29  ;;  %v254_v53 = vmul.f32 %v2336_v6, %v2193_v25  ;;  %v255_v16 = vmul.f32 %v2338_v7, %v2193_v25  ;;  %v2493_v30 = vmul.f32 %v4434_v63, %v2267_v62 }
  0x9d   :  { %v2470_v18 = vadd.f32 %v2454_v43, %v384_v51  ;;  %v2475_v3 = vadd.f32 %v2454_v43, %v385_v54  ;;  %v2478_v60 = vadd.f32 %v2454_v43, %v386_v11  ;;  %v2481_v47 = vadd.f32 %v2454_v43, %v387_v28  ;;  %v4438_v51 = vld [vmem:[#allocation12_spill] sm:$0xff]  ;;  %v4439_v54 = vld [vmem:[#allocation7_spill] sm:$0xff] }
  0x9e   :  { %4435 = vst [vmem:[#allocation44_spill] sm:$0xff] %v2493_v30  ;;  %v2497_v50 = vmul.f32 %v2217_v39, %v2267_v62  ;;  %v79_v55 = vmul.f32 %v2313_v45, %v2308_v29  ;;  %v2501_v56 = vperm.slane %v335_v15, 3  ;;  %v2505_v11 = vmul.f32 %v4439_v54, %v4438_v51  ;;  %v4441_v28 = vld [vmem:[#allocation8_spill] sm:$0xff] }
  0x9f   :  { %v2509_v25 = vmul.f32 %v4441_v28, %v4438_v51  ;;  %v2513_v30 = vmul.f32 0.70710677, %v2470_v18  ;;  %v181_v62 = vadd.f32 %v149_v40, %v77_v12  ;;  %v2519_v29 = vmul.f32 0.70710677, %v2478_v60  ;;  %v2534_v12 = vpop.permute.xlu2 %317 }
  0xa0   :  { %4436 = vst [vmem:[#allocation45_spill] sm:$0xff] %v2497_v50  ;;  %v2516_v50 = vmul.f32 0.70710677, %v2475_v3  ;;  %v2522_v15 = vmul.f32 0.70710677, %v2481_v47  ;;  %v2530_v34 = vmul.f32 %v2281_v5, %v4438_v51  ;;  %v182_v37 = vadd.f32 %v150_v61, %v78_v48 }
  0xa1   :  { %4437 = vst [vmem:[#allocation46_spill] sm:$0xff] %v2501_v56  ;;  %v536_v40 = vmul.f32 %v2513_v30, %v2513_v30  ;;  %v616_v49 = vmul.f32 %v2519_v29, %v2519_v29  ;;  %v2548_v61 = vmul.f32 %v2353_v20, %v2534_v12  ;;  %v284_v48 = vadd.f32 %v252_v14, %v180_v33 }
  0xa2   :  { %4440 = vst [vmem:[#allocation47_spill] sm:$0xff] %v2505_v11  ;;  %v4444_v11 = vld [vmem:[#allocation13_spill] sm:$0xff]  ;;  %v576_v58 = vmul.f32 %v2516_v50, %v2516_v50  ;;  %v286_v44 = vadd.f32 %v254_v53, %v182_v37 }
  0xa3   :  { %4442 = vst [vmem:[#allocation48_spill] sm:$0xff] %v2509_v25  ;;  %v2526_v59 = vmul.f32 %v4444_v11, %v4438_v51  ;;  %v183_v25 = vadd.f32 %v151_v32, %v79_v55  ;;  %v2544_v51 = vmul.f32 %v2351_v19, %v2534_v12  ;;  %v285_v32 = vadd.f32 %v253_v42, %v181_v62 }
  0xa4   :  { %4446 = vst [vmem:[#allocation49_spill] sm:$0xff] %v2530_v34  ;;  %v2550_v34 = vmin.f32 %v536_v40, 16.0  ;;  %v356_v55 = vmul.f32 %v2459_v35, %v2432_v52  ;;  %v2554_v13 = vmin.f32 %v576_v58, 16.0  ;;  %v2556_v45 = vmin.f32 %v616_v49, 16.0 }
  0xa5   :  { %4445 = vst [vmem:[#allocation29_spill] sm:$0xff] %v2526_v59  ;;  %v656_v59 = vmul.f32 %v2522_v15, %v2522_v15  ;;  %v287_v38 = vadd.f32 %v255_v16, %v183_v25  ;;  %v357_v58 = vmul.f32 %v2461_v36, %v2432_v52 }
  0xa6   :  { %4447 = vst [vmem:[#allocation50_spill] sm:$0xff] %v2534_v12  ;;  %v538_v8 = vmul.f32 2.1237322e-06, %v2550_v34  ;;  %v578_v33 = vmul.f32 2.1237322e-06, %v2554_v13  ;;  %v388_v37 = vadd.f32 %v356_v55, %v284_v48 }
  0xa7   :  { %4448 = vst [vmem:[#allocation51_spill] sm:$0xff] %v2544_v51  ;;  %v549_v51 = vmul.f32 3.8918573e-05, %v2550_v34  ;;  %v2560_v2 = vmin.f32 %v656_v59, 16.0  ;;  %v589_v14 = vmul.f32 3.8918573e-05, %v2554_v13 }
  0xa8   :  { %4449 = vst [vmem:[#allocation52_spill] sm:$0xff] %v2548_v61  ;;  %v618_v62 = vmul.f32 2.1237322e-06, %v2556_v45  ;;  %v539_v42 = vadd.f32 0.00028619796, %v538_v8 }
  0xa9   :  { %v550_v49 = vadd.f32 0.001143296, %v549_v51  ;;  %v629_v53 = vmul.f32 3.8918573e-05, %v2556_v45  ;;  %v579_v40 = vadd.f32 0.00028619796, %v578_v33  ;;  %v268_v33 = vmul.f32 %v2328_v0, %v2257_v57 }
  0xaa   :  { %v590_v61 = vadd.f32 0.001143296, %v589_v14  ;;  %v619_v4 = vadd.f32 0.00028619796, %v618_v62  ;;  %v540_v59 = vmul.f32 %v539_v42, %v2550_v34  ;;  %v658_v41 = vmul.f32 2.1237322e-06, %v2560_v2 }
  0xab   :  { %v551_v16 = vmul.f32 %v550_v49, %v2550_v34  ;;  %v630_v25 = vadd.f32 0.001143296, %v629_v53  ;;  %v580_v21 = vmul.f32 %v579_v40, %v2554_v13  ;;  %v669_v51 = vmul.f32 3.8918573e-05, %v2560_v2 }
  0xac   :  { %v591_v39 = vmul.f32 %v590_v61, %v2554_v13  ;;  %v620_v8 = vmul.f32 %v619_v4, %v2556_v45  ;;  %v541_v63 = vadd.f32 0.0036580483, %v540_v59  ;;  %v389_v14 = vadd.f32 %v357_v58, %v285_v32 }
  0xad   :  { %v552_v48 = vadd.f32 0.014752088, %v551_v16  ;;  %v631_v55 = vmul.f32 %v630_v25, %v2556_v45  ;;  %v659_v42 = vadd.f32 0.00028619796, %v658_v41  ;;  %v2580_v49 = vmul.f32 %v2330_v1, %v2257_v57 }
  0xae   :  { %v592_v62 = vadd.f32 0.014752088, %v591_v39  ;;  %v2583_v61 = vadd.f32 %v2454_v43, %v388_v37  ;;  %v581_v53 = vadd.f32 0.0036580483, %v580_v21  ;;  %v542_v59 = vmul.f32 %v541_v63, %v2550_v34 }
  0xaf   :  { %v553_v4 = vmul.f32 %v552_v48, %v2550_v34  ;;  %v632_v40 = vadd.f32 0.014752088, %v631_v55  ;;  %v621_v25 = vadd.f32 0.0036580483, %v620_v8  ;;  %v670_v0 = vadd.f32 0.001143296, %v669_v51 }
  0xb0   :  { %v593_v16 = vmul.f32 %v592_v62, %v2554_v13  ;;  %v358_v39 = vmul.f32 %v2467_v9, %v2432_v52  ;;  %v359_v41 = vmul.f32 %v2501_v56, %v2432_v52  ;;  %v2594_v37 = vadd.f32 %v2454_v43, %v389_v14 }
  0xb1   :  { %v554_v32 = vadd.f32 0.112945676, %v553_v4  ;;  %v633_v58 = vmul.f32 %v632_v40, %v2556_v45  ;;  %v660_v48 = vmul.f32 %v659_v42, %v2560_v2  ;;  %v671_v63 = vmul.f32 %v670_v0, %v2560_v2 }
  0xb2   :  { %v594_v21 = vadd.f32 0.112945676, %v593_v16  ;;  %v2599_v8 = vmul.f32 0.70710677, %v2583_v61  ;;  %v582_v55 = vmul.f32 %v581_v53, %v2554_v13  ;;  %v543_v52 = vadd.f32 0.05243302, %v542_v59 }
  0xb3   :  { %v555_v51 = vmul.f32 %v554_v32, %v2550_v34  ;;  %v634_v62 = vadd.f32 0.112945676, %v633_v58  ;;  %v622_v40 = vmul.f32 %v621_v25, %v2556_v45  ;;  %v672_v14 = vadd.f32 0.014752088, %v671_v63 }
  0xb4   :  { %v595_v4 = vmul.f32 %v594_v21, %v2554_v13  ;;  %v390_v1 = vadd.f32 %v358_v39, %v286_v44  ;;  %v391_v16 = vadd.f32 %v359_v41, %v287_v38  ;;  %v2607_v0 = vmul.f32 0.70710677, %v2594_v37 }
  0xb5   :  { %v556_v31 = vadd.f32 0.4994258, %v555_v51  ;;  %v635_v42 = vmul.f32 %v634_v62, %v2556_v45  ;;  %v661_v11 = vadd.f32 0.0036580483, %v660_v48  ;;  %v673_v32 = vmul.f32 %v672_v14, %v2560_v2 }
  0xb6   :  { %v596_v5 = vadd.f32 0.4994258, %v595_v4  ;;  %v583_v59 = vadd.f32 0.05243302, %v582_v55  ;;  %v696_v25 = vmul.f32 %v2599_v8, %v2599_v8  ;;  %v544_v44 = vmul.f32 %v543_v52, %v2550_v34 }
  0xb7   :  { %v557_v53 = vmul.f32 %v556_v31, %v2550_v34  ;;  %v636_v58 = vadd.f32 0.4994258, %v635_v42  ;;  %v623_v39 = vadd.f32 0.05243302, %v622_v40  ;;  %v674_v41 = vadd.f32 0.112945676, %v673_v32 }
  0xb8   :  { %v597_v38 = vmul.f32 %v596_v5, %v2554_v13  ;;  %v2619_v48 = vmul.f32 %v2336_v6, %v2257_v57  ;;  %v2623_v31 = vmul.f32 %v2338_v7, %v2257_v57  ;;  %v2626_v63 = vadd.f32 %v268_v33, %v2415_v22 }
  0xb9   :  { %v2615_v21 = vadd.f32 1.0, %v557_v53  ;;  %v637_v55 = vmul.f32 %v636_v58, %v2556_v45  ;;  %v662_v5 = vmul.f32 %v661_v11, %v2560_v2  ;;  %v675_v62 = vmul.f32 %v674_v41, %v2560_v2 }
  0xba   :  { %4450 = vst [vmem:[#allocation53_spill] sm:$0xff] %v2619_v48  ;;  %v2628_v51 = vadd.f32 1.0, %v597_v38  ;;  %v446_v52 = vadd.f32 %v2454_v43, %v390_v1  ;;  %v584_v4 = vmul.f32 %v583_v59, %v2554_v13  ;;  %v2636_v40 = vmin.f32 %v696_v25, 16.0 }
  0xbb   :  { %4451 = vst [vmem:[#allocation54_spill] sm:$0xff] %v2623_v31  ;;  %2049 = vrcp.f32 %v2615_v21  ;;  %v447_v57 = vadd.f32 %v2454_v43, %v391_v16  ;;  %v545_v22 = vadd.f32 0.18741608, %v544_v44  ;;  %v624_v33 = vmul.f32 %v623_v39, %v2556_v45  ;;  %v2671_v39 = vpop.permute.xlu1 %321 }
  0xbc   :  { %v736_v14 = vmul.f32 %v2607_v0, %v2607_v0  ;;  %v2643_v11 = vmul.f32 0.5, %v2470_v18  ;;  %v2646_v42 = vmul.f32 0.5, %v2475_v3  ;;  %v2649_v1 = vmul.f32 0.5, %v2478_v60 }
  0xbd   :  { %2051 = vrcp.f32 %v2628_v51  ;;  %v2653_v32 = vmul.f32 0.5, %v2481_v47  ;;  %v2655_v43 = vadd.f32 1.0, %v637_v55  ;;  %v663_v16 = vadd.f32 0.05243302, %v662_v5 }
  0xbe   :  { %v676_v53 = vadd.f32 0.4994258, %v675_v62  ;;  %v585_v59 = vadd.f32 0.18741608, %v584_v4  ;;  %v698_v58 = vmul.f32 2.1237322e-06, %v2636_v40  ;;  %v2661_v3 = vadd.f32 %v2580_v49, %v2418_v23 }
  0xbf   :  { %v709_v18 = vmul.f32 3.8918573e-05, %v2636_v40  ;;  %v2664_v60 = vmul.f32 0.5, %v2583_v61  ;;  %v546_v25 = vmul.f32 %v545_v22, %v2550_v34  ;;  %v625_v47 = vadd.f32 0.18741608, %v624_v33 }
  0xc0   :  { %4452 = vst [vmem:[#allocation55_spill] sm:$0xff] %v2661_v3  ;;  %v2667_v44 = vmin.f32 %v736_v14, 16.0  ;;  %2053 = vrcp.f32 %v2655_v43  ;;  %v677_v41 = vmul.f32 %v676_v53, %v2560_v2  ;;  %v699_v55 = vadd.f32 0.00028619796, %v698_v58 }
  0xc1   :  { %v2669_v38 = vpop.eup %2049  ;;  %v710_v5 = vadd.f32 0.001143296, %v709_v18  ;;  %v2676_v23 = vmul.f32 0.5, %v2594_v37  ;;  %v2678_v49 = vmul.f32 0.5, %v446_v52  ;;  %v2680_v61 = vmul.f32 0.5, %v447_v57 }
  0xc2   :  { %v2682_v34 = vmul.f32 0.70710677, %v446_v52  ;;  %v560_v4 = vmul.f32 %v2669_v38, %v2615_v21  ;;  %v586_v22 = vmul.f32 %v585_v59, %v2554_v13  ;;  %v664_v33 = vmul.f32 %v663_v16, %v2560_v2 }
  0xc3   :  { %4453 = vst [vmem:[#allocation56_spill] sm:$0xff] %v2680_v61  ;;  %v2684_v62 = vpop.eup %2051  ;;  %v2690_v14 = vadd.f32 1.0, %v677_v41  ;;  %v2694_v37 = vmul.f32 %v2351_v19, %v2671_v39  ;;  %v626_v53 = vmul.f32 %v625_v47, %v2556_v45  ;;  %v700_v52 = vmul.f32 %v699_v55, %v2636_v40 }
  0xc4   :  { %v711_v58 = vmul.f32 %v710_v5, %v2636_v40  ;;  %v2701_v18 = vmul.f32 %v2353_v20, %v2671_v39  ;;  %v2705_v13 = vmul.f32 %v2408_v10, %v2671_v39  ;;  %v547_v16 = vadd.f32 1.1283791, %v546_v25 }
  0xc5   :  { %v738_v59 = vmul.f32 2.1237322e-06, %v2667_v44  ;;  %v2708_v41 = vmul.f32 0.70710677, %v447_v57  ;;  %v600_v45 = vmul.f32 %v2684_v62, %v2628_v51  ;;  %v776_v55 = vmul.f32 %v2682_v34, %v2682_v34 }
  0xc6   :  { %v712_v47 = vadd.f32 0.014752088, %v711_v58  ;;  %v2714_v5 = vpop.eup %2053  ;;  %v561_v20 = vsub.f32 1.0, %v560_v4  ;;  %v587_v19 = vadd.f32 1.1283791, %v586_v22  ;;  %2055 = vrcp.f32 %v2690_v14 }
  0xc7   :  { %v665_v7 = vadd.f32 0.18741608, %v664_v33  ;;  %v570_v25 = vand.u32 2147483648, %v2615_v21  ;;  %v627_v6 = vadd.f32 1.1283791, %v626_v53  ;;  %v2720_v54 = vmul.f32 %v547_v16, %v2513_v30 }
  0xc8   :  { %v701_v28 = vadd.f32 0.0036580483, %v700_v52  ;;  %v713_v57 = vmul.f32 %v712_v47, %v2636_v40  ;;  %v568_v58 = vand.u32 2147483647, %v2615_v21  ;;  %v610_v10 = vand.u32 2147483648, %v2628_v51 }
  0xc9   :  { %v739_v12 = vadd.f32 0.00028619796, %v738_v59  ;;  %v601_v56 = vsub.f32 1.0, %v600_v45  ;;  %v640_v4 = vmul.f32 %v2714_v5, %v2655_v43  ;;  %v749_v33 = vmul.f32 3.8918573e-05, %v2667_v44 }
  0xca   :  { %v714_v22 = vadd.f32 0.112945676, %v713_v57  ;;  %v562_v53 = vmul.f32 %v2669_v38, %v561_v20  ;;  %vm564_vm0 = vweird.f32 %v2615_v21  ;;  %v2730_v52 = vmul.f32 %v587_v19, %v2516_v50 }
  0xcb   :  { %v608_v30 = vand.u32 2147483647, %v2628_v51  ;;  %v571_v16 = vor.u32 1.1754944e-38, %v570_v25  ;;  %vm604_vm1 = vweird.f32 %v2628_v51  ;;  %v2735_v59 = vmul.f32 %v627_v6, %v2519_v29 }
  0xcc   :  { %v666_v45 = vmul.f32 %v665_v7, %v2560_v2  ;;  %v702_v47 = vmul.f32 %v701_v28, %v2636_v40  ;;  %v2739_v57 = vpop.eup %2055  ;;  %vm2741_vm2 = vcmp.eq.f32.partialorder %v568_v58, 8.507059e+37  ;;  %v611_v19 = vor.u32 1.1754944e-38, %v610_v10 }
  0xcd   :  { %v715_v50 = vmul.f32 %v714_v22, %v2636_v40  ;;  %v740_v25 = vmul.f32 %v739_v12, %v2667_v44  ;;  %v2747_v9 = vmin.f32 %v776_v55, 16.0  ;;  %v602_v6 = vmul.f32 %v2684_v62, %v601_v56 }
  0xce   :  { %v641_v29 = vsub.f32 1.0, %v640_v4  ;;  %v648_v7 = vand.u32 2147483647, %v2655_v43  ;;  %v750_v2 = vadd.f32 0.001143296, %v749_v33  ;;  %v563_v28 = vadd.f32 %v2669_v38, %v562_v53 }
  0xcf   :  { %vm565_vm3 = vweird.f32 %v2669_v38  ;;  %v650_v58 = vand.u32 2147483648, %v2655_v43  ;;  %v716_v3 = vadd.f32 0.4994258, %v715_v50  ;;  %vm644_vm4 = vweird.f32 %v2655_v43 }
  0xd0   :  { %v667_v10 = vadd.f32 1.1283791, %v666_v45  ;;  %v680_v12 = vmul.f32 %v2739_v57, %v2690_v14  ;;  %v703_v55 = vadd.f32 0.05243302, %v702_v47  ;;  %v751_v56 = vmul.f32 %v750_v2, %v2667_v44  ;;  %vm2767_vm7 = vmor %vm564_vm0, %vm565_vm3 }
  0xd1   :  { %vm605_vm5 = vweird.f32 %v2684_v62  ;;  %vm2759_vm6 = vcmp.eq.f32.partialorder %v608_v30, 8.507059e+37  ;;  %v717_v22 = vmul.f32 %v716_v3, %v2636_v40  ;;  %v741_v33 = vadd.f32 0.0036580483, %v740_v25 }
  0xd2   :  { %v778_v53 = vmul.f32 2.1237322e-06, %v2747_v9  ;;  %v603_v47 = vadd.f32 %v2684_v62, %v602_v6  ;;  %v642_v50 = vmul.f32 %v2714_v5, %v641_v29  ;;  %v752_v2 = vadd.f32 0.014752088, %v751_v56  ;;  %vm2786_vm8 = vmor %vm604_vm1, %vm605_vm5 }
  0xd3   :  { %v789_v30 = vmul.f32 3.8918573e-05, %v2747_v9  ;;  %v567_v3 = vsel %vm2767_vm7, %v2669_v38, %v563_v28  ;;  %v690_v25 = vand.u32 2147483648, %v2690_v14  ;;  %v2778_v61 = vadd.f32 1.0, %v717_v22 }
  0xd4   :  { %v779_v21 = vadd.f32 0.00028619796, %v778_v53  ;;  %v681_v31 = vsub.f32 1.0, %v680_v12  ;;  %v704_v26 = vmul.f32 %v703_v55, %v2636_v40  ;;  %v753_v48 = vmul.f32 %v752_v2, %v2667_v44 }
  0xd5   :  { %v790_v6 = vadd.f32 0.001143296, %v789_v30  ;;  %vm2790_vm9 = vcmp.eq.f32.partialorder %v648_v7, 8.507059e+37  ;;  %v651_v28 = vor.u32 1.1754944e-38, %v650_v58  ;;  %v2795_v12 = vmul.f32 %v667_v10, %v2522_v15 }
  0xd6   :  { %2057 = vrcp.f32 %v2778_v61  ;;  %v742_v55 = vmul.f32 %v741_v33, %v2667_v44  ;;  %v572_v56 = vsel %vm2741_vm2, %v571_v16, %v567_v3  ;;  %v607_v51 = vsel %vm2786_vm8, %v2684_v62, %v603_v47 }
  0xd7   :  { %v643_v7 = vadd.f32 %v2714_v5, %v642_v50  ;;  %vm645_vm10 = vweird.f32 %v2714_v5  ;;  %vm684_vm11 = vweird.f32 %v2690_v14  ;;  %v754_v58 = vadd.f32 0.112945676, %v753_v48 }
  0xd8   :  { %v780_v15 = vmul.f32 %v779_v21, %v2747_v9  ;;  %v791_v10 = vmul.f32 %v790_v6, %v2747_v9  ;;  %v816_v22 = vmul.f32 %v2708_v41, %v2708_v41  ;;  %v682_v16 = vmul.f32 %v2739_v57, %v681_v31  ;;  %vm2815_vm12 = vmor %vm644_vm4, %vm645_vm10 }
  0xd9   :  { %v688_v20 = vand.u32 2147483647, %v2690_v14  ;;  %v691_v33 = vor.u32 1.1754944e-38, %v690_v25  ;;  %v705_v62 = vadd.f32 0.18741608, %v704_v26  ;;  %v755_v45 = vmul.f32 %v754_v58, %v2667_v44 }
  0xda   :  { %v743_v48 = vadd.f32 0.05243302, %v742_v55  ;;  %v792_v47 = vadd.f32 0.014752088, %v791_v10  ;;  %v2820_v50 = vmin.f32 %v816_v22, 16.0  ;;  %v2823_v2 = vmul.f32 %v572_v56, %v2720_v54 }
  0xdb   :  { %v612_v31 = vsel %vm2759_vm6, %v611_v19, %v607_v51  ;;  %v647_v26 = vsel %vm2815_vm12, %v2714_v5, %v643_v7  ;;  %vm685_vm13 = vweird.f32 %v2739_v57  ;;  %v756_v30 = vadd.f32 0.4994258, %v755_v45 }
  0xdc   :  { %v2831_v43 = vpop.eup %2057  ;;  %v781_v3 = vadd.f32 0.0036580483, %v780_v15  ;;  %v793_v25 = vmul.f32 %v792_v47, %v2747_v9  ;;  %v818_v21 = vmul.f32 2.1237322e-06, %v2820_v50  ;;  %v683_v54 = vadd.f32 %v2739_v57, %v682_v16  ;;  %vm2858_vm15 = vmor %vm684_vm11, %vm685_vm13 }
  0xdd   :  { %vm2836_vm14 = vcmp.eq.f32.partialorder %v688_v20, 8.507059e+37  ;;  %v706_v19 = vmul.f32 %v705_v62, %v2636_v40  ;;  %v720_v5 = vmul.f32 %v2831_v43, %v2778_v61  ;;  %v829_v4 = vmul.f32 3.8918573e-05, %v2820_v50  ;;  %v2907_v62 = vpop.permute.xlu2 %325 }
  0xde   :  { %v744_v29 = vmul.f32 %v743_v48, %v2667_v44  ;;  %v757_v55 = vmul.f32 %v756_v30, %v2667_v44  ;;  %v794_v56 = vadd.f32 0.112945676, %v793_v25  ;;  %v819_v51 = vadd.f32 0.00028619796, %v818_v21  ;;  %v4471_v48 = vld [vmem:[#allocation10_spill] sm:$0xff] }
  0xdf   :  { %v613_v7 = vmul.f32 %v612_v31, %v2730_v52  ;;  %v652_v58 = vsel %vm2790_vm9, %v651_v28, %v647_v26  ;;  %v721_v15 = vsub.f32 1.0, %v720_v5  ;;  %v830_v10 = vadd.f32 0.001143296, %v829_v4  ;;  %v4470_v28 = vld [vmem:[#allocation9_spill] sm:$0xff] }
  0xe0   :  { %v2849_v22 = vadd.f32 1.0, %v757_v55  ;;  %v782_v40 = vmul.f32 %v781_v3, %v2747_v9  ;;  %v795_v16 = vmul.f32 %v794_v56, %v2747_v9  ;;  %v820_v20 = vmul.f32 %v819_v51, %v2820_v50  ;;  %4474 = vst [vmem:[#allocation9_spill] sm:$0xff] %v2907_v62 }
  0xe1   :  { %v722_v52 = vmul.f32 %v2831_v43, %v721_v15  ;;  %v831_v38 = vmul.f32 %v830_v10, %v2820_v50  ;;  %v2866_v53 = vadd.f32 %v2694_v37, %v4470_v28  ;;  %v2870_v45 = vadd.f32 %v2701_v18, %v4471_v48 }
  0xe2   :  { %v687_v14 = vsel %vm2858_vm15, %v2739_v57, %v683_v54  ;;  %v707_v47 = vadd.f32 1.1283791, %v706_v19  ;;  %v745_v31 = vadd.f32 0.18741608, %v744_v29  ;;  %2059 = vrcp.f32 %v2849_v22 }
  0xe3   :  { %v723_v26 = vadd.f32 %v2831_v43, %v722_v52  ;;  %vm725_vm0 = vweird.f32 %v2831_v43  ;;  %v796_v30 = vadd.f32 0.4994258, %v795_v16  ;;  %v821_v3 = vadd.f32 0.0036580483, %v820_v20 }
  0xe4   :  { %v730_v37 = vand.u32 2147483648, %v2778_v61  ;;  %v783_v25 = vadd.f32 0.05243302, %v782_v40  ;;  %v832_v21 = vadd.f32 0.014752088, %v831_v38  ;;  %v2881_v18 = vadd.f32 %v2705_v13, %v2428_v27 }
  0xe5   :  { %vm724_vm1 = vweird.f32 %v2778_v61  ;;  %v728_v57 = vand.u32 2147483647, %v2778_v61  ;;  %v797_v54 = vmul.f32 %v796_v30, %v2747_v9  ;;  %v822_v19 = vmul.f32 %v821_v3, %v2820_v50 }
  0xe6   :  { %v2001_v5 = vclamps-f32 %v2823_v2, 1.0  ;;  %v2002_v4 = vclamps-f32 %v613_v7, 1.0  ;;  %v692_v29 = vsel %vm2836_vm14, %v691_v33, %v687_v14  ;;  %vm2890_vm2 = vmor %vm724_vm1, %vm725_vm0  ;;  %v833_v27 = vmul.f32 %v832_v21, %v2820_v50 }
  0xe7   :  { %v727_v61 = vsel %vm2890_vm2, %v2831_v43, %v723_v26  ;;  %v746_v13 = vmul.f32 %v745_v31, %v2667_v44  ;;  %v2899_v56 = vadd.f32 1.0, %v797_v54  ;;  %v823_v51 = vadd.f32 0.05243302, %v822_v19 }
  0xe8   :  { %v2060_v2 = vpop.eup %2059  ;;  %v653_v7 = vmul.f32 %v652_v58, %v2735_v59  ;;  %v731_v6 = vor.u32 1.1754944e-38, %v730_v37  ;;  %v784_v33 = vmul.f32 %v783_v25, %v2747_v9  ;;  %v834_v15 = vadd.f32 0.112945676, %v833_v27 }
  0xe9   :  { %v693_v10 = vmul.f32 %v692_v29, %v2795_v12  ;;  %v708_v40 = vmul.f32 %v707_v47, %v2599_v8  ;;  %vm729_vm3 = vcmp.eq.f32.partialorder %v728_v57, 8.507059e+37  ;;  %v760_v16 = vmul.f32 %v2060_v2, %v2849_v22 }
  0xea   :  { %v732_v43 = vsel %vm729_vm3, %v731_v6, %v727_v61  ;;  %2061 = vrcp.f32 %v2899_v56  ;;  %v1816_v44 = vadd.f32 1.0, %v2001_v5  ;;  %v1817_v20 = vadd.f32 1.0, %v2002_v4 }
  0xeb   :  { %v747_v52 = vadd.f32 1.1283791, %v746_v13  ;;  %v761_v59 = vsub.f32 1.0, %v760_v16  ;;  %v824_v58 = vmul.f32 %v823_v51, %v2820_v50  ;;  %v835_v38 = vmul.f32 %v834_v15, %v2820_v50  ;;  %v2931_v51 = vpop.permute.xlu2 %432 }
  0xec   :  { %v2003_v28 = vclamps-f32 %v653_v7, 1.0  ;;  %v768_v12 = vand.u32 2147483647, %v2849_v22  ;;  %v770_v8 = vand.u32 2147483648, %v2849_v22  ;;  %v785_v48 = vadd.f32 0.18741608, %v784_v33 }
  0xed   :  { %v733_v14 = vmul.f32 %v732_v43, %v708_v40  ;;  %v762_v47 = vmul.f32 %v2060_v2, %v761_v59  ;;  %vm765_vm4 = vweird.f32 %v2060_v2  ;;  %v836_v31 = vadd.f32 0.4994258, %v835_v38 }
  0xee   :  { %v2004_v26 = vclamps-f32 %v693_v10, 1.0  ;;  %v2914_v30 = vmul.f32 %v1816_v44, %v2643_v11  ;;  %v2917_v3 = vmul.f32 %v1817_v20, %v2646_v42  ;;  %v371_v37 = vmul.f32 %v2425_v17, %v2671_v39 }
  0xef   :  { %v763_v25 = vadd.f32 %v2060_v2, %v762_v47  ;;  %vm764_vm5 = vweird.f32 %v2849_v22  ;;  %v825_v21 = vadd.f32 0.18741608, %v824_v58  ;;  %v837_v57 = vmul.f32 %v836_v31, %v2820_v50 }
  0xf0   :  { %4475 = vst [vmem:[#allocation10_spill] sm:$0xff] %v2914_v30  ;;  %v2062_v54 = vpop.eup %2061  ;;  %v748_v19 = vmul.f32 %v747_v52, %v2607_v0  ;;  %vm766_vm6 = vmor %vm764_vm5, %vm765_vm4  ;;  %v771_v5 = vor.u32 1.1754944e-38, %v770_v8  ;;  %v786_v11 = vmul.f32 %v785_v48, %v2747_v9  ;;  %v1818_v4 = vadd.f32 1.0, %v2003_v28 }
  0xf1   :  { %4476 = vst [vmem:[#allocation57_spill] sm:$0xff] %v2917_v3  ;;  %v2005_v29 = vclamps-f32 %v733_v14, 1.0  ;;  %v767_v42 = vsel %vm766_vm6, %v2060_v2, %v763_v25  ;;  %vm769_vm7 = vcmp.eq.f32.partialorder %v768_v12, 8.507059e+37  ;;  %v800_v55 = vmul.f32 %v2062_v54, %v2899_v56 }
  0xf2   :  { %v772_v27 = vsel %vm769_vm7, %v771_v5, %v767_v42  ;;  %v2926_v61 = vadd.f32 1.0, %v837_v57  ;;  %v1880_v22 = vadd.f32 %v2917_v3, %v2914_v30  ;;  %v403_v13 = vadd.f32 %v371_v37, %v2430_v46 }
  0xf3   :  { %v773_v0 = vmul.f32 %v772_v27, %v748_v19  ;;  %v801_v7 = vsub.f32 1.0, %v800_v55  ;;  %v810_v9 = vand.u32 2147483648, %v2899_v56  ;;  %v826_v6 = vmul.f32 %v825_v21, %v2820_v50 }
  0xf4   :  { %v787_v2 = vadd.f32 1.1283791, %v786_v11  ;;  %2063 = vrcp.f32 %v2926_v61  ;;  %v1819_v33 = vadd.f32 1.0, %v2004_v26  ;;  %v2937_v15 = vmul.f32 %v1818_v4, %v2649_v1 }
  0xf5   :  { %v802_v10 = vmul.f32 %v2062_v54, %v801_v7  ;;  %vm805_vm8 = vweird.f32 %v2062_v54  ;;  %v808_v40 = vand.u32 2147483647, %v2899_v56  ;;  %v1820_v46 = vadd.f32 1.0, %v2005_v29 }
  0xf6   :  { %4477 = vst [vmem:[#allocation58_spill] sm:$0xff] %v2937_v15  ;;  %vm804_vm9 = vweird.f32 %v2899_v56  ;;  %v1881_v16 = vadd.f32 %v1880_v22, %v2937_v15  ;;  %v2944_v43 = vmul.f32 %v2459_v35, %v2671_v39  ;;  %v2948_v50 = vadd.f32 %v2931_v51, %v2866_v53 }
  0xf7   :  { %v2006_v44 = vclamps-f32 %v773_v0, 1.0  ;;  %v803_v1 = vadd.f32 %v2062_v54, %v802_v10  ;;  %v811_v20 = vor.u32 1.1754944e-38, %v810_v9  ;;  %v827_v52 = vadd.f32 1.1283791, %v826_v6  ;;  %vm806_vm10 = vmor %vm804_vm9, %vm805_vm8 }
  0xf8   :  { %v2951_v59 = vmul.f32 %v1819_v33, %v2653_v32  ;;  %v2955_v56 = vadd.f32 %v2931_v51, %v2870_v45  ;;  %v2959_v58 = vadd.f32 %v2931_v51, %v2881_v18  ;;  %v2962_v38 = vadd.f32 %v2931_v51, %v403_v13 }
  0xf9   :  { %v788_v53 = vmul.f32 %v787_v2, %v2682_v34  ;;  %v807_v28 = vsel %vm806_vm10, %v2062_v54, %v803_v1  ;;  %vm809_vm11 = vcmp.eq.f32.partialorder %v808_v40, 8.507059e+37  ;;  %v2966_v12 = vmul.f32 %v1820_v46, %v2664_v60 }
  0xfa   :  { %4478 = vst [vmem:[#allocation59_spill] sm:$0xff] %v2951_v59  ;;  %v2064_v32 = vpop.eup %2063  ;;  %v812_v8 = vsel %vm809_vm11, %v811_v20, %v807_v28  ;;  %v848_v48 = vand.u32 2147483647, %v2926_v61  ;;  %v1882_v45 = vadd.f32 %v1881_v16, %v2951_v59  ;;  %v2971_v14 = vmul.f32 0.70710677, %v2948_v50 }
  0xfb   :  { %4479 = vst [vmem:[#allocation60_spill] sm:$0xff] %v2966_v12  ;;  %v813_v18 = vmul.f32 %v812_v8, %v788_v53  ;;  %v828_v47 = vmul.f32 %v827_v52, %v2708_v41  ;;  %v840_v31 = vmul.f32 %v2064_v32, %v2926_v61  ;;  %v1821_v34 = vadd.f32 1.0, %v2006_v44 }
  0xfc   :  { %v2976_v26 = vmul.f32 0.70710677, %v2955_v56  ;;  %v2979_v60 = vmul.f32 0.70710677, %v2959_v58  ;;  %v2982_v37 = vmul.f32 0.70710677, %v2962_v38  ;;  %v1176_v25 = vmul.f32 %v2971_v14, %v2971_v14 }
  0xfd   :  { %v2007_v21 = vclamps-f32 %v813_v18, 1.0  ;;  %v841_v57 = vsub.f32 1.0, %v840_v31  ;;  %vm844_vm12 = vweird.f32 %v2926_v61  ;;  %v850_v41 = vand.u32 2147483648, %v2926_v61 }
  0xfe   :  { %vm2988_vm13 = vcmp.eq.f32.partialorder %v848_v48, 8.507059e+37  ;;  %v1883_v19 = vadd.f32 %v1882_v45, %v2966_v12  ;;  %v2993_v5 = vmin.f32 %v1176_v25, 16.0  ;;  %v1216_v11 = vmul.f32 %v2976_v26, %v2976_v26 }
  0xff   :  { %v842_v4 = vmul.f32 %v2064_v32, %v841_v57  ;;  %vm845_vm14 = vweird.f32 %v2064_v32  ;;  %v1256_v29 = vmul.f32 %v2979_v60, %v2979_v60  ;;  %v1296_v42 = vmul.f32 %v2982_v37, %v2982_v37 }
 0x100   :  { %v3002_v55 = vmul.f32 %v1821_v34, %v2676_v23  ;;  %v1178_v27 = vmul.f32 2.1237322e-06, %v2993_v5  ;;  %v1189_v22 = vmul.f32 3.8918573e-05, %v2993_v5  ;;  %v3006_v13 = vmin.f32 %v1216_v11, 16.0  ;;  %vm846_vm15 = vmor %vm844_vm12, %vm845_vm14 }
 0x101   :  { %v843_v0 = vadd.f32 %v2064_v32, %v842_v4  ;;  %v851_v7 = vor.u32 1.1754944e-38, %v850_v41  ;;  %v1822_v9 = vadd.f32 1.0, %v2007_v21  ;;  %v3008_v6 = vmin.f32 %v1256_v29, 16.0 }
 0x102   :  { %4482 = vst [vmem:[#allocation61_spill] sm:$0xff] %v3002_v55  ;;  %v1884_v2 = vadd.f32 %v1883_v19, %v3002_v55  ;;  %v1179_v33 = vadd.f32 0.00028619796, %v1178_v27  ;;  %v1190_v10 = vadd.f32 0.001143296, %v1189_v22  ;;  %v3016_v44 = vmin.f32 %v1296_v42, 16.0 }
 0x103   :  { %v1218_v23 = vmul.f32 2.1237322e-06, %v3006_v13  ;;  %v847_v40 = vsel %vm846_vm15, %v2064_v32, %v843_v0  ;;  %v1229_v46 = vmul.f32 3.8918573e-05, %v3006_v13  ;;  %v1258_v16 = vmul.f32 2.1237322e-06, %v3008_v6 }
 0x104   :  { %v852_v1 = vsel %vm2988_vm13, %v851_v7, %v847_v40  ;;  %v1180_v20 = vmul.f32 %v1179_v33, %v2993_v5  ;;  %v1191_v61 = vmul.f32 %v1190_v10, %v2993_v5  ;;  %v1269_v48 = vmul.f32 3.8918573e-05, %v3008_v6  ;;  %v4484_v42 = vld [vmem:[#allocation53_spill] sm:$0xff]  ;;  %v4485_v22 = vld [vmem:[#allocation38_spill] sm:$0xff]  ;;  %v4489_v40 = vld [vmem:[#allocation55_spill] sm:$0xff] }
 0x105   :  { %v1219_v52 = vadd.f32 0.00028619796, %v1218_v23  ;;  %v853_v53 = vmul.f32 %v852_v1, %v828_v47  ;;  %v1230_v28 = vadd.f32 0.001143296, %v1229_v46  ;;  %v1259_v8 = vadd.f32 0.00028619796, %v1258_v16 }
 0x106   :  { %v3024_v32 = vmul.f32 %v1822_v9, %v2678_v49  ;;  %v373_v45 = vmul.f32 %v2461_v36, %v2671_v39  ;;  %v1181_v18 = vadd.f32 0.0036580483, %v1180_v20  ;;  %v1192_v31 = vadd.f32 0.014752088, %v1191_v61  ;;  %v4486_v0 = vld [vmem:[#allocation54_spill] sm:$0xff] }
 0x107   :  { %v2008_v34 = vclamps-f32 %v853_v53, 1.0  ;;  %v1220_v25 = vmul.f32 %v1219_v52, %v3006_v13  ;;  %v1231_v21 = vmul.f32 %v1230_v28, %v3006_v13  ;;  %v1270_v57 = vadd.f32 0.001143296, %v1269_v48  ;;  %v4490_v28 = vld [vmem:[#allocation43_spill] sm:$0xff]  ;;  %v4491_v48 = vld [vmem:[#allocation46_spill] sm:$0xff] }
 0x108   :  { %4483 = vst [vmem:[#allocation62_spill] sm:$0xff] %v3024_v32  ;;  %v1885_v47 = vadd.f32 %v1884_v2, %v3024_v32  ;;  %v404_v41 = vadd.f32 %v2944_v43, %v2626_v63  ;;  %v1193_v54 = vmul.f32 %v1192_v31, %v2993_v5  ;;  %v1298_v49 = vmul.f32 2.1237322e-06, %v3016_v44  ;;  %v4487_v63 = vld [vmem:[#allocation56_spill] sm:$0xff] }
 0x109   :  { %v1823_v19 = vadd.f32 1.0, %v2008_v34  ;;  %v1232_v11 = vadd.f32 0.014752088, %v1231_v21  ;;  %v1260_v4 = vmul.f32 %v1259_v8, %v3008_v6  ;;  %v1271_v29 = vmul.f32 %v1270_v57, %v3008_v6 }
 0x10a   :  { %v302_v27 = vadd.f32 %v4484_v42, %v2420_v24  ;;  %v303_v7 = vadd.f32 %v4486_v0, %v4485_v22  ;;  %v1182_v9 = vmul.f32 %v1181_v18, %v2993_v5  ;;  %v1194_v2 = vadd.f32 0.112945676, %v1193_v54  ;;  %v4493_v42 = vld [vmem:[#allocation37_spill] sm:$0xff] }
 0x10b   :  { %v3043_v43 = vmul.f32 %v1823_v19, %v4487_v63  ;;  %v1221_v33 = vadd.f32 0.0036580483, %v1220_v25  ;;  %v1233_v10 = vmul.f32 %v1232_v11, %v3006_v13  ;;  %v1272_v23 = vadd.f32 0.014752088, %v1271_v29  ;;  %v4492_v29 = vld [vmem:[#allocation50_spill] sm:$0xff] }
 0x10c   :  { %v405_v46 = vadd.f32 %v373_v45, %v4489_v40  ;;  %v460_v16 = vadd.f32 %v2931_v51, %v404_v41  ;;  %v1195_v1 = vmul.f32 %v1194_v2, %v2993_v5  ;;  %v1299_v24 = vadd.f32 0.00028619796, %v1298_v49  ;;  %v4494_v40 = vld [vmem:[#allocation32_spill] sm:$0xff] }
 0x10d   :  { %4488 = vst [vmem:[#allocation53_spill] sm:$0xff] %v3043_v43  ;;  %v1886_v20 = vadd.f32 %v1885_v47, %v3043_v43  ;;  %v1234_v61 = vadd.f32 0.112945676, %v1233_v10  ;;  %v1261_v52 = vadd.f32 0.0036580483, %v1260_v4  ;;  %v1273_v53 = vmul.f32 %v1272_v23, %v3008_v6 }
 0x10e   :  { %v374_v8 = vmul.f32 %v4490_v28, %v2671_v39  ;;  %v375_v18 = vmul.f32 %v4491_v48, %v2671_v39  ;;  %v1183_v31 = vadd.f32 0.05243302, %v1182_v9  ;;  %v1196_v34 = vadd.f32 0.4994258, %v1195_v1 }
 0x10f   :  { %1887 = vadd.xlane.f32.xlu2 %v1886_v20  ;;  %v1222_v45 = vmul.f32 %v1221_v33, %v3006_v13  ;;  %v1235_v25 = vmul.f32 %v1234_v61, %v3006_v13  ;;  %v1274_v21 = vadd.f32 0.112945676, %v1273_v53  ;;  %v1309_v57 = vmul.f32 3.8918573e-05, %v3016_v44 }
 0x110   :  { %v461_v47 = vadd.f32 %v2931_v51, %v405_v46  ;;  %v3059_v41 = vmul.f32 0.70710677, %v460_v16  ;;  %v1197_v54 = vmul.f32 %v1196_v34, %v2993_v5  ;;  %v1300_v49 = vmul.f32 %v1299_v24, %v3016_v44  ;;  %v4495_v46 = vld [vmem:[#allocation7_spill] sm:$0xff]  ;;  %v4496_v24 = vld [vmem:[#allocation8_spill] sm:$0xff] }
 0x111   :  { %v1236_v19 = vadd.f32 0.4994258, %v1235_v25  ;;  %v1262_v39 = vmul.f32 %v1261_v52, %v3008_v6  ;;  %v1275_v11 = vmul.f32 %v1274_v21, %v3008_v6  ;;  %v1310_v4 = vadd.f32 0.001143296, %v1309_v57 }
 0x112   :  { %v3067_v22 = vmul.f32 %v4493_v42, %v4492_v29  ;;  %v406_v0 = vadd.f32 %v374_v8, %v302_v27  ;;  %v407_v9 = vadd.f32 %v375_v18, %v303_v7  ;;  %v3069_v2 = vadd.f32 1.0, %v1197_v54  ;;  %v4497_v8 = vld [vmem:[#allocation13_spill] sm:$0xff] }
 0x113   :  { %v1184_v63 = vmul.f32 %v1183_v31, %v2993_v5  ;;  %v1223_v33 = vadd.f32 0.05243302, %v1222_v45  ;;  %v1276_v10 = vadd.f32 0.4994258, %v1275_v11  ;;  %v1311_v23 = vmul.f32 %v1310_v4, %v3016_v44  ;;  %v4498_v31 = vld [vmem:[#allocation14_spill] sm:$0xff] }
 0x114   :  { %v3075_v1 = vmul.f32 %v4495_v46, %v4494_v40  ;;  %v3079_v20 = vmul.f32 %v4496_v24, %v4494_v40  ;;  %v3081_v61 = vmul.f32 0.70710677, %v461_v47  ;;  %v1237_v27 = vmul.f32 %v1236_v19, %v3006_v13 }
 0x115   :  { %2065 = vrcp.f32 %v3069_v2  ;;  %v1263_v7 = vadd.f32 0.05243302, %v1262_v39  ;;  %v1301_v52 = vadd.f32 0.0036580483, %v1300_v49  ;;  %v1336_v53 = vmul.f32 %v3059_v41, %v3059_v41 }
 0x116   :  { %v3089_v18 = vmul.f32 %v4497_v8, %v4494_v40  ;;  %v3093_v34 = vmul.f32 %v4498_v31, %v4494_v40  ;;  %v1277_v45 = vmul.f32 %v1276_v10, %v3008_v6  ;;  %v1312_v25 = vadd.f32 0.014752088, %v1311_v23 }
 0x117   :  { %v462_v21 = vadd.f32 %v2931_v51, %v406_v0  ;;  %v463_v57 = vadd.f32 %v2931_v51, %v407_v9  ;;  %v1185_v54 = vadd.f32 0.18741608, %v1184_v63  ;;  %v1224_v49 = vmul.f32 %v1223_v33, %v3006_v13 }
 0x118   :  { %v3100_v19 = vmul.f32 0.5, %v2948_v50  ;;  %v3103_v39 = vmul.f32 0.5, %v2955_v56  ;;  %v3105_v11 = vadd.f32 1.0, %v1237_v27  ;;  %v1376_v4 = vmul.f32 %v3081_v61, %v3081_v61 }
 0x119   :  { %v1264_v10 = vmul.f32 %v1263_v7, %v3008_v6  ;;  %v1302_v0 = vmul.f32 %v1301_v52, %v3016_v44  ;;  %v1313_v51 = vmul.f32 %v1312_v25, %v3016_v44  ;;  %v3112_v9 = vmin.f32 %v1336_v53, 16.0  ;;  %v4500_v53 = vld [vmem:[#allocation5_spill] sm:$0xff] }
 0x11a   :  { %v3115_v63 = vmul.f32 0.5, %v2959_v58  ;;  %v3118_v50 = vmul.f32 0.5, %v2962_v38  ;;  %v3120_v56 = vmul.f32 0.5, %v460_v16  ;;  %v3122_v33 = vadd.f32 1.0, %v1277_v45  ;;  %v4499_v16 = vld [vmem:[#allocation33_spill] sm:$0xff] }
 0x11b   :  { %v3124_v23 = vpop.eup %2065  ;;  %v3126_v46 = vmul.f32 0.5, %v461_v47  ;;  %v3128_v24 = vmul.f32 0.5, %v462_v21  ;;  %v1186_v27 = vmul.f32 %v1185_v54, %v2993_v5  ;;  %v1225_v7 = vadd.f32 0.18741608, %v1224_v49 }
 0x11c   :  { %2067 = vrcp.f32 %v3105_v11  ;;  %v1314_v58 = vadd.f32 0.112945676, %v1313_v51  ;;  %v1338_v52 = vmul.f32 2.1237322e-06, %v3112_v9  ;;  %v3133_v38 = vmin.f32 %v1376_v4, 16.0 }
 0x11d   :  { %v3137_v8 = vmul.f32 %v4500_v53, %v4499_v16  ;;  %v1265_v31 = vadd.f32 0.18741608, %v1264_v10  ;;  %v1303_v45 = vadd.f32 0.05243302, %v1302_v0  ;;  %v1349_v47 = vmul.f32 3.8918573e-05, %v3112_v9 }
 0x11e   :  { %v3140_v25 = vmul.f32 0.5, %v463_v57  ;;  %v1200_v5 = vmul.f32 %v3124_v23, %v3069_v2  ;;  %2069 = vrcp.f32 %v3122_v33  ;;  %v1315_v54 = vmul.f32 %v1314_v58, %v3016_v44  ;;  %v4502_v10 = vld [vmem:[#allocation6_spill] sm:$0xff] }
 0x11f   :  { %v3146_v49 = vmul.f32 0.70710677, %v462_v21  ;;  %v1226_v4 = vmul.f32 %v1225_v7, %v3006_v13  ;;  %v1339_v51 = vadd.f32 0.00028619796, %v1338_v52  ;;  %v1350_v53 = vadd.f32 0.001143296, %v1349_v47 }
 0x120   :  { %4501 = vst [vmem:[#allocation38_spill] sm:$0xff] %v3140_v25  ;;  %v3151_v0 = vmul.f32 %v4502_v10, %v4499_v16  ;;  %v1187_v43 = vadd.f32 1.1283791, %v1186_v27  ;;  %v1316_v32 = vadd.f32 0.4994258, %v1315_v54  ;;  %v1266_v59 = vmul.f32 %v1265_v31, %v3008_v6 }
 0x121   :  { %v1378_v55 = vmul.f32 2.1237322e-06, %v3133_v38  ;;  %v3154_v12 = vmul.f32 0.70710677, %v463_v57  ;;  %v1304_v58 = vmul.f32 %v1303_v45, %v3016_v44  ;;  %v1389_v21 = vmul.f32 3.8918573e-05, %v3133_v38 }
 0x122   :  { %v3159_v15 = vpop.eup %2067  ;;  %v1201_v13 = vsub.f32 1.0, %v1200_v5  ;;  %v1210_v7 = vand.u32 2147483648, %v3069_v2  ;;  %v1317_v52 = vmul.f32 %v1316_v32, %v3016_v44  ;;  %v1351_v27 = vmul.f32 %v1350_v53, %v3112_v9 }
 0x123   :  { %v1208_v47 = vand.u32 2147483647, %v3069_v2  ;;  %v1227_v54 = vadd.f32 1.1283791, %v1226_v4  ;;  %v1340_v57 = vmul.f32 %v1339_v51, %v3112_v9  ;;  %v1416_v6 = vmul.f32 %v3146_v49, %v3146_v49 }
 0x124   :  { %v3168_v31 = vpop.eup %2069  ;;  %v3171_v45 = vmul.f32 %v1187_v43, %v2971_v14  ;;  %v3173_v5 = vadd.f32 1.0, %v1317_v52  ;;  %v1352_v10 = vadd.f32 0.014752088, %v1351_v27  ;;  %v1379_v3 = vadd.f32 0.00028619796, %v1378_v55 }
 0x125   :  { %v1240_v32 = vmul.f32 %v3159_v15, %v3105_v11  ;;  %v1267_v53 = vadd.f32 1.1283791, %v1266_v59  ;;  %v1305_v30 = vadd.f32 0.18741608, %v1304_v58  ;;  %v1390_v4 = vadd.f32 0.001143296, %v1389_v21 }
 0x126   :  { %v1202_v51 = vmul.f32 %v3124_v23, %v1201_v13  ;;  %vm1204_vm0 = vweird.f32 %v3069_v2  ;;  %v1211_v42 = vor.u32 1.1754944e-38, %v1210_v7  ;;  %v1250_v62 = vand.u32 2147483648, %v3105_v11 }
 0x127   :  { %v1280_v14 = vmul.f32 %v3168_v31, %v3122_v33  ;;  %2071 = vrcp.f32 %v3173_v5  ;;  %v1341_v43 = vadd.f32 0.0036580483, %v1340_v57  ;;  %v3183_v55 = vmin.f32 %v1416_v6, 16.0 }
 0x128   :  { %vm3185_vm1 = vcmp.eq.f32.partialorder %v1208_v47, 8.507059e+37  ;;  %v3190_v59 = vmul.f32 %v1227_v54, %v2976_v26  ;;  %v1248_v58 = vand.u32 2147483647, %v3105_v11  ;;  %v1353_v21 = vmul.f32 %v1352_v10, %v3112_v9 }
 0x129   :  { %v1380_v13 = vmul.f32 %v1379_v3, %v3133_v38  ;;  %v1241_v7 = vsub.f32 1.0, %v1240_v32  ;;  %v3196_v27 = vmul.f32 %v1267_v53, %v2979_v60  ;;  %v1306_v57 = vmul.f32 %v1305_v30, %v3016_v44 }
 0x12a   :  { %v1391_v47 = vmul.f32 %v1390_v4, %v3133_v38  ;;  %v1203_v6 = vadd.f32 %v3124_v23, %v1202_v51  ;;  %vm1205_vm2 = vweird.f32 %v3124_v23  ;;  %v3202_v26 = vor.u32 1.1754944e-38, %v1250_v62 }
 0x12b   :  { %v1354_v54 = vadd.f32 0.112945676, %v1353_v21  ;;  %v1281_v48 = vsub.f32 1.0, %v1280_v14  ;;  %v1342_v10 = vmul.f32 %v1341_v43, %v3112_v9  ;;  %v1418_v3 = vmul.f32 2.1237322e-06, %v3183_v55  ;;  %vm3215_vm4 = vmor %vm1204_vm0, %vm1205_vm2 }
 0x12c   :  { %v1392_v28 = vadd.f32 0.014752088, %v1391_v47  ;;  %vm1244_vm3 = vweird.f32 %v3105_v11  ;;  %v1381_v30 = vadd.f32 0.0036580483, %v1380_v13  ;;  %v1429_v44 = vmul.f32 3.8918573e-05, %v3183_v55 }
 0x12d   :  { %v1355_v60 = vmul.f32 %v1354_v54, %v3112_v9  ;;  %v1456_v32 = vmul.f32 %v3154_v12, %v3154_v12  ;;  %v3211_v53 = vpop.eup %2071  ;;  %v1242_v4 = vmul.f32 %v3159_v15, %v1241_v7  ;;  %vm1284_vm5 = vweird.f32 %v3122_v33 }
 0x12e   :  { %v1288_v51 = vand.u32 2147483647, %v3122_v33  ;;  %v1290_v14 = vand.u32 2147483648, %v3122_v33  ;;  %v1307_v43 = vadd.f32 1.1283791, %v1306_v57  ;;  %v1207_v21 = vsel %vm3215_vm4, %v3124_v23, %v1203_v6 }
 0x12f   :  { %v1356_v13 = vadd.f32 0.4994258, %v1355_v60  ;;  %v1393_v2 = vmul.f32 %v1392_v28, %v3133_v38  ;;  %v1419_v47 = vadd.f32 0.00028619796, %v1418_v3  ;;  %v1282_v54 = vmul.f32 %v3168_v31, %v1281_v48 }
 0x130   :  { %v1343_v36 = vadd.f32 0.05243302, %v1342_v10  ;;  %v1430_v25 = vadd.f32 0.001143296, %v1429_v44  ;;  %v3228_v7 = vmin.f32 %v1456_v32, 16.0  ;;  %vm3230_vm6 = vcmp.eq.f32.partialorder %v1248_v58, 8.507059e+37 }
 0x131   :  { %v1320_v57 = vmul.f32 %v3211_v53, %v3173_v5  ;;  %v1357_v62 = vmul.f32 %v1356_v13, %v3112_v9  ;;  %v1382_v23 = vmul.f32 %v1381_v30, %v3133_v38  ;;  %v1394_v6 = vadd.f32 0.112945676, %v1393_v2 }
 0x132   :  { %v1212_v28 = vsel %vm3185_vm1, %v1211_v42, %v1207_v21  ;;  %vm1245_vm7 = vweird.f32 %v3159_v15  ;;  %v1420_v48 = vmul.f32 %v1419_v47, %v3183_v55  ;;  %v1431_v58 = vmul.f32 %v1430_v25, %v3183_v55 }
 0x133   :  { %v1243_v10 = vadd.f32 %v3159_v15, %v1242_v4  ;;  %vm3244_vm8 = vcmp.eq.f32.partialorder %v1288_v51, 8.507059e+37  ;;  %v3248_v60 = vadd.f32 1.0, %v1357_v62  ;;  %v1395_v30 = vmul.f32 %v1394_v6, %v3133_v38  ;;  %vm3263_vm10 = vmor %vm1244_vm3, %vm1245_vm7 }
 0x134   :  { %v1458_v44 = vmul.f32 2.1237322e-06, %v3228_v7  ;;  %v1283_v42 = vadd.f32 %v3168_v31, %v1282_v54  ;;  %vm1285_vm9 = vweird.f32 %v3168_v31  ;;  %v1344_v52 = vmul.f32 %v1343_v36, %v3112_v9 }
 0x135   :  { %v1432_v32 = vadd.f32 0.014752088, %v1431_v58  ;;  %v1291_v25 = vor.u32 1.1754944e-38, %v1290_v14  ;;  %v1321_v21 = vsub.f32 1.0, %v1320_v57  ;;  %2073 = vrcp.f32 %v3248_v60  ;;  %vm3275_vm11 = vmor %vm1284_vm5, %vm1285_vm9 }
 0x136   :  { %v1383_v4 = vadd.f32 0.05243302, %v1382_v23  ;;  %v3257_v51 = vmul.f32 %v1212_v28, %v3171_v45  ;;  %v3268_v2 = vmul.f32 %v1307_v43, %v2982_v37  ;;  %v1396_v36 = vadd.f32 0.4994258, %v1395_v30 }
 0x137   :  { %v1421_v14 = vadd.f32 0.0036580483, %v1420_v48  ;;  %v1247_v47 = vsel %vm3263_vm10, %v3159_v15, %v1243_v10  ;;  %vm1324_vm12 = vweird.f32 %v3173_v5  ;;  %v1433_v11 = vmul.f32 %v1432_v32, %v3183_v55 }
 0x138   :  { %v1459_v54 = vadd.f32 0.00028619796, %v1458_v44  ;;  %v1287_v37 = vsel %vm3275_vm11, %v3168_v31, %v1283_v42  ;;  %v1328_v43 = vand.u32 2147483647, %v3173_v5  ;;  %v1345_v57 = vadd.f32 0.18741608, %v1344_v52 }
 0x139   :  { %v1397_v15 = vmul.f32 %v1396_v36, %v3133_v38  ;;  %v1322_v33 = vmul.f32 %v3211_v53, %v1321_v21  ;;  %v1384_v62 = vmul.f32 %v1383_v4, %v3133_v38  ;;  %v1434_v23 = vadd.f32 0.112945676, %v1433_v11 }
 0x13a   :  { %v1469_v6 = vmul.f32 3.8918573e-05, %v3228_v7  ;;  %v2017_v28 = vclamps-f32 %v3257_v51, 1.0  ;;  %v1252_v48 = vsel %vm3230_vm6, %v3202_v26, %v1247_v47  ;;  %v1422_v31 = vmul.f32 %v1421_v14, %v3183_v55 }
 0x13b   :  { %v3293_v58 = vadd.f32 1.0, %v1397_v15  ;;  %v3296_v10 = vpop.eup %2073  ;;  %v1330_v30 = vand.u32 2147483648, %v3173_v5  ;;  %v1435_v44 = vmul.f32 %v1434_v23, %v3183_v55  ;;  %v1460_v42 = vmul.f32 %v1459_v54, %v3228_v7  ;;  %v4519_v5 = vld [vmem:[#allocation39_spill] sm:$0xff] }
 0x13c   :  { %v1470_v52 = vadd.f32 0.001143296, %v1469_v6  ;;  %v1292_v32 = vsel %vm3244_vm8, %v1291_v25, %v1287_v37  ;;  %v1346_v21 = vmul.f32 %v1345_v57, %v3112_v9  ;;  %v1360_v35 = vmul.f32 %v3296_v10, %v3248_v60 }
 0x13d   :  { %2075 = vrcp.f32 %v3293_v58  ;;  %v1253_v26 = vmul.f32 %v1252_v48, %v3190_v59  ;;  %v1323_v4 = vadd.f32 %v3211_v53, %v1322_v33  ;;  %vm1325_vm13 = vweird.f32 %v3211_v53 }
 0x13e   :  { %v1385_v13 = vadd.f32 0.18741608, %v1384_v62  ;;  %v1361_v36 = vsub.f32 1.0, %v1360_v35  ;;  %v1423_v14 = vadd.f32 0.05243302, %v1422_v31  ;;  %v1471_v3 = vmul.f32 %v1470_v52, %v3228_v7  ;;  %vm3320_vm15 = vmor %vm1324_vm12, %vm1325_vm13 }
 0x13f   :  { %v1436_v47 = vadd.f32 0.4994258, %v1435_v44  ;;  %v3312_v25 = vmul.f32 %v1292_v32, %v3196_v27  ;;  %vm3314_vm14 = vcmp.eq.f32.partialorder %v1328_v43, 8.507059e+37  ;;  %v1331_v45 = vor.u32 1.1754944e-38, %v1330_v30  ;;  %v4520_v30 = vld [vmem:[#allocation40_spill] sm:$0xff] }
 0x140   :  { %v1461_v11 = vadd.f32 0.0036580483, %v1460_v42  ;;  %v1347_v54 = vadd.f32 1.1283791, %v1346_v21  ;;  %v1362_v37 = vmul.f32 %v3296_v10, %v1361_v36  ;;  %v1472_v15 = vadd.f32 0.014752088, %v1471_v3 }
 0x141   :  { %v1437_v57 = vmul.f32 %v1436_v47, %v3183_v55  ;;  %v1327_v27 = vsel %vm3320_vm15, %v3211_v53, %v1323_v4  ;;  %v1368_v43 = vand.u32 2147483647, %v3248_v60  ;;  %v1386_v33 = vmul.f32 %v1385_v13, %v3133_v38 }
 0x142   :  { %v3333_v62 = vadd.f32 %v4519_v5, %v3137_v8  ;;  %v1424_v6 = vmul.f32 %v1423_v14, %v3183_v55  ;;  %v1473_v31 = vmul.f32 %v1472_v15, %v3228_v7  ;;  %v3341_v44 = vadd.f32 %v4520_v30, %v3151_v0 }
 0x143   :  { %v2076_v23 = vpop.eup %2075  ;;  %v3336_v48 = vadd.f32 1.0, %v1437_v57  ;;  %v1363_v53 = vadd.f32 %v3296_v10, %v1362_v37  ;;  %vm1365_vm0 = vweird.f32 %v3296_v10  ;;  %v1462_v8 = vmul.f32 %v1461_v11, %v3228_v7 }
 0x144   :  { %v1400_v38 = vmul.f32 %v2076_v23, %v3293_v58  ;;  %v2018_v42 = vclamps-f32 %v1253_v26, 1.0  ;;  %v2019_v52 = vclamps-f32 %v3312_v25, 1.0  ;;  %v1370_v32 = vand.u32 2147483648, %v3248_v60 }
 0x145   :  { %2077 = vrcp.f32 %v3336_v48  ;;  %v1332_v21 = vsel %vm3314_vm14, %v1331_v45, %v1327_v27  ;;  %vm1364_vm1 = vweird.f32 %v3248_v60  ;;  %v1387_v0 = vadd.f32 1.1283791, %v1386_v33 }
 0x146   :  { %v1401_v35 = vsub.f32 1.0, %v1400_v38  ;;  %v1348_v4 = vmul.f32 %v1347_v54, %v3059_v41  ;;  %vm3354_vm2 = vmor %vm1364_vm1, %vm1365_vm0  ;;  %vm3358_vm3 = vcmp.eq.f32.partialorder %v1368_v43, 8.507059e+37  ;;  %v1425_v36 = vadd.f32 0.18741608, %v1424_v6 }
 0x147   :  { %v1474_v14 = vadd.f32 0.112945676, %v1473_v31  ;;  %v1367_v47 = vsel %vm3354_vm2, %v3296_v10, %v1363_v53  ;;  %v1410_v60 = vand.u32 2147483648, %v3293_v58  ;;  %v1463_v25 = vadd.f32 0.05243302, %v1462_v8 }
 0x148   :  { %v1402_v3 = vmul.f32 %v2076_v23, %v1401_v35  ;;  %v1333_v41 = vmul.f32 %v1332_v21, %v3268_v2  ;;  %v1371_v9 = vor.u32 1.1754944e-38, %v1370_v32  ;;  %vm1405_vm4 = vweird.f32 %v2076_v23 }
 0x149   :  { %v1475_v45 = vmul.f32 %v1474_v14, %v3228_v7  ;;  %vm1404_vm5 = vweird.f32 %v3293_v58  ;;  %v1832_v59 = vadd.f32 1.0, %v2017_v28  ;;  %v1833_v54 = vadd.f32 1.0, %v2018_v42  ;;  %v4529_v14 = vld [vmem:[#allocation34_spill] sm:$0xff] }
 0x14a   :  { %v1403_v11 = vadd.f32 %v2076_v23, %v1402_v3  ;;  %v1372_v10 = vsel %vm3358_vm3, %v1371_v9, %v1367_v47  ;;  %v1408_v57 = vand.u32 2147483647, %v3293_v58  ;;  %v1426_v15 = vmul.f32 %v1425_v36, %v3183_v55  ;;  %vm3376_vm6 = vmor %vm1404_vm5, %vm1405_vm4 }
 0x14b   :  { %v2078_v37 = vpop.eup %2077  ;;  %v1476_v2 = vadd.f32 0.4994258, %v1475_v45  ;;  %v1388_v27 = vmul.f32 %v1387_v0, %v3081_v61  ;;  %v1411_v33 = vor.u32 1.1754944e-38, %v1410_v60  ;;  %v1464_v28 = vmul.f32 %v1463_v25, %v3228_v7  ;;  %v4531_v25 = vld [vmem:[#allocation36_spill] sm:$0xff] }
 0x14c   :  { %v1440_v51 = vmul.f32 %v2078_v37, %v3336_v48  ;;  %v1407_v5 = vsel %vm3376_vm6, %v2076_v23, %v1403_v11  ;;  %v1448_v6 = vand.u32 2147483647, %v3336_v48  ;;  %v1450_v58 = vand.u32 2147483648, %v3336_v48 }
 0x14d   :  { %v1477_v55 = vmul.f32 %v1476_v2, %v3228_v7  ;;  %v1373_v31 = vmul.f32 %v1372_v10, %v1348_v4  ;;  %v3388_v30 = vmul.f32 %v1832_v59, %v3100_v19  ;;  %v3391_v53 = vmul.f32 %v1833_v54, %v3103_v39  ;;  %v4532_v59 = vld [vmem:[#allocation15_spill] sm:$0xff] }
 0x14e   :  { %v1441_v61 = vsub.f32 1.0, %v1440_v51  ;;  %v2020_v38 = vclamps-f32 %v1333_v41, 1.0  ;;  %vm1409_vm7 = vcmp.eq.f32.partialorder %v1408_v57, 8.507059e+37  ;;  %v1427_v8 = vadd.f32 1.1283791, %v1426_v15  ;;  %v4535_v15 = vld [vmem:[#allocation2_spill] sm:$0xff] }
 0x14f   :  { %v3393_v42 = vadd.f32 1.0, %v1477_v55  ;;  %v1412_v23 = vsel %vm1409_vm7, %v1411_v33, %v1407_v5  ;;  %vm1445_vm8 = vweird.f32 %v2078_v37  ;;  %v1834_v21 = vadd.f32 1.0, %v2019_v52  ;;  %v4536_v2 = vld [vmem:[#allocation19_spill] sm:$0xff]  ;;  %v4539_v55 = vld [vmem:[#allocation24_spill] sm:$0xff] }
 0x150   :  { %v1442_v32 = vmul.f32 %v2078_v37, %v1441_v61  ;;  %vm1444_vm9 = vweird.f32 %v3336_v48  ;;  %vm3396_vm10 = vcmp.eq.f32.partialorder %v1448_v6, 8.507059e+37  ;;  %v1465_v19 = vadd.f32 0.18741608, %v1464_v28  ;;  %v4530_v48 = vld [vmem:[#allocation35_spill] sm:$0xff]  ;;  %v4540_v61 = vld [vmem:[#allocation52_spill] sm:$0xff] }
 0x151   :  { %2079 = vrcp.f32 %v3393_v42  ;;  %v2021_v39 = vclamps-f32 %v1373_v31, 1.0  ;;  %v1451_v4 = vor.u32 1.1754944e-38, %v1450_v58  ;;  %v1898_v13 = vadd.f32 %v3391_v53, %v3388_v30  ;;  %vm1446_vm11 = vmor %vm1444_vm9, %vm1445_vm8  ;;  %v4537_v51 = vld [vmem:[#allocation23_spill] sm:$0xff] }
 0x152   :  { %v1443_v35 = vadd.f32 %v2078_v37, %v1442_v32  ;;  %v1413_v26 = vmul.f32 %v1412_v23, %v1388_v27  ;;  %v1835_v36 = vadd.f32 1.0, %v2020_v38  ;;  %v288_v52 = vadd.f32 %v3075_v1, %v4529_v14  ;;  %v4538_v5 = vld [vmem:[#allocation51_spill] sm:$0xff] }
 0x153   :  { %v289_v47 = vadd.f32 %v3079_v20, %v4530_v48  ;;  %v3408_v60 = vmul.f32 %v1834_v21, %v3115_v63  ;;  %v290_v41 = vadd.f32 %v3089_v18, %v4531_v25  ;;  %v291_v9 = vadd.f32 %v3093_v34, %v3333_v62  ;;  %v4534_v18 = vld [vmem:[#allocation18_spill] sm:$0xff] }
 0x154   :  { %v1447_v3 = vsel %vm1446_vm11, %v2078_v37, %v1443_v35  ;;  %v1428_v45 = vmul.f32 %v1427_v8, %v3146_v49  ;;  %v1466_v1 = vmul.f32 %v1465_v19, %v3228_v7  ;;  %v85_v20 = vmul.f32 %v4532_v59, %v4499_v16  ;;  %v4533_v37 = vld [vmem:[#allocation17_spill] sm:$0xff] }
 0x155   :  { %v1452_v11 = vsel %vm3396_vm10, %v1451_v4, %v1447_v3  ;;  %v1836_v54 = vadd.f32 1.0, %v2021_v39  ;;  %v1899_v63 = vadd.f32 %v1898_v13, %v3408_v60  ;;  %v86_v10 = vmul.f32 %v4533_v37, %v4499_v16 }
 0x156   :  { %v87_v57 = vmul.f32 %v4534_v18, %v4499_v16  ;;  %v2022_v62 = vclamps-f32 %v1413_v26, 1.0  ;;  %v1453_v49 = vmul.f32 %v1452_v11, %v1428_v45  ;;  %v157_v27 = vmul.f32 %v4536_v2, %v4535_v15  ;;  %v3436_v16 = vpop.permute.xlu1 %427 }
 0x157   :  { %v2080_v34 = vpop.eup %2079  ;;  %v363_v7 = vmul.f32 %v2425_v17, %v4492_v29  ;;  %v3431_v33 = vmul.f32 %v1835_v36, %v3118_v50  ;;  %v158_v28 = vmul.f32 %v4537_v51, %v4535_v15  ;;  %v392_v6 = vadd.f32 %v4538_v5, %v288_v52 }
 0x158   :  { %v1480_v43 = vmul.f32 %v2080_v34, %v3393_v42  ;;  %v1467_v58 = vadd.f32 1.1283791, %v1466_v1  ;;  %v159_v31 = vmul.f32 %v4539_v55, %v4535_v15  ;;  %v393_v38 = vadd.f32 %v4540_v61, %v289_v47  ;;  %v4541_v1 = vld [vmem:[#allocation25_spill] sm:$0xff] }
 0x159   :  { %v394_v8 = vadd.f32 %v3067_v22, %v290_v41  ;;  %v1488_v32 = vand.u32 2147483647, %v3393_v42  ;;  %v3444_v50 = vmul.f32 %v1836_v54, %v3120_v56  ;;  %v1900_v21 = vadd.f32 %v1899_v63, %v3431_v33 }
 0x15a   :  { %v1481_v23 = vsub.f32 1.0, %v1480_v43  ;;  %v2023_v0 = vclamps-f32 %v1453_v49, 1.0  ;;  %v1490_v19 = vand.u32 2147483648, %v3393_v42  ;;  %v1837_v39 = vadd.f32 1.0, %v2022_v62  ;;  %v4543_v62 = vld [vmem:[#allocation27_spill] sm:$0xff] }
 0x15b   :  { %v395_v35 = vadd.f32 %v363_v7, %v291_v9  ;;  %vm1485_vm12 = vweird.f32 %v2080_v34  ;;  %v3449_v13 = vadd.f32 %v3436_v16, %v392_v6  ;;  %v3452_v22 = vadd.f32 %v3436_v16, %v393_v38  ;;  %v4544_v6 = vld [vmem:[#allocation28_spill] sm:$0xff] }
 0x15c   :  { %v1482_v4 = vmul.f32 %v2080_v34, %v1481_v23  ;;  %v1468_v26 = vmul.f32 %v1467_v58, %v3154_v12  ;;  %v189_v36 = vadd.f32 %v157_v27, %v85_v20  ;;  %v3456_v56 = vadd.f32 %v3436_v16, %v394_v8 }
 0x15d   :  { %v3459_v14 = vadd.f32 %v3436_v16, %v395_v35  ;;  %vm1484_vm13 = vweird.f32 %v3393_v42  ;;  %v1901_v48 = vadd.f32 %v1900_v21, %v3444_v50  ;;  %v190_v47 = vadd.f32 %v158_v28, %v86_v10 }
 0x15e   :  { %v1483_v52 = vadd.f32 %v2080_v34, %v1482_v4  ;;  %vm1486_vm14 = vmor %vm1484_vm13, %vm1485_vm12  ;;  %vm1489_vm15 = vcmp.eq.f32.partialorder %v1488_v32, 8.507059e+37  ;;  %v1491_v3 = vor.u32 1.1754944e-38, %v1490_v19  ;;  %v3464_v25 = vmul.f32 %v1837_v39, %v3126_v46  ;;  %v4546_v4 = vld [vmem:[#allocation38_spill] sm:$0xff] }
 0x15f   :  { %v3466_v12 = vadd.f32 %v159_v31, %v87_v57  ;;  %v1838_v9 = vadd.f32 1.0, %v2023_v0  ;;  %v3469_v45 = vmul.f32 0.70710677, %v3449_v13  ;;  %v3472_v11 = vmul.f32 0.70710677, %v3452_v22  ;;  %v4542_v57 = vld [vmem:[#allocation26_spill] sm:$0xff] }
 0x160   :  { %v1487_v41 = vsel %vm1486_vm14, %v2080_v34, %v1483_v52  ;;  %v260_v20 = vmul.f32 %v4541_v1, %v4494_v40  ;;  %v3477_v54 = vmul.f32 0.70710677, %v3456_v56  ;;  %v3480_v46 = vmul.f32 0.70710677, %v3459_v14 }
 0x161   :  { %v1492_v42 = vsel %vm1489_vm15, %v1491_v3, %v1487_v41  ;;  %v1902_v10 = vadd.f32 %v1901_v48, %v3464_v25  ;;  %v261_v34 = vmul.f32 %v4542_v57, %v4494_v40  ;;  %v262_v49 = vmul.f32 %v4543_v62, %v4494_v40 }
 0x162   :  { %v1493_v63 = vmul.f32 %v1492_v42, %v1468_v26  ;;  %v856_v15 = vmul.f32 %v3469_v45, %v3469_v45  ;;  %v896_v27 = vmul.f32 %v3472_v11, %v3472_v11  ;;  %v936_v7 = vmul.f32 %v3477_v54, %v3477_v54 }
 0x163   :  { %v976_v43 = vmul.f32 %v3480_v46, %v3480_v46  ;;  %v3496_v5 = vmul.f32 %v1838_v9, %v3128_v24  ;;  %v263_v58 = vmul.f32 %v4544_v6, %v4494_v40  ;;  %v292_v31 = vadd.f32 %v260_v20, %v3341_v44  ;;  %v4545_v24 = vld [vmem:[#allocation41_spill] sm:$0xff] }
 0x164   :  { %v2024_v28 = vclamps-f32 %v1493_v63, 1.0  ;;  %v293_v61 = vadd.f32 %v261_v34, %v189_v36  ;;  %v3501_v38 = vmin.f32 %v856_v15, 16.0  ;;  %v3503_v8 = vmin.f32 %v896_v27, 16.0 }
 0x165   :  { %v3505_v23 = vmin.f32 %v936_v7, 16.0  ;;  %v1903_v21 = vadd.f32 %v1902_v10, %v3496_v5  ;;  %v3508_v0 = vadd.f32 %v262_v49, %v190_v47  ;;  %v3510_v19 = vmin.f32 %v976_v43, 16.0  ;;  %v4547_v47 = vld [vmem:[#allocation42_spill] sm:$0xff] }
 0x166   :  { %v1839_v32 = vadd.f32 1.0, %v2024_v28  ;;  %v364_v39 = vmul.f32 %v4545_v24, %v4492_v29  ;;  %v858_v40 = vmul.f32 2.1237322e-06, %v3501_v38  ;;  %v869_v44 = vmul.f32 3.8918573e-05, %v3501_v38  ;;  %v4554_v24 = vld [vmem:[#allocation30_spill] sm:$0xff] }
 0x167   :  { %v898_v35 = vmul.f32 2.1237322e-06, %v3503_v8  ;;  %v909_v36 = vmul.f32 3.8918573e-05, %v3503_v8  ;;  %v938_v52 = vmul.f32 2.1237322e-06, %v3505_v23  ;;  %v365_v3 = vmul.f32 %v4547_v47, %v4492_v29 }
 0x168   :  { %v3518_v26 = vmul.f32 %v1839_v32, %v4546_v4  ;;  %v949_v48 = vmul.f32 3.8918573e-05, %v3505_v23  ;;  %v859_v41 = vadd.f32 0.00028619796, %v858_v40  ;;  %v870_v9 = vadd.f32 0.001143296, %v869_v44 }
 0x169   :  { %v899_v42 = vadd.f32 0.00028619796, %v898_v35  ;;  %v910_v63 = vadd.f32 0.001143296, %v909_v36  ;;  %v939_v10 = vadd.f32 0.00028619796, %v938_v52  ;;  %v396_v40 = vadd.f32 %v364_v39, %v292_v31 }
 0x16a   :  { %v1904_v20 = vadd.f32 %v1903_v21, %v3518_v26  ;;  %v950_v34 = vadd.f32 0.001143296, %v949_v48  ;;  %v860_v49 = vmul.f32 %v859_v41, %v3501_v38  ;;  %v871_v15 = vmul.f32 %v870_v9, %v3501_v38 }
 0x16b   :  { %v900_v27 = vmul.f32 %v899_v42, %v3503_v8  ;;  %v978_v7 = vmul.f32 2.1237322e-06, %v3510_v19  ;;  %v911_v43 = vmul.f32 %v910_v63, %v3503_v8  ;;  %v940_v28 = vmul.f32 %v939_v10, %v3505_v23 }
 0x16c   :  { %1905 = vadd.xlane.f32.xlu1 %v1904_v20  ;;  %v951_v32 = vmul.f32 %v950_v34, %v3505_v23  ;;  %v989_v21 = vmul.f32 3.8918573e-05, %v3510_v19  ;;  %v861_v44 = vadd.f32 0.0036580483, %v860_v49  ;;  %v872_v35 = vadd.f32 0.014752088, %v871_v15 }
 0x16d   :  { %v901_v4 = vadd.f32 0.0036580483, %v900_v27  ;;  %v397_v36 = vadd.f32 %v365_v3, %v293_v61  ;;  %v912_v52 = vadd.f32 0.014752088, %v911_v43  ;;  %v941_v48 = vadd.f32 0.0036580483, %v940_v28 }
 0x16e   :  { %v952_v41 = vadd.f32 0.014752088, %v951_v32  ;;  %v862_v9 = vmul.f32 %v861_v44, %v3501_v38  ;;  %v873_v42 = vmul.f32 %v872_v35, %v3501_v38  ;;  %v979_v63 = vadd.f32 0.00028619796, %v978_v7 }
 0x16f   :  { %v902_v20 = vmul.f32 %v901_v4, %v3503_v8  ;;  %v3538_v10 = vadd.f32 %v3436_v16, %v396_v40  ;;  %v913_v34 = vmul.f32 %v912_v52, %v3503_v8  ;;  %v990_v39 = vadd.f32 0.001143296, %v989_v21 }
 0x170   :  { %v953_v31 = vmul.f32 %v952_v41, %v3505_v23  ;;  %v3543_v61 = vadd.f32 %v3436_v16, %v397_v36  ;;  %v874_v3 = vadd.f32 0.112945676, %v873_v42  ;;  %v942_v49 = vmul.f32 %v941_v48, %v3505_v23  ;;  %v4548_v48 = vld [vmem:[#allocation43_spill] sm:$0xff] }
 0x171   :  { %v980_v15 = vmul.f32 %v979_v63, %v3510_v19  ;;  %v863_v27 = vadd.f32 0.05243302, %v862_v9  ;;  %v914_v43 = vadd.f32 0.112945676, %v913_v34  ;;  %v991_v7 = vmul.f32 %v990_v39, %v3510_v19 }
 0x172   :  { %v954_v28 = vadd.f32 0.112945676, %v953_v31  ;;  %v295_v32 = vadd.f32 %v263_v58, %v3466_v12  ;;  %v875_v40 = vmul.f32 %v874_v3, %v3501_v38  ;;  %v903_v44 = vadd.f32 0.05243302, %v902_v20  ;;  %v4549_v31 = vld [vmem:[#allocation46_spill] sm:$0xff] }
 0x173   :  { %v981_v35 = vadd.f32 0.0036580483, %v980_v15  ;;  %v3551_v21 = vmul.f32 0.70710677, %v3538_v10  ;;  %v915_v4 = vmul.f32 %v914_v43, %v3503_v8  ;;  %v992_v52 = vadd.f32 0.014752088, %v991_v7 }
 0x174   :  { %v955_v36 = vmul.f32 %v954_v28, %v3505_v23  ;;  %v366_v41 = vmul.f32 %v4548_v48, %v4492_v29  ;;  %v3558_v9 = vmul.f32 0.70710677, %v3543_v61  ;;  %v876_v42 = vadd.f32 0.4994258, %v875_v40  ;;  %v4550_v40 = vld [vmem:[#allocation16_spill] sm:$0xff] }
 0x175   :  { %v943_v12 = vadd.f32 0.05243302, %v942_v49  ;;  %v864_v58 = vmul.f32 %v863_v27, %v3501_v38  ;;  %v916_v20 = vadd.f32 0.4994258, %v915_v4  ;;  %v993_v34 = vmul.f32 %v992_v52, %v3510_v19  ;;  %v4551_v4 = vld [vmem:[#allocation3_spill] sm:$0xff] }
 0x176   :  { %v956_v63 = vadd.f32 0.4994258, %v955_v36  ;;  %v367_v39 = vmul.f32 %v4549_v31, %v4492_v29  ;;  %v877_v3 = vmul.f32 %v876_v42, %v3501_v38  ;;  %v904_v15 = vmul.f32 %v903_v44, %v3503_v8 }
 0x177   :  { %v982_v43 = vmul.f32 %v981_v35, %v3510_v19  ;;  %v917_v28 = vmul.f32 %v916_v20, %v3503_v8  ;;  %v994_v49 = vadd.f32 0.112945676, %v993_v34  ;;  %v1016_v27 = vmul.f32 %v3551_v21, %v3551_v21  ;;  %v4552_v35 = vld [vmem:[#allocation4_spill] sm:$0xff] }
 0x178   :  { %v957_v7 = vmul.f32 %v956_v63, %v3505_v23  ;;  %v3573_v36 = vmul.f32 %v4551_v4, %v4550_v40  ;;  %v3575_v52 = vadd.f32 1.0, %v877_v3  ;;  %v944_v29 = vmul.f32 %v943_v12, %v3505_v23 }
 0x179   :  { %v1056_v44 = vmul.f32 %v3558_v9, %v3558_v9  ;;  %v3582_v42 = vmul.f32 %v4552_v35, %v4550_v40  ;;  %v865_v20 = vadd.f32 0.18741608, %v864_v58  ;;  %v3584_v63 = vadd.f32 1.0, %v917_v28  ;;  %v4553_v35 = vld [vmem:[#allocation9_spill] sm:$0xff] }
 0x17a   :  { %v3586_v34 = vadd.f32 1.0, %v957_v7  ;;  %v398_v31 = vadd.f32 %v366_v41, %v3508_v0  ;;  %2081 = vrcp.f32 %v3575_v52  ;;  %v905_v3 = vadd.f32 0.18741608, %v904_v15 }
 0x17b   :  { %v983_v4 = vadd.f32 0.05243302, %v982_v43  ;;  %v399_v48 = vadd.f32 %v367_v39, %v295_v32  ;;  %2083 = vrcp.f32 %v3584_v63  ;;  %v995_v12 = vmul.f32 %v994_v49, %v3510_v19 }
 0x17c   :  { %v3592_v47 = vmin.f32 %v1016_v27, 16.0  ;;  %v3596_v58 = vmul.f32 %v4554_v24, %v4553_v35  ;;  %v3599_v28 = vadd.f32 %v3436_v16, %v398_v31  ;;  %v945_v7 = vadd.f32 0.18741608, %v944_v29 }
 0x17d   :  { %v3601_v0 = vmin.f32 %v1056_v44, 16.0  ;;  %v3604_v41 = vadd.f32 %v3436_v16, %v399_v48  ;;  %v3607_v32 = vmul.f32 0.5, %v3449_v13  ;;  %v866_v39 = vmul.f32 %v865_v20, %v3501_v38 }
 0x17e   :  { %2085 = vrcp.f32 %v3586_v34  ;;  %v3612_v15 = vmul.f32 0.5, %v3452_v22  ;;  %v3615_v24 = vmul.f32 0.5, %v3456_v56  ;;  %v906_v31 = vmul.f32 %v905_v3, %v3503_v8 }
 0x17f   :  { %4555 = vst [vmem:[#allocation54_spill] sm:$0xff] %v3604_v41  ;;  %v984_v43 = vmul.f32 %v983_v4, %v3510_v19  ;;  %v3620_v16 = vmul.f32 0.5, %v3459_v14  ;;  %v3623_v13 = vmul.f32 0.5, %v3538_v10  ;;  %v996_v48 = vadd.f32 0.4994258, %v995_v12 }
 0x180   :  { %v1018_v38 = vmul.f32 2.1237322e-06, %v3592_v47  ;;  %v3626_v49 = vpop.eup %2081  ;;  %v3629_v22 = vmul.f32 0.70710677, %v3599_v28  ;;  %v946_v56 = vmul.f32 %v945_v7, %v3505_v23  ;;  %v1029_v8 = vmul.f32 3.8918573e-05, %v3592_v47 }
 0x181   :  { %v1058_v27 = vmul.f32 2.1237322e-06, %v3601_v0  ;;  %v3634_v29 = vpop.eup %2083  ;;  %v867_v14 = vadd.f32 1.1283791, %v866_v39  ;;  %v880_v10 = vmul.f32 %v3626_v49, %v3575_v52  ;;  %v997_v44 = vmul.f32 %v996_v48, %v3510_v19 }
 0x182   :  { %v1019_v20 = vadd.f32 0.00028619796, %v1018_v38  ;;  %v3640_v3 = vmul.f32 0.70710677, %v3604_v41  ;;  %v907_v4 = vadd.f32 1.1283791, %v906_v31  ;;  %v920_v23 = vmul.f32 %v3634_v29, %v3584_v63 }
 0x183   :  { %v985_v12 = vadd.f32 0.18741608, %v984_v43  ;;  %v3646_v6 = vadd.f32 1.0, %v997_v44  ;;  %v1030_v62 = vadd.f32 0.001143296, %v1029_v8  ;;  %v881_v1 = vsub.f32 1.0, %v880_v10 }
 0x184   :  { %v3644_v7 = vpop.eup %2085  ;;  %v1020_v39 = vmul.f32 %v1019_v20, %v3592_v47  ;;  %v1059_v57 = vadd.f32 0.00028619796, %v1058_v27  ;;  %v947_v18 = vadd.f32 1.1283791, %v946_v56  ;;  %v1096_v31 = vmul.f32 %v3629_v22, %v3629_v22 }
 0x185   :  { %v960_v48 = vmul.f32 %v3644_v7, %v3586_v34  ;;  %v3654_v38 = vmul.f32 %v867_v14, %v3469_v45  ;;  %v888_v43 = vand.u32 2147483647, %v3575_v52  ;;  %v890_v44 = vand.u32 2147483648, %v3575_v52 }
 0x186   :  { %2087 = vrcp.f32 %v3646_v6  ;;  %vm884_vm0 = vweird.f32 %v3575_v52  ;;  %v3661_v8 = vmul.f32 %v907_v4, %v3472_v11  ;;  %v930_v56 = vand.u32 2147483648, %v3584_v63 }
 0x187   :  { %v986_v27 = vmul.f32 %v985_v12, %v3510_v19  ;;  %v1021_v10 = vadd.f32 0.0036580483, %v1020_v39  ;;  %v921_v20 = vsub.f32 1.0, %v920_v23  ;;  %v928_v45 = vand.u32 2147483647, %v3584_v63 }
 0x188   :  { %v1031_v14 = vmul.f32 %v1030_v62, %v3592_v47  ;;  %v1060_v55 = vmul.f32 %v1059_v57, %v3601_v0  ;;  %v882_v51 = vmul.f32 %v3626_v49, %v881_v1  ;;  %v3670_v37 = vmul.f32 %v947_v18, %v3477_v54 }
 0x189   :  { %v961_v59 = vsub.f32 1.0, %v960_v48  ;;  %v1022_v11 = vmul.f32 %v1021_v10, %v3592_v47  ;;  %v891_v4 = vor.u32 1.1754944e-38, %v890_v44  ;;  %vm924_vm1 = vweird.f32 %v3584_v63  ;;  %v4572_v63 = vld [vmem:[#allocation44_spill] sm:$0xff] }
 0x18a   :  { %v970_v19 = vand.u32 2147483648, %v3586_v34  ;;  %v1032_v23 = vadd.f32 0.014752088, %v1031_v14  ;;  %v1061_v12 = vadd.f32 0.0036580483, %v1060_v55  ;;  %vm3675_vm2 = vcmp.eq.f32.partialorder %v888_v43, 8.507059e+37 }
 0x18b   :  { %v3679_v57 = vor.u32 1.1754944e-38, %v930_v56  ;;  %vm964_vm3 = vweird.f32 %v3586_v34  ;;  %v968_v18 = vand.u32 2147483647, %v3586_v34  ;;  %v987_v1 = vadd.f32 1.1283791, %v986_v27 }
 0x18c   :  { %v3683_v54 = vmin.f32 %v1096_v31, 16.0  ;;  %v3685_v62 = vpop.eup %2087  ;;  %vm885_vm4 = vweird.f32 %v3626_v49  ;;  %v922_v48 = vmul.f32 %v3634_v29, %v921_v20  ;;  %v1033_v55 = vmul.f32 %v1032_v23, %v3592_v47 }
 0x18d   :  { %v1069_v43 = vmul.f32 3.8918573e-05, %v3601_v0  ;;  %v883_v44 = vadd.f32 %v3626_v49, %v882_v51  ;;  %v962_v56 = vmul.f32 %v3644_v7, %v961_v59  ;;  %v1000_v10 = vmul.f32 %v3685_v62, %v3646_v6  ;;  %vm3706_vm7 = vmor %vm884_vm0, %vm885_vm4 }
 0x18e   :  { %v1023_v27 = vadd.f32 0.05243302, %v1022_v11  ;;  %vm925_vm5 = vweird.f32 %v3634_v29  ;;  %v971_v31 = vor.u32 1.1754944e-38, %v970_v19  ;;  %v1034_v14 = vadd.f32 0.112945676, %v1033_v55 }
 0x18f   :  { %v1062_v2 = vmul.f32 %v1061_v12, %v3601_v0  ;;  %vm965_vm6 = vweird.f32 %v3644_v7  ;;  %v3699_v20 = vmul.f32 %v987_v1, %v3480_v46  ;;  %v1001_v23 = vsub.f32 1.0, %v1000_v10  ;;  %vm3733_vm11 = vmor %vm924_vm1, %vm925_vm5 }
 0x190   :  { %v1008_v51 = vand.u32 2147483647, %v3646_v6  ;;  %v923_v11 = vadd.f32 %v3634_v29, %v922_v48  ;;  %vm3711_vm8 = vcmp.eq.f32.partialorder %v928_v45, 8.507059e+37  ;;  %vm3715_vm9 = vcmp.eq.f32.partialorder %v968_v18, 8.507059e+37  ;;  %vm3747_vm12 = vmor %vm964_vm3, %vm965_vm6 }
 0x191   :  { %v1035_v12 = vmul.f32 %v1034_v14, %v3592_v47  ;;  %v1070_v1 = vadd.f32 0.001143296, %v1069_v43  ;;  %v1098_v55 = vmul.f32 2.1237322e-06, %v3683_v54  ;;  %v887_v52 = vsel %vm3706_vm7, %v3626_v49, %v883_v44 }
 0x192   :  { %v963_v10 = vadd.f32 %v3644_v7, %v962_v56  ;;  %vm1004_vm10 = vweird.f32 %v3646_v6  ;;  %v1024_v45 = vmul.f32 %v1023_v27, %v3592_v47  ;;  %v1109_v18 = vmul.f32 3.8918573e-05, %v3683_v54 }
 0x193   :  { %v1036_v48 = vadd.f32 0.4994258, %v1035_v12  ;;  %v1063_v40 = vadd.f32 0.05243302, %v1062_v2  ;;  %v1071_v41 = vmul.f32 %v1070_v1, %v3601_v0  ;;  %v1099_v14 = vadd.f32 0.00028619796, %v1098_v55 }
 0x194   :  { %v1002_v49 = vmul.f32 %v3685_v62, %v1001_v23  ;;  %v1010_v44 = vand.u32 2147483648, %v3646_v6  ;;  %v1110_v56 = vadd.f32 0.001143296, %v1109_v18  ;;  %v1136_v27 = vmul.f32 %v3640_v3, %v3640_v3 }
 0x195   :  { %v892_v2 = vsel %vm3675_vm2, %v891_v4, %v887_v52  ;;  %v1037_v59 = vmul.f32 %v1036_v48, %v3592_v47  ;;  %v1072_v23 = vadd.f32 0.014752088, %v1071_v41  ;;  %v1100_v12 = vmul.f32 %v1099_v14, %v3683_v54 }
 0x196   :  { %v927_v1 = vsel %vm3733_vm11, %v3634_v29, %v923_v11  ;;  %v967_v4 = vsel %vm3747_vm12, %v3644_v7, %v963_v10  ;;  %v1025_v39 = vadd.f32 0.18741608, %v1024_v45  ;;  %v1111_v34 = vmul.f32 %v1110_v56, %v3683_v54 }
 0x197   :  { %v3760_v55 = vadd.f32 1.0, %v1037_v59  ;;  %v1064_v52 = vmul.f32 %v1063_v40, %v3601_v0  ;;  %v1073_v18 = vmul.f32 %v1072_v23, %v3601_v0  ;;  %v3764_v41 = vmin.f32 %v1136_v27, 16.0 }
 0x198   :  { %v1003_v48 = vadd.f32 %v3685_v62, %v1002_v49  ;;  %vm1005_vm13 = vweird.f32 %v3685_v62  ;;  %v1101_v29 = vadd.f32 0.0036580483, %v1100_v12  ;;  %v1112_v11 = vadd.f32 0.014752088, %v1111_v34 }
 0x199   :  { %v3769_v14 = vmul.f32 %v892_v2, %v3654_v38  ;;  %vm3771_vm14 = vcmp.eq.f32.partialorder %v1008_v51, 8.507059e+37  ;;  %v1011_v10 = vor.u32 1.1754944e-38, %v1010_v44  ;;  %2089 = vrcp.f32 %v3760_v55  ;;  %vm3784_vm15 = vmor %vm1004_vm10, %vm1005_vm13 }
 0x19a   :  { %v932_v40 = vsel %vm3711_vm8, %v3679_v57, %v927_v1  ;;  %v972_v45 = vsel %vm3715_vm9, %v971_v31, %v967_v4  ;;  %v1074_v43 = vadd.f32 0.112945676, %v1073_v18  ;;  %v1102_v49 = vmul.f32 %v1101_v29, %v3683_v54 }
 0x19b   :  { %v1026_v51 = vmul.f32 %v1025_v39, %v3592_v47  ;;  %v1065_v44 = vadd.f32 0.18741608, %v1064_v52  ;;  %v1113_v56 = vmul.f32 %v1112_v11, %v3683_v54  ;;  %v1138_v19 = vmul.f32 2.1237322e-06, %v3764_v41  ;;  %v4573_v47 = vld [vmem:[#allocation45_spill] sm:$0xff] }
 0x19c   :  { %v1007_v57 = vsel %vm3784_vm15, %v3685_v62, %v1003_v48  ;;  %v1075_v31 = vmul.f32 %v1074_v43, %v3601_v0  ;;  %v1103_v46 = vadd.f32 0.05243302, %v1102_v49  ;;  %v1149_v6 = vmul.f32 3.8918573e-05, %v3764_v41 }
 0x19d   :  { %v1114_v27 = vadd.f32 0.112945676, %v1113_v56  ;;  %v1139_v2 = vadd.f32 0.00028619796, %v1138_v19  ;;  %v3798_v59 = vadd.f32 %v3573_v36, %v4572_v63  ;;  %v3802_v23 = vadd.f32 %v3582_v42, %v4573_v47 }
 0x19e   :  { %v2009_v12 = vclamps-f32 %v3769_v14, 1.0  ;;  %v933_v1 = vmul.f32 %v932_v40, %v3661_v8  ;;  %v1076_v62 = vadd.f32 0.4994258, %v1075_v31  ;;  %v1150_v4 = vadd.f32 0.001143296, %v1149_v6 }
 0x19f   :  { %v2090_v39 = vpop.eup %2089  ;;  %v973_v34 = vmul.f32 %v972_v45, %v3670_v37  ;;  %v1012_v52 = vsel %vm3771_vm14, %v1011_v10, %v1007_v57  ;;  %v1115_v18 = vmul.f32 %v1114_v27, %v3683_v54  ;;  %v1140_v36 = vmul.f32 %v1139_v2, %v3764_v41 }
 0x1a0   :  { %v1027_v48 = vadd.f32 1.1283791, %v1026_v51  ;;  %v1040_v42 = vmul.f32 %v2090_v39, %v3760_v55  ;;  %v1077_v29 = vmul.f32 %v1076_v62, %v3601_v0  ;;  %v1104_v11 = vmul.f32 %v1103_v46, %v3683_v54 }
 0x1a1   :  { %v1066_v8 = vmul.f32 %v1065_v44, %v3601_v0  ;;  %v1116_v14 = vadd.f32 0.4994258, %v1115_v18  ;;  %v1141_v40 = vadd.f32 0.0036580483, %v1140_v36  ;;  %v1151_v37 = vmul.f32 %v1150_v4, %v3764_v41 }
 0x1a2   :  { %v1013_v7 = vmul.f32 %v1012_v52, %v3699_v20  ;;  %v1041_v10 = vsub.f32 1.0, %v1040_v42  ;;  %v1048_v45 = vand.u32 2147483647, %v3760_v55  ;;  %v3818_v43 = vadd.f32 1.0, %v1077_v29 }
 0x1a3   :  { %v1050_v49 = vand.u32 2147483648, %v3760_v55  ;;  %v1117_v38 = vmul.f32 %v1116_v14, %v3683_v54  ;;  %v1142_v51 = vmul.f32 %v1141_v40, %v3764_v41  ;;  %v1152_v56 = vadd.f32 0.014752088, %v1151_v37 }
 0x1a4   :  { %v1042_v19 = vmul.f32 %v2090_v39, %v1041_v10  ;;  %vm1045_vm0 = vweird.f32 %v2090_v39  ;;  %2091 = vrcp.f32 %v3818_v43  ;;  %v1105_v0 = vadd.f32 0.18741608, %v1104_v11 }
 0x1a5   :  { %v2010_v44 = vclamps-f32 %v933_v1, 1.0  ;;  %v2011_v57 = vclamps-f32 %v973_v34, 1.0  ;;  %v1067_v20 = vadd.f32 1.1283791, %v1066_v8  ;;  %v3824_v31 = vadd.f32 1.0, %v1117_v38 }
 0x1a6   :  { %v1043_v46 = vadd.f32 %v2090_v39, %v1042_v19  ;;  %vm1044_vm1 = vweird.f32 %v3760_v55  ;;  %v1143_v6 = vadd.f32 0.05243302, %v1142_v51  ;;  %v1153_v27 = vmul.f32 %v1152_v56, %v3764_v41 }
 0x1a7   :  { %v2012_v2 = vclamps-f32 %v1013_v7, 1.0  ;;  %v1028_v63 = vmul.f32 %v1027_v48, %v3551_v21  ;;  %vm1046_vm2 = vmor %vm1044_vm1, %vm1045_vm0  ;;  %v1051_v47 = vor.u32 1.1754944e-38, %v1050_v49  ;;  %2093 = vrcp.f32 %v3824_v31 }
 0x1a8   :  { %v1047_v62 = vsel %vm1046_vm2, %v2090_v39, %v1043_v46  ;;  %vm1049_vm3 = vcmp.eq.f32.partialorder %v1048_v45, 8.507059e+37  ;;  %v1106_v1 = vmul.f32 %v1105_v0, %v3683_v54  ;;  %v1824_v4 = vadd.f32 1.0, %v2009_v12 }
 0x1a9   :  { %v1052_v34 = vsel %vm1049_vm3, %v1051_v47, %v1047_v62  ;;  %v1088_v52 = vand.u32 2147483647, %v3818_v43  ;;  %v1154_v18 = vadd.f32 0.112945676, %v1153_v27  ;;  %v1825_v55 = vadd.f32 1.0, %v2010_v44 }
 0x1aa   :  { %v2092_v36 = vpop.eup %2091  ;;  %v1053_v42 = vmul.f32 %v1052_v34, %v1028_v63  ;;  %v1068_v29 = vmul.f32 %v1067_v20, %v3558_v9  ;;  %v1090_v21 = vand.u32 2147483648, %v3818_v43  ;;  %v1144_v48 = vmul.f32 %v1143_v6, %v3764_v41 }
 0x1ab   :  { %v1080_v11 = vmul.f32 %v2092_v36, %v3818_v43  ;;  %vm1084_vm4 = vweird.f32 %v3818_v43  ;;  %v1155_v54 = vmul.f32 %v1154_v18, %v3764_v41  ;;  %v1826_v12 = vadd.f32 1.0, %v2011_v57 }
 0x1ac   :  { %v2013_v39 = vclamps-f32 %v1053_v42, 1.0  ;;  %v1107_v8 = vadd.f32 1.1283791, %v1106_v1  ;;  %v1856_v14 = vmul.f32 %v1824_v4, %v3607_v32  ;;  %v1857_v40 = vmul.f32 %v1825_v55, %v3612_v15 }
 0x1ad   :  { %v2094_v37 = vpop.eup %2093  ;;  %v1081_v7 = vsub.f32 1.0, %v1080_v11  ;;  %vm3840_vm5 = vcmp.eq.f32.partialorder %v1088_v52, 8.507059e+37  ;;  %v1156_v10 = vadd.f32 0.4994258, %v1155_v54  ;;  %v1827_v45 = vadd.f32 1.0, %v2012_v2 }
 0x1ae   :  { %vm1085_vm6 = vweird.f32 %v2092_v36  ;;  %v1091_v49 = vor.u32 1.1754944e-38, %v1090_v21  ;;  %v1120_v38 = vmul.f32 %v2094_v37, %v3824_v31  ;;  %v1145_v51 = vadd.f32 0.18741608, %v1144_v48 }
 0x1af   :  { %v1082_v56 = vmul.f32 %v2092_v36, %v1081_v7  ;;  %v1157_v19 = vmul.f32 %v1156_v10, %v3764_v41  ;;  %v1858_v32 = vmul.f32 %v1826_v12, %v3615_v24  ;;  %v1889_v0 = vadd.f32 %v1857_v40, %v1856_v14  ;;  %vm1086_vm7 = vmor %vm1084_vm4, %vm1085_vm6  ;;  %v4576_v10 = vld [vmem:[#allocation20_spill] sm:$0xff] }
 0x1b0   :  { %v1121_v15 = vsub.f32 1.0, %v1120_v38  ;;  %v1128_v44 = vand.u32 2147483647, %v3824_v31  ;;  %v1130_v57 = vand.u32 2147483648, %v3824_v31  ;;  %v1828_v20 = vadd.f32 1.0, %v2013_v39 }
 0x1b1   :  { %v1083_v46 = vadd.f32 %v2092_v36, %v1082_v56  ;;  %v3849_v6 = vadd.f32 1.0, %v1157_v19  ;;  %v1859_v27 = vmul.f32 %v1827_v45, %v3620_v16  ;;  %v1890_v2 = vadd.f32 %v1889_v0, %v1858_v32  ;;  %v4581_v0 = vld [vmem:[#allocation29_spill] sm:$0xff] }
 0x1b2   :  { %v1122_v63 = vmul.f32 %v2094_v37, %v1121_v15  ;;  %vm1125_vm8 = vweird.f32 %v2094_v37  ;;  %v1937_v24 = vmul.f32 %v3388_v30, %v3388_v30  ;;  %v1938_v47 = vmul.f32 %v3391_v53, %v3391_v53 }
 0x1b3   :  { %v1087_v62 = vsel %vm1086_vm7, %v2092_v36, %v1083_v46  ;;  %vm1124_vm9 = vweird.f32 %v3824_v31  ;;  %v1146_v1 = vmul.f32 %v1145_v51, %v3764_v41  ;;  %2095 = vrcp.f32 %v3849_v6  ;;  %v4582_v46 = vld [vmem:[#allocation49_spill] sm:$0xff] }
 0x1b4   :  { %v1092_v16 = vsel %vm3840_vm5, %v1091_v49, %v1087_v62  ;;  %v1123_v43 = vadd.f32 %v2094_v37, %v1122_v63  ;;  %v1860_v4 = vmul.f32 %v1828_v20, %v3623_v13  ;;  %v1891_v34 = vadd.f32 %v1890_v2, %v1859_v27  ;;  %vm1126_vm10 = vmor %vm1124_vm9, %vm1125_vm8  ;;  %v4578_v49 = vld [vmem:[#allocation21_spill] sm:$0xff] }
 0x1b5   :  { %v1093_v52 = vmul.f32 %v1092_v16, %v1068_v29  ;;  %v1108_v30 = vmul.f32 %v1107_v8, %v3629_v22  ;;  %vm1129_vm11 = vcmp.eq.f32.partialorder %v1128_v44, 8.507059e+37  ;;  %v1131_v53 = vor.u32 1.1754944e-38, %v1130_v57 }
 0x1b6   :  { %v1127_v18 = vsel %vm1126_vm10, %v2094_v37, %v1123_v43  ;;  %v1892_v55 = vadd.f32 %v1891_v34, %v1860_v4  ;;  %v1939_v41 = vmul.f32 %v3408_v60, %v3408_v60  ;;  %v1971_v31 = vadd.f32 %v1938_v47, %v1937_v24  ;;  %v4583_v47 = vld [vmem:[#allocation31_spill] sm:$0xff] }
 0x1b7   :  { %v1132_v36 = vsel %vm1129_vm11, %v1131_v53, %v1127_v18  ;;  %v1147_v42 = vadd.f32 1.1283791, %v1146_v1  ;;  %v1929_v21 = vmul.f32 %v1856_v14, %v1856_v14  ;;  %v1930_v48 = vmul.f32 %v1857_v40, %v1857_v40  ;;  %v4584_v1 = vld [vmem:[#allocation37_spill] sm:$0xff] }
 0x1b8   :  { %v1940_v13 = vmul.f32 %v3431_v33, %v3431_v33  ;;  %v1941_v29 = vmul.f32 %v3444_v50, %v3444_v50  ;;  %v1942_v22 = vmul.f32 %v3464_v25, %v3464_v25  ;;  %v1972_v11 = vadd.f32 %v1971_v31, %v1939_v41  ;;  %v4577_v50 = vld [vmem:[#allocation47_spill] sm:$0xff]  ;;  %v4579_v25 = vld [vmem:[#allocation48_spill] sm:$0xff] }
 0x1b9   :  { %v2096_v54 = vpop.eup %2095  ;;  %v2014_v12 = vclamps-f32 %v1093_v52, 1.0  ;;  %v1168_v39 = vand.u32 2147483647, %v3849_v6  ;;  %v1931_v60 = vmul.f32 %v1858_v32, %v1858_v32  ;;  %v1962_v8 = vadd.f32 %v1930_v48, %v1929_v21  ;;  %v4580_v32 = vld [vmem:[#allocation22_spill] sm:$0xff] }
 0x1ba   :  { %v1133_v37 = vmul.f32 %v1132_v36, %v1108_v30  ;;  %v1160_v14 = vmul.f32 %v2096_v54, %v3849_v6  ;;  %v1170_v40 = vand.u32 2147483648, %v3849_v6  ;;  %v1973_v7 = vadd.f32 %v1972_v11, %v1940_v13  ;;  %v3898_v36 = vpop.permute.xlu1 %437 }
 0x1bb   :  { %v1932_v33 = vmul.f32 %v1859_v27, %v1859_v27  ;;  %v1963_v9 = vadd.f32 %v1962_v8, %v1931_v60  ;;  %v304_v45 = vadd.f32 %v4577_v50, %v4576_v10  ;;  %v305_v38 = vadd.f32 %v4579_v25, %v4578_v49  ;;  %v4586_v8 = vld [vmem:[#allocation16_spill] sm:$0xff]  ;;  %v4591_v50 = vld [vmem:[#allocation23_spill] sm:$0xff] }
 0x1bc   :  { %v1161_v51 = vsub.f32 1.0, %v1160_v14  ;;  %v1943_v56 = vmul.f32 %v3496_v5, %v3496_v5  ;;  %v1974_v19 = vadd.f32 %v1973_v7, %v1941_v29  ;;  %v306_v15 = vadd.f32 %v4581_v0, %v4580_v32  ;;  %v4589_v7 = vld [vmem:[#allocation15_spill] sm:$0xff]  ;;  %v4592_v49 = vld [vmem:[#allocation24_spill] sm:$0xff]  ;;  %v4593_v32 = vld [vmem:[#allocation18_spill] sm:$0xff] }
 0x1bd   :  { %v1829_v44 = vadd.f32 1.0, %v2014_v12  ;;  %v1933_v57 = vmul.f32 %v1860_v4, %v1860_v4  ;;  %v1964_v20 = vadd.f32 %v1963_v9, %v1932_v33  ;;  %v307_v27 = vadd.f32 %v4582_v46, %v3798_v59  ;;  %v4590_v9 = vld [vmem:[#allocation17_spill] sm:$0xff] }
 0x1be   :  { %v2015_v2 = vclamps-f32 %v1133_v37, 1.0  ;;  %v1162_v63 = vmul.f32 %v2096_v54, %v1161_v51  ;;  %vm1165_vm12 = vweird.f32 %v2096_v54  ;;  %v1975_v24 = vadd.f32 %v1974_v19, %v1942_v22  ;;  %v4587_v37 = vld [vmem:[#allocation19_spill] sm:$0xff] }
 0x1bf   :  { %v377_v62 = vmul.f32 %v4583_v47, %v4553_v35  ;;  %v378_v5 = vmul.f32 %v4584_v1, %v4553_v35  ;;  %v485_v16 = vmul.f32 0.5, %v3543_v61  ;;  %v1965_v43 = vadd.f32 %v1964_v20, %v1933_v57 }
 0x1c0   :  { %v1163_v34 = vadd.f32 %v2096_v54, %v1162_v63  ;;  %vm1164_vm13 = vweird.f32 %v3849_v6  ;;  %v1944_v4 = vmul.f32 %v3518_v26, %v3518_v26  ;;  %v1976_v59 = vadd.f32 %v1975_v24, %v1943_v56  ;;  %v4596_v24 = vld [vmem:[#allocation26_spill] sm:$0xff] }
 0x1c1   :  { %v1148_v52 = vmul.f32 %v1147_v42, %v3640_v3  ;;  %vm1166_vm14 = vmor %vm1164_vm13, %vm1165_vm12  ;;  %vm1169_vm15 = vcmp.eq.f32.partialorder %v1168_v39, 8.507059e+37  ;;  %v1171_v30 = vor.u32 1.1754944e-38, %v1170_v40  ;;  %v379_v53 = vmul.f32 %v2425_v17, %v4553_v35  ;;  %v4588_v40 = vld [vmem:[#allocation11_spill] sm:$0xff] }
 0x1c2   :  { %v1167_v18 = vsel %vm1166_vm14, %v2096_v54, %v1163_v34  ;;  %v1830_v41 = vadd.f32 1.0, %v2015_v2  ;;  %v1861_v31 = vmul.f32 %v1829_v44, %v485_v16  ;;  %v1977_v61 = vadd.f32 %v1976_v59, %v1944_v4  ;;  %v4595_v44 = vld [vmem:[#allocation25_spill] sm:$0xff] }
 0x1c3   :  { %v1172_v21 = vsel %vm1169_vm15, %v1171_v30, %v1167_v18  ;;  %v408_v6 = vadd.f32 %v3596_v58, %v304_v45  ;;  %v409_v48 = vadd.f32 %v377_v62, %v305_v38  ;;  %v486_v26 = vmul.f32 0.5, %v3599_v28  ;;  %v4585_v28 = vld [vmem:[#allocation54_spill] sm:$0xff]  ;;  %v4598_v30 = vld [vmem:[#allocation28_spill] sm:$0xff] }
 0x1c4   :  { %v1173_v13 = vmul.f32 %v1172_v21, %v1148_v52  ;;  %v1893_v3 = vadd.f32 %v1892_v55, %v1861_v31  ;;  %1978 = vadd.xlane.f32.xlu1 %v1977_v61  ;;  %v410_v42 = vadd.f32 %v378_v5, %v306_v15  ;;  %v411_v29 = vadd.f32 %v379_v53, %v307_v27  ;;  %v4594_v15 = vld [vmem:[#allocation12_spill] sm:$0xff]  ;;  %v4597_v5 = vld [vmem:[#allocation27_spill] sm:$0xff] }
 0x1c5   :  { %v1862_v11 = vmul.f32 %v1830_v41, %v486_v26  ;;  %v3903_v17 = vadd.f32 %v3898_v36, %v408_v6  ;;  %v3906_v54 = vadd.f32 %v3898_v36, %v409_v48  ;;  %v487_v39 = vmul.f32 0.5, %v4585_v28  ;;  %v4599_v41 = vld [vmem:[#allocation41_spill] sm:$0xff] }
 0x1c6   :  { %v2016_v22 = vclamps-f32 %v1173_v13, 1.0  ;;  %v3909_v12 = vadd.f32 %v3898_v36, %v410_v42  ;;  %v3912_v58 = vadd.f32 %v3898_v36, %v411_v29  ;;  %v173_v14 = vmul.f32 %v4587_v37, %v4586_v8  ;;  %v4600_v13 = vld [vmem:[#allocation42_spill] sm:$0xff] }
 0x1c7   :  { %v1894_v60 = vadd.f32 %v1893_v3, %v1862_v11  ;;  %v101_v33 = vmul.f32 %v4589_v7, %v4588_v40  ;;  %v102_v10 = vmul.f32 %v4590_v9, %v4588_v40  ;;  %v174_v45 = vmul.f32 %v4591_v50, %v4586_v8 }
 0x1c8   :  { %v1831_v55 = vadd.f32 1.0, %v2016_v22  ;;  %v175_v25 = vmul.f32 %v4592_v49, %v4586_v8  ;;  %v1934_v51 = vmul.f32 %v1861_v31, %v1861_v31  ;;  %v3926_v56 = vmul.f32 0.70710677, %v3903_v17 }
 0x1c9   :  { %v3929_v19 = vmul.f32 0.70710677, %v3906_v54  ;;  %v103_v0 = vmul.f32 %v4593_v32, %v4588_v40  ;;  %v276_v57 = vmul.f32 %v4595_v44, %v4594_v15  ;;  %v3936_v20 = vmul.f32 0.70710677, %v3909_v12 }
 0x1ca   :  { %v1863_v38 = vmul.f32 %v1831_v55, %v487_v39  ;;  %v3939_v46 = vmul.f32 0.70710677, %v3912_v58  ;;  %v1966_v2 = vadd.f32 %v1965_v43, %v1934_v51  ;;  %v205_v63 = vadd.f32 %v173_v14, %v101_v33 }
 0x1cb   :  { %v277_v47 = vmul.f32 %v4596_v24, %v4594_v15  ;;  %v206_v62 = vadd.f32 %v174_v45, %v102_v10  ;;  %v3943_v1 = vadd.f32 %v175_v25, %v103_v0  ;;  %v278_v16 = vmul.f32 %v4597_v5, %v4594_v15 }
 0x1cc   :  { %v1895_v27 = vadd.f32 %v1894_v60, %v1863_v38  ;;  %v1496_v34 = vmul.f32 %v3926_v56, %v3926_v56  ;;  %v1935_v4 = vmul.f32 %v1862_v11, %v1862_v11  ;;  %v1536_v59 = vmul.f32 %v3929_v19, %v3929_v19 }
 0x1cd   :  { %v1576_v43 = vmul.f32 %v3936_v20, %v3936_v20  ;;  %v1616_v52 = vmul.f32 %v3939_v46, %v3939_v46  ;;  %v279_v53 = vmul.f32 %v4598_v30, %v4594_v15  ;;  %v308_v18 = vadd.f32 %v276_v57, %v3802_v23 }
 0x1ce   :  { %1896 = vadd.xlane.f32.xlu0 %v1895_v27  ;;  %v380_v31 = vmul.f32 %v4599_v41, %v4553_v35  ;;  %v3960_v61 = vmin.f32 %v1496_v34, 16.0  ;;  %v1967_v21 = vadd.f32 %v1966_v2, %v1935_v4  ;;  %v309_v6 = vadd.f32 %v277_v47, %v205_v63 }
 0x1cf   :  { %v3962_v48 = vmin.f32 %v1536_v59, 16.0  ;;  %v3964_v26 = vmin.f32 %v1576_v43, 16.0  ;;  %v381_v3 = vmul.f32 %v4600_v13, %v4553_v35  ;;  %v3970_v22 = vmin.f32 %v1616_v52, 16.0 }
 0x1d0   :  { %v1498_v42 = vmul.f32 2.1237322e-06, %v3960_v61  ;;  %v1509_v29 = vmul.f32 3.8918573e-05, %v3960_v61  ;;  %v1936_v23 = vmul.f32 %v1863_v38, %v1863_v38  ;;  %v412_v55 = vadd.f32 %v380_v31, %v308_v18 }
 0x1d1   :  { %v1538_v11 = vmul.f32 2.1237322e-06, %v3962_v48  ;;  %v1549_v28 = vmul.f32 3.8918573e-05, %v3962_v48  ;;  %v1578_v39 = vmul.f32 2.1237322e-06, %v3964_v26  ;;  %v310_v30 = vadd.f32 %v278_v16, %v206_v62 }
 0x1d2   :  { %v1499_v60 = vadd.f32 0.00028619796, %v1498_v42  ;;  %v1510_v8 = vadd.f32 0.001143296, %v1509_v29  ;;  %v1589_v37 = vmul.f32 3.8918573e-05, %v3964_v26  ;;  %v1968_v14 = vadd.f32 %v1967_v21, %v1936_v23 }
 0x1d3   :  { %v1539_v40 = vadd.f32 0.00028619796, %v1538_v11  ;;  %v1550_v7 = vadd.f32 0.001143296, %v1549_v28  ;;  %v1579_v33 = vadd.f32 0.00028619796, %v1578_v39  ;;  %v3985_v57 = vadd.f32 %v3898_v36, %v412_v55 }
 0x1d4   :  { %v1500_v9 = vmul.f32 %v1499_v60, %v3960_v61  ;;  %v1511_v10 = vmul.f32 %v1510_v8, %v3960_v61  ;;  %v1590_v50 = vadd.f32 0.001143296, %v1589_v37  ;;  %v1618_v45 = vmul.f32 2.1237322e-06, %v3970_v22 }
 0x1d5   :  { %v1540_v49 = vmul.f32 %v1539_v40, %v3962_v48  ;;  %v1551_v25 = vmul.f32 %v1550_v7, %v3962_v48  ;;  %v1580_v38 = vmul.f32 %v1579_v33, %v3964_v26  ;;  %v1629_v51 = vmul.f32 3.8918573e-05, %v3970_v22 }
 0x1d6   :  { %1969 = vadd.xlane.f32.xlu0 %v1968_v14  ;;  %v1501_v32 = vadd.f32 0.0036580483, %v1500_v9  ;;  %v1512_v0 = vadd.f32 0.014752088, %v1511_v10  ;;  %v1591_v15 = vmul.f32 %v1590_v50, %v3964_v26  ;;  %v1619_v44 = vadd.f32 0.00028619796, %v1618_v45 }
 0x1d7   :  { %v1541_v27 = vadd.f32 0.0036580483, %v1540_v49  ;;  %v1552_v2 = vadd.f32 0.014752088, %v1551_v25  ;;  %v1581_v63 = vadd.f32 0.0036580483, %v1580_v38  ;;  %v413_v18 = vadd.f32 %v381_v3, %v309_v6 }
 0x1d8   :  { %v1502_v24 = vmul.f32 %v1501_v32, %v3960_v61  ;;  %v1513_v47 = vmul.f32 %v1512_v0, %v3960_v61  ;;  %v1592_v5 = vadd.f32 0.014752088, %v1591_v15  ;;  %v1620_v34 = vmul.f32 %v1619_v44, %v3970_v22  ;;  %v4601_v3 = vld [vmem:[#allocation43_spill] sm:$0xff]  ;;  %v4602_v45 = vld [vmem:[#allocation46_spill] sm:$0xff] }
 0x1d9   :  { %v1542_v4 = vmul.f32 %v1541_v27, %v3962_v48  ;;  %v1553_v59 = vmul.f32 %v1552_v2, %v3962_v48  ;;  %v1582_v43 = vmul.f32 %v1581_v63, %v3964_v26  ;;  %v1630_v52 = vadd.f32 0.001143296, %v1629_v51 }
 0x1da   :  { %v1514_v41 = vadd.f32 0.112945676, %v1513_v47  ;;  %v1593_v31 = vmul.f32 %v1592_v5, %v3964_v26  ;;  %v3995_v21 = vmul.f32 0.70710677, %v3985_v57  ;;  %v1503_v13 = vadd.f32 0.05243302, %v1502_v24 }
 0x1db   :  { %v1554_v42 = vadd.f32 0.112945676, %v1553_v59  ;;  %v1631_v29 = vmul.f32 %v1630_v52, %v3970_v22  ;;  %v1543_v11 = vadd.f32 0.05243302, %v1542_v4  ;;  %v1621_v39 = vadd.f32 0.0036580483, %v1620_v34 }
 0x1dc   :  { %v1515_v23 = vmul.f32 %v1514_v41, %v3960_v61  ;;  %v1594_v28 = vadd.f32 0.112945676, %v1593_v31  ;;  %v311_v55 = vadd.f32 %v279_v53, %v3943_v1  ;;  %v1583_v16 = vadd.f32 0.05243302, %v1582_v43 }
 0x1dd   :  { %v1555_v62 = vmul.f32 %v1554_v42, %v3962_v48  ;;  %v1632_v6 = vadd.f32 0.014752088, %v1631_v29  ;;  %v382_v60 = vmul.f32 %v4601_v3, %v4553_v35  ;;  %v4004_v8 = vadd.f32 %v3898_v36, %v413_v18 }
 0x1de   :  { %v1516_v37 = vadd.f32 0.4994258, %v1515_v23  ;;  %v1595_v14 = vmul.f32 %v1594_v28, %v3964_v26  ;;  %v1504_v40 = vmul.f32 %v1503_v13, %v3960_v61  ;;  %v1656_v1 = vmul.f32 %v3995_v21, %v3995_v21 }
 0x1df   :  { %v1556_v7 = vadd.f32 0.4994258, %v1555_v62  ;;  %v1633_v33 = vmul.f32 %v1632_v6, %v3970_v22  ;;  %v1544_v9 = vmul.f32 %v1543_v11, %v3962_v48  ;;  %v1622_v50 = vmul.f32 %v1621_v39, %v3970_v22 }
 0x1e0   :  { %v1517_v53 = vmul.f32 %v1516_v37, %v3960_v61  ;;  %v1596_v10 = vadd.f32 0.4994258, %v1595_v14  ;;  %v383_v49 = vmul.f32 %v4602_v45, %v4553_v35  ;;  %v1584_v38 = vmul.f32 %v1583_v16, %v3964_v26 }
 0x1e1   :  { %v1557_v25 = vmul.f32 %v1556_v7, %v3962_v48  ;;  %v1634_v51 = vadd.f32 0.112945676, %v1633_v33  ;;  %v414_v32 = vadd.f32 %v382_v60, %v310_v30  ;;  %v4019_v0 = vmul.f32 0.70710677, %v4004_v8 }
 0x1e2   :  { %v4021_v15 = vadd.f32 1.0, %v1517_v53  ;;  %v1505_v44 = vadd.f32 0.18741608, %v1504_v40  ;;  %v1597_v2 = vmul.f32 %v1596_v10, %v3964_v26  ;;  %v1545_v35 = vadd.f32 0.18741608, %v1544_v9 }
 0x1e3   :  { %v4023_v27 = vadd.f32 1.0, %v1557_v25  ;;  %v1635_v63 = vmul.f32 %v1634_v51, %v3970_v22  ;;  %v1623_v24 = vadd.f32 0.05243302, %v1622_v50  ;;  %v4028_v47 = vmin.f32 %v1656_v1, 16.0 }
 0x1e4   :  { %2097 = vrcp.f32 %v4021_v15  ;;  %v415_v5 = vadd.f32 %v383_v49, %v311_v55  ;;  %v1585_v34 = vadd.f32 0.18741608, %v1584_v38  ;;  %v4032_v4 = vadd.f32 %v3898_v36, %v414_v32 }
 0x1e5   :  { %2099 = vrcp.f32 %v4023_v27  ;;  %v1696_v59 = vmul.f32 %v4019_v0, %v4019_v0  ;;  %v1506_v52 = vmul.f32 %v1505_v44, %v3960_v61  ;;  %v4040_v30 = vadd.f32 1.0, %v1597_v2 }
 0x1e6   :  { %v4037_v43 = vadd.f32 %v3898_v36, %v415_v5  ;;  %v1636_v18 = vadd.f32 0.4994258, %v1635_v63  ;;  %v1546_v41 = vmul.f32 %v1545_v35, %v3962_v48  ;;  %v1624_v31 = vmul.f32 %v1623_v24, %v3970_v22 }
 0x1e7   :  { %v1658_v13 = vmul.f32 2.1237322e-06, %v4028_v47  ;;  %v1669_v42 = vmul.f32 3.8918573e-05, %v4028_v47  ;;  %v1586_v29 = vmul.f32 %v1585_v34, %v3964_v26  ;;  %2101 = vrcp.f32 %v4040_v30 }
 0x1e8   :  { %v1637_v36 = vmul.f32 %v1636_v18, %v3970_v22  ;;  %v4051_v28 = vmin.f32 %v1696_v59, 16.0  ;;  %v4056_v48 = vmul.f32 0.70710677, %v4032_v4  ;;  %v4059_v55 = vmul.f32 0.70710677, %v4037_v43 }
 0x1e9   :  { %v1659_v61 = vadd.f32 0.00028619796, %v1658_v13  ;;  %v1670_v11 = vadd.f32 0.001143296, %v1669_v42  ;;  %v1507_v62 = vadd.f32 1.1283791, %v1506_v52  ;;  %vm1524_vm0 = vweird.f32 %v4021_v15 }
 0x1ea   :  { %v4048_v23 = vpop.eup %2097  ;;  %v1547_v16 = vadd.f32 1.1283791, %v1546_v41  ;;  %v1625_v3 = vadd.f32 0.18741608, %v1624_v31  ;;  %v4065_v60 = vadd.f32 1.0, %v1637_v36  ;;  %v1530_v10 = vand.u32 2147483648, %v4021_v15 }
 0x1eb   :  { %v4053_v39 = vpop.eup %2099  ;;  %v1520_v26 = vmul.f32 %v4048_v23, %v4021_v15  ;;  %v1587_v14 = vadd.f32 1.1283791, %v1586_v29  ;;  %v1660_v40 = vmul.f32 %v1659_v61, %v4028_v47  ;;  %v1671_v7 = vmul.f32 %v1670_v11, %v4028_v47 }
 0x1ec   :  { %v1560_v6 = vmul.f32 %v4053_v39, %v4023_v27  ;;  %v1528_v33 = vand.u32 2147483647, %v4021_v15  ;;  %2103 = vrcp.f32 %v4065_v60  ;;  %v1698_v53 = vmul.f32 2.1237322e-06, %v4051_v28 }
 0x1ed   :  { %v1521_v37 = vsub.f32 1.0, %v1520_v26  ;;  %v4072_v9 = vpop.eup %2101  ;;  %v1661_v50 = vadd.f32 0.0036580483, %v1660_v40  ;;  %v1672_v45 = vadd.f32 0.014752088, %v1671_v7  ;;  %v1736_v49 = vmul.f32 %v4056_v48, %v4056_v48 }
 0x1ee   :  { %v1561_v1 = vsub.f32 1.0, %v1560_v6  ;;  %v4078_v25 = vmul.f32 %v1507_v62, %v3926_v56  ;;  %v1568_v51 = vand.u32 2147483647, %v4023_v27  ;;  %v4084_v32 = vmul.f32 %v1547_v16, %v3929_v19 }
 0x1ef   :  { %v1522_v38 = vmul.f32 %v4048_v23, %v1521_v37  ;;  %v1600_v2 = vmul.f32 %v4072_v9, %v4040_v30  ;;  %v1673_v63 = vmul.f32 %v1672_v45, %v4028_v47  ;;  %vm1564_vm1 = vweird.f32 %v4023_v27 }
 0x1f0   :  { %v1562_v44 = vmul.f32 %v4053_v39, %v1561_v1  ;;  %v1570_v56 = vand.u32 2147483648, %v4023_v27  ;;  %v4093_v35 = vmul.f32 %v1587_v14, %v3936_v20  ;;  %v1699_v24 = vadd.f32 0.00028619796, %v1698_v53 }
 0x1f1   :  { %vm4095_vm2 = vcmp.eq.f32.partialorder %v1528_v33, 8.507059e+37  ;;  %v1531_v19 = vor.u32 1.1754944e-38, %v1530_v10  ;;  %v1662_v34 = vmul.f32 %v1661_v50, %v4028_v47  ;;  %v1674_v59 = vadd.f32 0.112945676, %v1673_v63 }
 0x1f2   :  { %v1709_v52 = vmul.f32 3.8918573e-05, %v4051_v28  ;;  %v4101_v18 = vpop.eup %2103  ;;  %v1523_v41 = vadd.f32 %v4048_v23, %v1522_v38  ;;  %vm1525_vm3 = vweird.f32 %v4048_v23  ;;  %vm4105_vm4 = vcmp.eq.f32.partialorder %v1568_v51, 8.507059e+37 }
 0x1f3   :  { %v1626_v31 = vmul.f32 %v1625_v3, %v3970_v22  ;;  %v1563_v13 = vadd.f32 %v4053_v39, %v1562_v44  ;;  %vm1565_vm5 = vweird.f32 %v4053_v39  ;;  %v1601_v42 = vsub.f32 1.0, %v1600_v2  ;;  %vm4119_vm6 = vmor %vm1524_vm0, %vm1525_vm3 }
 0x1f4   :  { %v1700_v29 = vmul.f32 %v1699_v24, %v4051_v28  ;;  %v1571_v36 = vor.u32 1.1754944e-38, %v1570_v56  ;;  %v1608_v61 = vand.u32 2147483647, %v4040_v30  ;;  %v1675_v11 = vmul.f32 %v1674_v59, %v4028_v47  ;;  %vm4132_vm8 = vmor %vm1564_vm1, %vm1565_vm5 }
 0x1f5   :  { %v4115_v62 = vmin.f32 %v1736_v49, 16.0  ;;  %vm1604_vm7 = vweird.f32 %v4040_v30  ;;  %v1610_v22 = vand.u32 2147483648, %v4040_v30  ;;  %v1640_v16 = vmul.f32 %v4101_v18, %v4065_v60 }
 0x1f6   :  { %v1663_v6 = vadd.f32 0.05243302, %v1662_v34  ;;  %v1710_v3 = vadd.f32 0.001143296, %v1709_v52  ;;  %v1527_v37 = vsel %vm4119_vm6, %v4048_v23, %v1523_v41  ;;  %v1627_v14 = vadd.f32 1.1283791, %v1626_v31 }
 0x1f7   :  { %v1648_v40 = vand.u32 2147483647, %v4065_v60  ;;  %v1676_v7 = vadd.f32 0.4994258, %v1675_v11  ;;  %v1567_v33 = vsel %vm4132_vm8, %v4053_v39, %v1563_v13  ;;  %v1602_v1 = vmul.f32 %v4072_v9, %v1601_v42 }
 0x1f8   :  { %v1701_v53 = vadd.f32 0.0036580483, %v1700_v29  ;;  %v1711_v10 = vmul.f32 %v1710_v3, %v4051_v28  ;;  %vm1605_vm9 = vweird.f32 %v4072_v9  ;;  %v1650_v27 = vand.u32 2147483648, %v4065_v60 }
 0x1f9   :  { %v1677_v23 = vmul.f32 %v1676_v7, %v4028_v47  ;;  %v1738_v50 = vmul.f32 2.1237322e-06, %v4115_v62  ;;  %v1641_v45 = vsub.f32 1.0, %v1640_v16  ;;  %v1664_v49 = vmul.f32 %v1663_v6, %v4028_v47  ;;  %vm4177_vm12 = vmor %vm1604_vm7, %vm1605_vm9 }
 0x1fa   :  { %v1712_v38 = vadd.f32 0.014752088, %v1711_v10  ;;  %v1749_v51 = vmul.f32 3.8918573e-05, %v4115_v62  ;;  %v1532_v39 = vsel %vm4095_vm2, %v1531_v19, %v1527_v37  ;;  %v1572_v44 = vsel %vm4105_vm4, %v1571_v36, %v1567_v33 }
 0x1fb   :  { %vm4152_vm10 = vcmp.eq.f32.partialorder %v1608_v61, 8.507059e+37  ;;  %v4156_v63 = vadd.f32 1.0, %v1677_v23  ;;  %v1739_v56 = vadd.f32 0.00028619796, %v1738_v50  ;;  %v1603_v24 = vadd.f32 %v4072_v9, %v1602_v1 }
 0x1fc   :  { %v1702_v34 = vmul.f32 %v1701_v53, %v4051_v28  ;;  %v1713_v59 = vmul.f32 %v1712_v38, %v4051_v28  ;;  %v1750_v52 = vadd.f32 0.001143296, %v1749_v51  ;;  %v1611_v41 = vor.u32 1.1754944e-38, %v1610_v22 }
 0x1fd   :  { %v4162_v5 = vmul.f32 %v1627_v14, %v3939_v46  ;;  %vm1644_vm11 = vweird.f32 %v4065_v60  ;;  %2105 = vrcp.f32 %v4156_v63  ;;  %v4167_v19 = vmul.f32 %v1532_v39, %v4078_v25 }
 0x1fe   :  { %v4170_v20 = vmul.f32 %v1572_v44, %v4084_v32  ;;  %v1642_v31 = vmul.f32 %v4101_v18, %v1641_v45  ;;  %v1665_v13 = vadd.f32 0.18741608, %v1664_v49  ;;  %v1714_v42 = vadd.f32 0.112945676, %v1713_v59 }
 0x1ff   :  { %v1740_v29 = vmul.f32 %v1739_v56, %v4115_v62  ;;  %v1751_v25 = vmul.f32 %v1750_v52, %v4115_v62  ;;  %v1776_v32 = vmul.f32 %v4059_v55, %v4059_v55  ;;  %v1607_v36 = vsel %vm4177_vm12, %v4072_v9, %v1603_v24 }
 0x200   :  { %vm4188_vm13 = vcmp.eq.f32.partialorder %v1648_v40, 8.507059e+37  ;;  %v1651_v30 = vor.u32 1.1754944e-38, %v1650_v27  ;;  %v1703_v11 = vadd.f32 0.05243302, %v1702_v34  ;;  %v1715_v26 = vmul.f32 %v1714_v42, %v4051_v28 }
 0x201   :  { %v1741_v22 = vadd.f32 0.0036580483, %v1740_v29  ;;  %v1752_v16 = vadd.f32 0.014752088, %v1751_v25  ;;  %v4193_v6 = vmin.f32 %v1776_v32, 16.0  ;;  %v2025_v3 = vclamps-f32 %v4167_v19, 1.0 }
 0x202   :  { %v1643_v37 = vadd.f32 %v4101_v18, %v1642_v31  ;;  %vm1645_vm14 = vweird.f32 %v4101_v18  ;;  %v1666_v9 = vmul.f32 %v1665_v13, %v4028_v47  ;;  %v2026_v14 = vclamps-f32 %v4170_v20, 1.0 }
 0x203   :  { %v2106_v15 = vpop.eup %2105  ;;  %v1716_v40 = vadd.f32 0.4994258, %v1715_v26  ;;  %v1753_v7 = vmul.f32 %v1752_v16, %v4115_v62  ;;  %v1778_v33 = vmul.f32 2.1237322e-06, %v4193_v6  ;;  %v1612_v1 = vsel %vm4152_vm10, %v1611_v41, %v1607_v36  ;;  %vm4209_vm15 = vmor %vm1644_vm11, %vm1645_vm14 }
 0x204   :  { %v1680_v53 = vmul.f32 %v2106_v15, %v4156_v63  ;;  %v1704_v10 = vmul.f32 %v1703_v11, %v4051_v28  ;;  %v1789_v27 = vmul.f32 3.8918573e-05, %v4193_v6  ;;  %v1742_v50 = vmul.f32 %v1741_v22, %v4115_v62 }
 0x205   :  { %v1717_v23 = vmul.f32 %v1716_v40, %v4051_v28  ;;  %v1754_v45 = vadd.f32 0.112945676, %v1753_v7  ;;  %v1779_v49 = vadd.f32 0.00028619796, %v1778_v33  ;;  %v1647_v38 = vsel %vm4209_vm15, %v4101_v18, %v1643_v37 }
 0x206   :  { %v1667_v51 = vadd.f32 1.1283791, %v1666_v9  ;;  %v1681_v39 = vsub.f32 1.0, %v1680_v53  ;;  %v1790_v44 = vadd.f32 0.001143296, %v1789_v27  ;;  %v1690_v2 = vand.u32 2147483648, %v4156_v63 }
 0x207   :  { %v4219_v60 = vadd.f32 1.0, %v1717_v23  ;;  %v1755_v56 = vmul.f32 %v1754_v45, %v4115_v62  ;;  %v1780_v24 = vmul.f32 %v1779_v49, %v4193_v6  ;;  %vm1685_vm0 = vweird.f32 %v2106_v15 }
 0x208   :  { %v1682_v34 = vmul.f32 %v2106_v15, %v1681_v39  ;;  %v1688_v59 = vand.u32 2147483647, %v4156_v63  ;;  %v1791_v52 = vmul.f32 %v1790_v44, %v4193_v6  ;;  %v1652_v18 = vsel %vm4188_vm13, %v1651_v30, %v1647_v38 }
 0x209   :  { %v1705_v41 = vadd.f32 0.18741608, %v1704_v10  ;;  %2107 = vrcp.f32 %v4219_v60  ;;  %v1743_v19 = vadd.f32 0.05243302, %v1742_v50  ;;  %v1613_v20 = vmul.f32 %v1612_v1, %v4093_v35 }
 0x20a   :  { %v1683_v31 = vadd.f32 %v2106_v15, %v1682_v34  ;;  %vm1684_vm1 = vweird.f32 %v4156_v63  ;;  %v1756_v13 = vadd.f32 0.4994258, %v1755_v56  ;;  %v1668_v46 = vmul.f32 %v1667_v51, %v3995_v21 }
 0x20b   :  { %vm1686_vm2 = vmor %vm1684_vm1, %vm1685_vm0  ;;  %v1691_v42 = vor.u32 1.1754944e-38, %v1690_v2  ;;  %v1781_v29 = vadd.f32 0.0036580483, %v1780_v24  ;;  %v1792_v25 = vadd.f32 0.014752088, %v1791_v52  ;;  %v1653_v32 = vmul.f32 %v1652_v18, %v4162_v5 }
 0x20c   :  { %v1687_v36 = vsel %vm1686_vm2, %v2106_v15, %v1683_v31  ;;  %vm1689_vm3 = vcmp.eq.f32.partialorder %v1688_v59, 8.507059e+37  ;;  %v1757_v61 = vmul.f32 %v1756_v13, %v4115_v62  ;;  %v1706_v11 = vmul.f32 %v1705_v41, %v4051_v28 }
 0x20d   :  { %v1692_v30 = vsel %vm1689_vm3, %v1691_v42, %v1687_v36  ;;  %v1744_v35 = vmul.f32 %v1743_v19, %v4115_v62  ;;  %v1793_v63 = vmul.f32 %v1792_v25, %v4193_v6  ;;  %v496_v26 = vmul.f32 0.5, %v3903_v17 }
 0x20e   :  { %v2027_v21 = vclamps-f32 %v1613_v20, 1.0  ;;  %v4237_v22 = vadd.f32 1.0, %v1757_v61  ;;  %v1693_v37 = vmul.f32 %v1692_v30, %v1668_v46  ;;  %v1782_v5 = vmul.f32 %v1781_v29, %v4193_v6 }
 0x20f   :  { %v2108_v16 = vpop.eup %2107  ;;  %v1794_v9 = vadd.f32 0.112945676, %v1793_v63  ;;  %v1840_v15 = vadd.f32 1.0, %v2025_v3  ;;  %v497_v40 = vmul.f32 0.5, %v3906_v54  ;;  %v498_v7 = vmul.f32 0.5, %v3909_v12 }
 0x210   :  { %v1720_v28 = vmul.f32 %v2108_v16, %v4219_v60  ;;  %v1841_v33 = vadd.f32 1.0, %v2026_v14  ;;  %v2028_v1 = vclamps-f32 %v1653_v32, 1.0  ;;  %v1707_v53 = vadd.f32 1.1283791, %v1706_v11 }
 0x211   :  { %v1745_v10 = vadd.f32 0.18741608, %v1744_v35  ;;  %2109 = vrcp.f32 %v4237_v22  ;;  %v1728_v27 = vand.u32 2147483647, %v4219_v60  ;;  %v1730_v47 = vand.u32 2147483648, %v4219_v60 }
 0x212   :  { %v1721_v17 = vsub.f32 1.0, %v1720_v28  ;;  %v1795_v23 = vmul.f32 %v1794_v9, %v4193_v6  ;;  %v2029_v3 = vclamps-f32 %v1693_v37, 1.0  ;;  %v1783_v50 = vadd.f32 0.05243302, %v1782_v5  ;;  %v4620_v9 = vld [vmem:[#allocation57_spill] sm:$0xff] }
 0x213   :  { %v1842_v54 = vadd.f32 1.0, %v2027_v21  ;;  %v1872_v45 = vmul.f32 %v1840_v15, %v496_v26  ;;  %vm1725_vm4 = vweird.f32 %v2108_v16  ;;  %v1873_v14 = vmul.f32 %v1841_v33, %v497_v40 }
 0x214   :  { %v1722_v12 = vmul.f32 %v2108_v16, %v1721_v17  ;;  %v1796_v49 = vadd.f32 0.4994258, %v1795_v23  ;;  %v499_v38 = vmul.f32 0.5, %v3912_v58  ;;  %v500_v51 = vmul.f32 0.5, %v3985_v57 }
 0x215   :  { %vm1724_vm5 = vweird.f32 %v4219_v60  ;;  %v1746_v39 = vmul.f32 %v1745_v10, %v4115_v62  ;;  %v1843_v56 = vadd.f32 1.0, %v2028_v1  ;;  %v1907_v24 = vadd.f32 %v1873_v14, %v1872_v45 }
 0x216   :  { %v1723_v44 = vadd.f32 %v2108_v16, %v1722_v12  ;;  %v1797_v2 = vmul.f32 %v1796_v49, %v4193_v6  ;;  %v1708_v59 = vmul.f32 %v1707_v53, %v4019_v0  ;;  %vm1726_vm6 = vmor %vm1724_vm5, %vm1725_vm4  ;;  %vm1729_vm7 = vcmp.eq.f32.partialorder %v1728_v27, 8.507059e+37 }
 0x217   :  { %v2110_v34 = vpop.eup %2109  ;;  %v1784_v52 = vmul.f32 %v1783_v50, %v4193_v6  ;;  %v1874_v18 = vmul.f32 %v1842_v54, %v498_v7  ;;  %v1731_v41 = vor.u32 1.1754944e-38, %v1730_v47  ;;  %v1844_v60 = vadd.f32 1.0, %v2029_v3  ;;  %v4621_v54 = vld [vmem:[#allocation58_spill] sm:$0xff] }
 0x218   :  { %v1727_v58 = vsel %vm1726_vm6, %v2108_v16, %v1723_v44  ;;  %v1760_v57 = vmul.f32 %v2110_v34, %v4237_v22  ;;  %v4255_v19 = vadd.f32 1.0, %v1797_v2  ;;  %v1945_v20 = vmul.f32 %v1872_v45, %v1872_v45  ;;  %v4619_v16 = vld [vmem:[#allocation10_spill] sm:$0xff]  ;;  %v1906_v44 = vpop.xlane.xlu1 %1905 }
 0x219   :  { %v1908_v62 = vadd.f32 %v1907_v24, %v1874_v18  ;;  %v1946_v31 = vmul.f32 %v1873_v14, %v1873_v14  ;;  %v1732_v13 = vsel %vm1729_vm7, %v1731_v41, %v1727_v58  ;;  %v1747_v46 = vadd.f32 1.1283791, %v1746_v39  ;;  %v1888_v39 = vpop.xlane.xlu2 %1887 }
 0x21a   :  { %v1761_v42 = vsub.f32 1.0, %v1760_v57  ;;  %v1875_v29 = vmul.f32 %v1843_v56, %v499_v38  ;;  %v1768_v0 = vand.u32 2147483647, %v4237_v22  ;;  %v1770_v25 = vand.u32 2147483648, %v4237_v22 }
 0x21b   :  { %v1785_v32 = vadd.f32 0.18741608, %v1784_v52  ;;  %2111 = vrcp.f32 %v4255_v19  ;;  %vm1765_vm8 = vweird.f32 %v2110_v34  ;;  %v1876_v61 = vmul.f32 %v1844_v60, %v500_v51  ;;  %v4622_v52 = vld [vmem:[#allocation59_spill] sm:$0xff] }
 0x21c   :  { %v1762_v36 = vmul.f32 %v2110_v34, %v1761_v42  ;;  %v1909_v30 = vadd.f32 %v1908_v62, %v1875_v29  ;;  %v1733_v11 = vmul.f32 %v1732_v13, %v1708_v59  ;;  %v1947_v35 = vmul.f32 %v1874_v18, %v1874_v18 }
 0x21d   :  { %v1980_v63 = vadd.f32 %v1946_v31, %v1945_v20  ;;  %vm1764_vm9 = vweird.f32 %v4237_v22  ;;  %v1921_v37 = vmul.f32 %v4619_v16, %v4619_v16  ;;  %v1771_v5 = vor.u32 1.1754944e-38, %v1770_v25 }
 0x21e   :  { %v1763_v26 = vadd.f32 %v2110_v34, %v1762_v36  ;;  %v1910_v21 = vadd.f32 %v1909_v30, %v1876_v61  ;;  %vm1766_vm10 = vmor %vm1764_vm9, %vm1765_vm8  ;;  %v1922_v15 = vmul.f32 %v4620_v9, %v4620_v9  ;;  %v1948_v40 = vmul.f32 %v1875_v29, %v1875_v29  ;;  %v4624_v36 = vld [vmem:[#allocation61_spill] sm:$0xff] }
 0x21f   :  { %v1981_v7 = vadd.f32 %v1980_v63, %v1947_v35  ;;  %v1748_v28 = vmul.f32 %v1747_v46, %v4056_v48  ;;  %vm1769_vm11 = vcmp.eq.f32.partialorder %v1768_v0, 8.507059e+37  ;;  %v1786_v1 = vmul.f32 %v1785_v32, %v4193_v6  ;;  %v4623_v46 = vld [vmem:[#allocation60_spill] sm:$0xff]  ;;  %v4625_v35 = vld [vmem:[#allocation62_spill] sm:$0xff] }
 0x220   :  { %v1767_v33 = vsel %vm1766_vm10, %v2110_v34, %v1763_v26  ;;  %v2030_v10 = vclamps-f32 %v1733_v11, 1.0  ;;  %v1949_v17 = vmul.f32 %v1876_v61, %v1876_v61  ;;  %v1923_v45 = vmul.f32 %v4621_v54, %v4621_v54  ;;  %v4626_v26 = vld [vmem:[#allocation53_spill] sm:$0xff] }
 0x221   :  { %v2112_v53 = vpop.eup %2111  ;;  %v1772_v22 = vsel %vm1769_vm11, %v1771_v5, %v1767_v33  ;;  %v1982_v27 = vadd.f32 %v1981_v7, %v1948_v40  ;;  %v1953_v12 = vadd.f32 %v1922_v15, %v1921_v37  ;;  %v1787_v49 = vadd.f32 1.1283791, %v1786_v1 }
 0x222   :  { %v1773_v47 = vmul.f32 %v1772_v22, %v1748_v28  ;;  %v1800_v23 = vmul.f32 %v2112_v53, %v4255_v19  ;;  %v1808_v48 = vand.u32 2147483647, %v4255_v19  ;;  %v1810_v14 = vand.u32 2147483648, %v4255_v19 }
 0x223   :  { %v1983_v3 = vadd.f32 %v1982_v27, %v1949_v17  ;;  %v1845_v6 = vadd.f32 1.0, %v2030_v10  ;;  %vm1805_vm12 = vweird.f32 %v2112_v53  ;;  %vm1916_vm13 = vcmask 7168  }
 0x224   :  { %v1801_v50 = vsub.f32 1.0, %v1800_v23  ;;  %v2031_v38 = vclamps-f32 %v1773_v47, 1.0  ;;  %1917 = vst.msk [vmem:[%s4322_s3] sm:$0xff] %vm1916_vm13, %v1888_v39  ;;  %v501_v2 = vmul.f32 0.5, %v4004_v8  ;;  %vm1804_vm14 = vweird.f32 %v4255_v19 }
 0x225   :  { %v1954_v24 = vadd.f32 %v1953_v12, %v1923_v45  ;;  %1919 = vst.msk [vmem:[%s4322_s3 + $0x10] sm:$0xff] %vm1916_vm13, %v1906_v44  ;;  %v1788_v34 = vmul.f32 %v1787_v49, %v4059_v55  ;;  %vm1806_vm15 = vmor %vm1804_vm14, %vm1805_vm12  ;;  %v1811_v59 = vor.u32 1.1754944e-38, %v1810_v14  ;;  %v1924_v18 = vmul.f32 %v4622_v52, %v4622_v52 }
 0x226   :  { %v1802_v51 = vmul.f32 %v2112_v53, %v1801_v50  ;;  %vm1809_vm0 = vcmp.eq.f32.partialorder %v1808_v48, 8.507059e+37  ;;  %v1846_v41 = vadd.f32 1.0, %v2031_v38  ;;  %v1877_v8 = vmul.f32 %v1845_v6, %v501_v2 }
 0x227   :  { %v502_v60 = vmul.f32 0.5, %v4032_v4  ;;  %v1955_v20 = vadd.f32 %v1954_v24, %v1924_v18  ;;  %v1925_v55 = vmul.f32 %v4623_v46, %v4623_v46  ;;  %v503_v42 = vmul.f32 0.5, %v4037_v43 }
 0x228   :  { %v1803_v56 = vadd.f32 %v2112_v53, %v1802_v51  ;;  %v1911_v62 = vadd.f32 %v1910_v21, %v1877_v8  ;;  %v1926_v61 = vmul.f32 %v4624_v36, %v4624_v36  ;;  %v1927_v63 = vmul.f32 %v4625_v35, %v4625_v35 }
 0x229   :  { %v1878_v13 = vmul.f32 %v1846_v41, %v502_v60  ;;  %v1956_v25 = vadd.f32 %v1955_v20, %v1925_v55  ;;  %v1928_v21 = vmul.f32 %v4626_v26, %v4626_v26  ;;  %v1950_v16 = vmul.f32 %v1877_v8, %v1877_v8 }
 0x22a   :  { %v1807_v58 = vsel %vm1806_vm15, %v2112_v53, %v1803_v56 }
 0x22b   :  { %v1812_v57 = vsel %vm1809_vm0, %v1811_v59, %v1807_v58  ;;  %v1912_v0 = vadd.f32 %v1911_v62, %v1878_v13  ;;  %v1957_v11 = vadd.f32 %v1956_v25, %v1926_v61  ;;  %v1984_v5 = vadd.f32 %v1983_v3, %v1950_v16 }
 0x22c   :  { %v1813_v19 = vmul.f32 %v1812_v57, %v1788_v34  ;;  %v1951_v9 = vmul.f32 %v1878_v13, %v1878_v13 }
 0x22d   :  { %v1958_v43 = vadd.f32 %v1957_v11, %v1927_v63 }
 0x22e   :  { %v2032_v31 = vclamps-f32 %v1813_v19, 1.0  ;;  %v1985_v40 = vadd.f32 %v1984_v5, %v1951_v9 }
 0x22f   :  { %v1959_v37 = vadd.f32 %v1958_v43, %v1928_v21 }
 0x230   :  { %v1847_v29 = vadd.f32 1.0, %v2032_v31 }
 0x232   :  { %v1879_v32 = vmul.f32 %v1847_v29, %v503_v42 }
 0x234   :  { %v1913_v30 = vadd.f32 %v1912_v0, %v1879_v32  ;;  %v1952_v7 = vmul.f32 %v1879_v32, %v1879_v32 }
 0x236   :  { %1914 = vadd.xlane.f32.xlu2 %v1913_v30  ;;  %v1986_v28 = vadd.f32 %v1985_v40, %v1952_v7 }
 0x237   :  { %v1979_v4 = vpop.xlane.xlu1 %1978 }
 0x238   :  { %1991 = vst.msk [vmem:[%s4323_s4 + $0x10] sm:$0xff] %vm1916_vm13, %v1979_v4 }
 0x23e   :  { %1960 = vadd.xlane.f32.xlu2 %v1959_v37 }
 0x241   :  { %v1897_v15 = vpop.xlane.xlu0 %1896 }
 0x242   :  { %1918 = vst.msk [vmem:[%s4322_s3 + $0x8] sm:$0xff] %vm1916_vm13, %v1897_v15 }
 0x246   :  { %1987 = vadd.xlane.f32.xlu2 %v1986_v28 }
 0x249   :  { %v1970_v33 = vpop.xlane.xlu0 %1969 }
 0x24a   :  { %1990 = vst.msk [vmem:[%s4323_s4 + $0x8] sm:$0xff] %vm1916_vm13, %v1970_v33 }
 0x2a9   :  { %v1915_v1 = vpop.xlane.xlu2 %1914 }
 0x2aa   :  { %1920 = vst.msk [vmem:[%s4322_s3 + $0x18] sm:$0xff] %vm1916_vm13, %v1915_v1 }
 0x2b1   :  { %v1961_v53 = vpop.xlane.xlu2 %1960 }
 0x2b2   :  { %1989 = vst.msk [vmem:[%s4323_s4] sm:$0xff] %vm1916_vm13, %v1961_v53 }
 0x2b9   :  { %v1988_v10 = vpop.xlane.xlu2 %1987 }
 0x2ba   :  { %1992 = vst.msk [vmem:[%s4323_s4 + $0x18] sm:$0xff] %vm1916_vm13, %v1988_v10 }

// kernel: prediction_forward.3
= control target key start
LH: loop header
LB: loop body
LE: loop exit
PB: predicated region body
PF: predicated region fallthrough
CT: control target
= control target key end

     0   :  { %v2409_v0 = vmov 2   ;;  %v2410_v1 = vmov 0   ;;  %v2411_v15 = vmov 1   ;;  %v2412_v24 = vmov 3   ;;  %s4256_s1 = inlined_call_operand.vmem [shape: f32[32,4], index: 1, kind: input, shape index: {}]   ;;  %s4257_s3 = inlined_call_operand.vmem [shape: f32[32,1], index: 3, kind: input, shape index: {}]   ;;  %s4258_s4 = inlined_call_operand.vmem [shape: f32[32,1], index: 4, kind: input, shape index: {}]   ;;  %s4259_s2 = inlined_call_operand.vmem [shape: f32[32,1], index: 2, kind: input, shape index: {}]   ;;  %s4260_s5 = inlined_call_operand.vmem [shape: f32[32,1], index: 5, kind: input, shape index: {}]   ;;  %s4261_s6 = inlined_call_operand.vmem [shape: f32[32,1], index: 6, kind: input, shape index: {}]   ;;  %s4262_s8 = inlined_call_operand.vmem [shape: f32[8,1], index: 8, kind: input, shape index: {}]   ;;  %s4263_s0 = inlined_call_operand.vmem [shape: f32[4,1024], index: 0, kind: input, shape index: {}]   ;;  %s4264_s7 = inlined_call_operand.vmem [shape: f32[8,32], index: 7, kind: input, shape index: {}]   ;;  %s4265_s9 = inlined_call_operand.vmem [shape: f32[8,1024], index: 9, kind: output, shape index: {}]  }
   0x1   :  { %2323 = vset.pattern.permute.xlu2 %v2409_v0  ;;  %2321 = vset.pattern.permute.xlu1 %v2410_v1  ;;  %v131_v2 = vld [vmem:[%s4256_s1 + $0x18] sm:$0xff]  ;;  %v2471_v3 = vld [vmem:[%s4256_s1 + $0x10] sm:$0xff]  ;;  %v33_v4 = vld [vmem:[%s4257_s3 + $0x8] sm:$0xff] }
   0x2   :  { %2319 = vset.pattern.permute.xlu0 %v2410_v1  ;;  %329 = vperm.xlu2 %2323, %v131_v2   ;;  %v41_v5 = vld [vmem:[%s4258_s4 + $0x8] sm:$0xff]  ;;  %v2481_v6 = vmul.f32 0.0009765625, %v33_v4  ;;  %v35_v9 = vld [vmem:[%s4257_s3 + $0x18] sm:$0xff]  ;;  %v34_v19 = vld [vmem:[%s4257_s3 + $0x10] sm:$0xff] }
   0x3   :  { %149 = vperm.xlu0 %2319, %v131_v2   ;;  %144 = vperm.xlu1 %2321, %v2471_v3   ;;  %v45_v7 = vmul.f32 0.0009765625, %v41_v5  ;;  %v2488_v12 = vmul.f32 0.0009765625, %v35_v9  ;;  %v2494_v13 = vld [vmem:[%s4256_s1 + $0x8] sm:$0xff]  ;;  %v43_v14 = vld [vmem:[%s4258_s4 + $0x18] sm:$0xff]  ;;  %v2506_v20 = vmul.f32 0.0009765625, %v34_v19  ;;  %v42_v22 = vld [vmem:[%s4258_s4 + $0x10] sm:$0xff] }
   0x4   :  { %v49_v8 = vmul.f32 %v2481_v6, %v2481_v6  ;;  %v47_v17 = vmul.f32 0.0009765625, %v43_v14  ;;  %v46_v26 = vmul.f32 0.0009765625, %v42_v22  ;;  %v32_v29 = vld [vmem:[%s4257_s3] sm:$0xff]  ;;  %v525_v44 = vld [vmem:[%s4259_s2 + $0x8] sm:$0xff]  ;;  %v527_v55 = vld [vmem:[%s4259_s2 + $0x18] sm:$0xff] }
   0x5   :  { %v51_v18 = vmul.f32 %v2488_v12, %v2488_v12  ;;  %v50_v27 = vmul.f32 %v2506_v20, %v2506_v20  ;;  %v2521_v33 = vmul.f32 0.0009765625, %v32_v29  ;;  %v128_v34 = vld [vmem:[%s4256_s1] sm:$0xff]  ;;  %v61_v48 = vld [vmem:[%s4260_s5 + $0x8] sm:$0xff]  ;;  %v63_v5 = vld [vmem:[%s4260_s5 + $0x18] sm:$0xff] }
   0x6   :  { %v53_v10 = vsub.f32 %v45_v7, %v49_v8  ;;  %v40_v35 = vld [vmem:[%s4258_s4] sm:$0xff]  ;;  %v113_v58 = vld [vmem:[%s4261_s6 + $0x8] sm:$0xff]  ;;  %v62_v14 = vld [vmem:[%s4260_s5 + $0x10] sm:$0xff] }
   0x7   :  { %v55_v21 = vsub.f32 %v47_v17, %v51_v18  ;;  %v54_v31 = vsub.f32 %v46_v26, %v50_v27  ;;  %v44_v38 = vmul.f32 0.0009765625, %v40_v35  ;;  %v48_v39 = vmul.f32 %v2521_v33, %v2521_v33  ;;  %v524_v9 = vld [vmem:[%s4259_s2] sm:$0xff] }
   0x8   :  { %v57_v11 = vmax.f32 %v53_v10, 0.0  ;;  %v60_v22 = vld [vmem:[%s4260_s5] sm:$0xff] }
   0x9   :  { %v59_v28 = vmax.f32 %v55_v21, 0.0  ;;  %v58_v37 = vmax.f32 %v54_v31, 0.0  ;;  %v52_v42 = vsub.f32 %v44_v38, %v48_v39 }
   0xa   :  { %2324 = vset.pattern.permute.xlu2 %v2410_v1  ;;  %v65_v16 = vadd.f32 1e-05, %v57_v11 }
   0xb   :  { %2320 = vset.pattern.permute.xlu0 %v2411_v15  ;;  %2322 = vset.pattern.permute.xlu1 %v2411_v15  ;;  %v2519_v32 = vadd.f32 1e-05, %v59_v28  ;;  %v66_v41 = vadd.f32 1e-05, %v58_v37  ;;  %v56_v46 = vmax.f32 %v52_v42, 0.0  ;;  %v2093_v28 = vld [vmem:[%s4262_s8] sm:$0xff] }
   0xc   :  { %225 = vperm.xlu0 %2320, %v131_v2   ;;  %221 = vperm.xlu1 %2322, %v2471_v3   ;;  %2336 = vrsqrt.f32 %v65_v16  ;;  %vm84_vm0 = vweird.f32 %v65_v16 }
   0xd   :  { %139 = vperm.xlu2 %2324, %v2494_v13   ;;  %2338 = vrsqrt.f32 %v2519_v32  ;;  %v64_v50 = vadd.f32 1e-05, %v56_v46  ;;  %vm104_vm3 = vweird.f32 %v2519_v32  ;;  %vm94_vm6 = vweird.f32 %v66_v41 }
   0xe   :  { %2340 = vrsqrt.f32 %v66_v41 }
   0xf   :  { %2342 = vrsqrt.f32 %v64_v50  ;;  %vm74_vm9 = vweird.f32 %v64_v50 }
  0x12   :  { %v2337_v23 = vpop.eup %2336 }
  0x13   :  { %v79_v25 = vmul.f32 %v2337_v23, %v65_v16  ;;  %vm85_vm1 = vweird.f32 %v2337_v23  ;;  %v2339_v43 = vpop.eup %2338  ;;  %v115_v16 = vld [vmem:[%s4261_s6 + $0x18] sm:$0xff] }
  0x14   :  { %2326 = vset.pattern.permute.xlu0 %v2412_v24  ;;  %217 = vperm.xlu1 %2322, %v2494_v13   ;;  %vm86_vm2 = vmor %vm84_vm0, %vm85_vm1  ;;  %v99_v47 = vmul.f32 %v2339_v43, %v2519_v32  ;;  %v2341_v51 = vpop.eup %2340  ;;  %vm105_vm4 = vweird.f32 %v2339_v43 }
  0x15   :  { %2325 = vset.pattern.permute.xlu2 %v2409_v0  ;;  %433 = vperm.xlu0 %2326, %v131_v2   ;;  %v80_v30 = vmul.f32 %v2337_v23, %v79_v25  ;;  %v89_v54 = vmul.f32 %v2341_v51, %v66_v41  ;;  %v2343_v61 = vpop.eup %2342  ;;  %vm106_vm5 = vmor %vm104_vm3, %vm105_vm4  ;;  %vm95_vm7 = vweird.f32 %v2341_v51 }
  0x16   :  { %325 = vperm.xlu2 %2325, %v2471_v3   ;;  %v100_v52 = vmul.f32 %v2339_v43, %v99_v47  ;;  %vm96_vm8 = vmor %vm94_vm6, %vm95_vm7  ;;  %vm75_vm10 = vweird.f32 %v2343_v61 }
  0x17   :  { %v81_v36 = vmul.f32 0.5, %v80_v30  ;;  %v90_v59 = vmul.f32 %v2341_v51, %v89_v54  ;;  %vm76_vm11 = vmor %vm74_vm9, %vm75_vm10 }
  0x18   :  { %v101_v56 = vmul.f32 0.5, %v100_v52 }
  0x19   :  { %v82_v40 = vsub.f32 1.5, %v81_v36  ;;  %v91_v63 = vmul.f32 0.5, %v90_v59 }
  0x1a   :  { %v102_v60 = vsub.f32 1.5, %v101_v56 }
  0x1b   :  { %v83_v45 = vmul.f32 %v2337_v23, %v82_v40  ;;  %v92_v4 = vsub.f32 1.5, %v91_v63 }
  0x1c   :  { %2327 = vset.pattern.permute.xlu1 %v2410_v1  ;;  %v103_v2 = vmul.f32 %v2339_v43, %v102_v60 }
  0x1d   :  { %134 = vperm.xlu1 %2327, %v128_v34   ;;  %2331 = vset.pattern.permute.xlu0 %v2409_v0  ;;  %v87_v49 = vsel %vm86_vm2, %v2337_v23, %v83_v45  ;;  %v93_v10 = vmul.f32 %v2341_v51, %v92_v4 }
  0x1e   :  { %2328 = vset.pattern.permute.xlu2 %v2411_v15  ;;  %317 = vperm.xlu0 %2331, %v128_v34   ;;  %v109_v53 = vmul.f32 %v87_v49, %v61_v48 }
  0x1f   :  { %213 = vperm.xlu2 %2328, %v128_v34   ;;  %v97_v15 = vsel %vm96_vm8, %v2341_v51, %v93_v10 }
  0x20   :  { %v117_v57 = vmul.f32 %v109_v53, %v2481_v6  ;;  %v107_v6 = vsel %vm106_vm5, %v2339_v43, %v103_v2  ;;  %v110_v18 = vmul.f32 %v97_v15, %v62_v14 }
  0x21   :  { %v111_v8 = vmul.f32 %v107_v6, %v63_v5 }
  0x22   :  { %v121_v62 = vsub.f32 %v113_v58, %v117_v57 }
  0x25   :  { %2329 = vset.pattern.permute.xlu1 %v2409_v0  ;;  %v526_v0 = vld [vmem:[%s4259_s2 + $0x10] sm:$0xff] }
  0x26   :  { %321 = vperm.xlu1 %2329, %v2494_v13   ;;  %2334 = vset.pattern.permute.xlu0 %v2410_v1 }
  0x27   :  { %2330 = vset.pattern.permute.xlu2 %v2412_v24  ;;  %535 = vperm.xlu0 %2334, %v525_v44  }
  0x28   :  { %429 = vperm.xlu2 %2330, %v2471_v3   ;;  %v69_v3 = vmul.f32 %v2343_v61, %v64_v50 }
  0x2a   :  { %v70_v7 = vmul.f32 %v2343_v61, %v69_v3 }
  0x2c   :  { %v71_v11 = vmul.f32 0.5, %v70_v7 }
  0x2e   :  { %2332 = vset.pattern.permute.xlu1 %v2412_v24  ;;  %v72_v17 = vsub.f32 1.5, %v71_v11 }
  0x2f   :  { %425 = vperm.xlu1 %2332, %v2494_v13   ;;  %1995 = vperm.xlu0 %2334, %v109_v53   ;;  %v119_v13 = vmul.f32 %v111_v8, %v2488_v12  ;;  %v114_v12 = vld [vmem:[%s4261_s6 + $0x10] sm:$0xff] }
  0x30   :  { %2333 = vset.pattern.permute.xlu2 %v2410_v1  ;;  %v73_v21 = vmul.f32 %v2343_v61, %v72_v17 }
  0x31   :  { %545 = vperm.xlu2 %2333, %v527_v55   ;;  %v123_v19 = vsub.f32 %v115_v16, %v119_v13 }
  0x32   :  { %v77_v23 = vsel %vm76_vm11, %v2343_v61, %v73_v21 }
  0x33   :  { %v108_v25 = vmul.f32 %v77_v23, %v60_v22 }
  0x35   :  { %v116_v26 = vmul.f32 %v108_v25, %v2521_v33  ;;  %v124_v33 = vld [vmem:[%s4263_s0] sm:$0xff] }
  0x36   :  { %v228_v35 = vperm.slane %v124_v33, 1  ;;  %v229_v36 = vperm.slane %v124_v33, 5  ;;  %v156_v39 = vperm.slane %v124_v33, 0  ;;  %v157_v40 = vperm.slane %v124_v33, 4 }
  0x37   :  { %421 = vperm.xlu1 %2332, %v128_v34   ;;  %2047 = vperm.xlu0 %2334, %v121_v62   ;;  %v125_v34 = vld [vmem:[%s4263_s0 + $0x8] sm:$0xff]  ;;  %v332_v53 = vperm.slane %v124_v33, 2  ;;  %v333_v54 = vperm.slane %v124_v33, 6 }
  0x38   :  { %v230_v37 = vperm.slane %v125_v34, 1  ;;  %v231_v38 = vperm.slane %v125_v34, 5  ;;  %v158_v41 = vperm.slane %v125_v34, 0  ;;  %v159_v42 = vperm.slane %v125_v34, 4 }
  0x39   :  { %540 = vperm.xlu2 %2333, %v526_v0   ;;  %v2602_v44 = vperm.slane %v228_v35, 1  ;;  %v2604_v45 = vperm.slane %v229_v36, 1  ;;  %v2612_v49 = vperm.slane %v156_v39, 0  ;;  %v2614_v50 = vperm.slane %v157_v40, 0 }
  0x3a   :  { %v2606_v46 = vperm.slane %v230_v37, 1  ;;  %v2608_v47 = vperm.slane %v231_v38, 1  ;;  %v2616_v51 = vperm.slane %v158_v41, 0  ;;  %v2618_v52 = vperm.slane %v159_v42, 0 }
  0x3b   :  { %v334_v55 = vperm.slane %v125_v34, 2  ;;  %v335_v56 = vperm.slane %v125_v34, 6  ;;  %v2638_v3 = vperm.slane %v332_v53, 2  ;;  %v2640_v4 = vperm.slane %v333_v54, 2 }
  0x3c   :  { %4319 = vst [vmem:[#allocation7_spill] sm:$0xff] %v2608_v47  ;;  %v438_v10 = vperm.slane %v125_v34, 3  ;;  %v439_v11 = vperm.slane %v125_v34, 7 }
  0x3d   :  { %4321 = vst [vmem:[#allocation9_spill] sm:$0xff] %v2618_v52  ;;  %v2642_v5 = vperm.slane %v334_v55, 2  ;;  %v2644_v6 = vperm.slane %v335_v56, 2 }
  0x3e   :  { %v2662_v23 = vperm.slane %v438_v10, 3 }
  0x3f   :  { %2335 = vset.pattern.permute.xlu1 %v2410_v1  ;;  %v118_v1 = vmul.f32 %v110_v18, %v2506_v20  ;;  %v112_v20 = vld [vmem:[%s4261_s6] sm:$0xff]  ;;  %4323 = vst [vmem:[#allocation11_spill] sm:$0xff] %v2644_v6 }
  0x40   :  { %530 = vperm.xlu1 %2335, %v524_v9   ;;  %v120_v27 = vsub.f32 %v112_v20, %v116_v26  ;;  %v437_v9 = vperm.slane %v124_v33, 7  ;;  %4325 = vst [vmem:[#allocation13_spill] sm:$0xff] %v2662_v23 }
  0x41   :  { %2005 = vperm.xlu2 %2333, %v111_v8   ;;  %v122_v24 = vsub.f32 %v114_v12, %v118_v1  ;;  %v436_v8 = vperm.slane %v124_v33, 3 }
  0x42   :  { %v2660_v22 = vperm.slane %v437_v9, 3 }
  0x43   :  { %v2658_v12 = vperm.slane %v436_v8, 3 }
  0x48   :  { %2000 = vperm.xlu1 %2335, %v110_v18  }
  0x49   :  { %2057 = vperm.xlu2 %2333, %v123_v19  }
  0x50   :  { %2052 = vperm.xlu1 %2335, %v122_v24   ;;  %v2664_v24 = vperm.slane %v439_v11, 3 }
  0x51   :  { %1990 = vperm.xlu2 %2333, %v108_v25  }
  0x58   :  { %2042 = vperm.xlu1 %2335, %v120_v27  }
  0x59   :  { %2096 = vperm.xlu2 %2333, %v2093_v28  }
  0x5c   :  { %v2586_v29 = vpop.permute.xlu2 %329 }
  0x5d   :  { %4314 = vst [vmem:[#allocation2_spill] sm:$0xff] %v2586_v29  ;;  %v380_v17 = vmul.f32 %v2638_v3, %v2586_v29  ;;  %v381_v18 = vmul.f32 %v2640_v4, %v2586_v29  ;;  %v382_v19 = vmul.f32 %v2642_v5, %v2586_v29  ;;  %v383_v21 = vmul.f32 %v2644_v6, %v2586_v29 }
  0x67   :  { %v2588_v30 = vpop.permute.xlu2 %139 }
  0x68   :  { %4315 = vst [vmem:[#allocation3_spill] sm:$0xff] %v2588_v30 }
  0x70   :  { %v2590_v31 = vpop.permute.xlu2 %325 }
  0x71   :  { %4316 = vst [vmem:[#allocation4_spill] sm:$0xff] %v2590_v31  ;;  %v373_v8 = vmul.f32 %v2640_v4, %v2590_v31 }
  0x75   :  { %v2592_v32 = vpop.permute.xlu0 %149  ;;  %v2610_v48 = vpop.permute.xlu1 %144 }
  0x76   :  { %4317 = vst [vmem:[#allocation5_spill] sm:$0xff] %v2592_v32  ;;  %v204_v58 = vmul.f32 %v2612_v49, %v2592_v32  ;;  %v205_v59 = vmul.f32 %v2614_v50, %v2592_v32  ;;  %v206_v60 = vmul.f32 %v2616_v51, %v2592_v32  ;;  %v207_v61 = vmul.f32 %v2618_v52, %v2592_v32 }
  0x77   :  { %4320 = vst [vmem:[#allocation8_spill] sm:$0xff] %v2610_v48  ;;  %v196_v54 = vmul.f32 %v2612_v49, %v2610_v48  ;;  %v197_v55 = vmul.f32 %v2614_v50, %v2610_v48 }
  0x79   :  { %v2600_v43 = vpop.permute.xlu2 %213 }
  0x7a   :  { %4318 = vst [vmem:[#allocation6_spill] sm:$0xff] %v2600_v43 }
  0x7e   :  { %v2620_v57 = vpop.permute.xlu0 %225  ;;  %v2656_v1 = vpop.permute.xlu1 %221 }
  0x7f   :  { %4322 = vst [vmem:[#allocation10_spill] sm:$0xff] %v2620_v57  ;;  %v276_v62 = vmul.f32 %v2602_v44, %v2620_v57  ;;  %v277_v63 = vmul.f32 %v2604_v45, %v2620_v57  ;;  %v278_v0 = vmul.f32 %v2606_v46, %v2620_v57  ;;  %v279_v2 = vmul.f32 %v2608_v47, %v2620_v57 }
  0x80   :  { %4324 = vst [vmem:[#allocation12_spill] sm:$0xff] %v2656_v1  ;;  %v268_v37 = vmul.f32 %v2602_v44, %v2656_v1  ;;  %v269_v38 = vmul.f32 %v2604_v45, %v2656_v1  ;;  %v270_v11 = vmul.f32 %v2606_v46, %v2656_v1 }
  0x81   :  { %v308_v13 = vadd.f32 %v276_v62, %v204_v58  ;;  %v309_v14 = vadd.f32 %v277_v63, %v205_v59  ;;  %v310_v15 = vadd.f32 %v278_v0, %v206_v60  ;;  %v311_v16 = vadd.f32 %v279_v2, %v207_v61 }
  0x82   :  { %v2646_v7 = vpop.permute.xlu2 %429  ;;  %v300_v61 = vadd.f32 %v268_v37, %v196_v54  ;;  %v372_v62 = vmul.f32 %v2638_v3, %v2590_v31  ;;  %v301_v2 = vadd.f32 %v269_v38, %v197_v55 }
  0x83   :  { %v412_v26 = vadd.f32 %v380_v17, %v308_v13  ;;  %v413_v20 = vadd.f32 %v381_v18, %v309_v14  ;;  %v414_v27 = vadd.f32 %v382_v19, %v310_v15  ;;  %v415_v28 = vadd.f32 %v383_v21, %v311_v16 }
  0x84   :  { %v198_v15 = vmul.f32 %v2616_v51, %v2610_v48  ;;  %v404_v18 = vadd.f32 %v372_v62, %v300_v61  ;;  %v476_v19 = vmul.f32 %v2658_v12, %v2646_v7  ;;  %v477_v38 = vmul.f32 %v2660_v22, %v2646_v7 }
  0x85   :  { %v478_v62 = vmul.f32 %v2662_v23, %v2646_v7 }
  0x87   :  { %v2666_v25 = vpop.permute.xlu0 %433 }
  0x88   :  { %4326 = vst [vmem:[#allocation14_spill] sm:$0xff] %v2666_v25  ;;  %v484_v33 = vmul.f32 %v2658_v12, %v2666_v25  ;;  %v485_v34 = vmul.f32 %v2660_v22, %v2666_v25  ;;  %v486_v35 = vmul.f32 %v2662_v23, %v2666_v25  ;;  %v487_v36 = vmul.f32 %v2664_v24, %v2666_v25  ;;  %v2763_v25 = vpop.permute.xlu1 %217 }
  0x8a   :  { %v516_v39 = vadd.f32 %v484_v33, %v412_v26  ;;  %v517_v40 = vadd.f32 %v485_v34, %v413_v20  ;;  %v518_v41 = vadd.f32 %v486_v35, %v414_v27  ;;  %v519_v42 = vadd.f32 %v487_v36, %v415_v28 }
  0x8b   :  { %v2680_v53 = vpop.permute.xlu2 %545  ;;  %v405_v20 = vadd.f32 %v373_v8, %v301_v2  ;;  %v302_v33 = vadd.f32 %v270_v11, %v198_v15  ;;  %v374_v34 = vmul.f32 %v2642_v5, %v2590_v31 }
  0x8c   :  { %4327 = vst [vmem:[#allocation15_spill] sm:$0xff] %v2680_v53  ;;  %v2687_v56 = vadd.f32 %v2680_v53, %v516_v39  ;;  %v2690_v58 = vadd.f32 %v2680_v53, %v517_v40  ;;  %v2693_v59 = vadd.f32 %v2680_v53, %v518_v41  ;;  %v2696_v60 = vadd.f32 %v2680_v53, %v519_v42 }
  0x8d   :  { %v2746_v42 = vadd.f32 %v476_v19, %v404_v18 }
  0x8e   :  { %v2701_v63 = vmul.f32 0.70710677, %v2687_v56  ;;  %v2704_v0 = vmul.f32 0.70710677, %v2690_v58  ;;  %v2709_v9 = vmul.f32 0.70710677, %v2693_v59 }
  0x8f   :  { %v2712_v10 = vmul.f32 0.70710677, %v2696_v60 }
  0x90   :  { %v1604_v13 = vmul.f32 %v2701_v63, %v2701_v63  ;;  %v1644_v14 = vmul.f32 %v2704_v0, %v2704_v0  ;;  %v1684_v16 = vmul.f32 %v2709_v9, %v2709_v9 }
  0x91   :  { %v1724_v17 = vmul.f32 %v2712_v10, %v2712_v10 }
  0x92   :  { %v2728_v21 = vmin.f32 %v1604_v13, 16.0  ;;  %v2730_v26 = vmin.f32 %v1644_v14, 16.0  ;;  %v2732_v27 = vmin.f32 %v1684_v16, 16.0  ;;  %v406_v13 = vadd.f32 %v374_v34, %v302_v33 }
  0x93   :  { %v2734_v28 = vmin.f32 %v1724_v17, 16.0  ;;  %v2758_v33 = vadd.f32 %v477_v38, %v405_v20 }
  0x94   :  { %v1606_v35 = vmul.f32 2.1237322e-06, %v2728_v21  ;;  %v1617_v36 = vmul.f32 3.8918573e-05, %v2728_v21  ;;  %v1646_v37 = vmul.f32 2.1237322e-06, %v2730_v26 }
  0x95   :  { %v1657_v39 = vmul.f32 3.8918573e-05, %v2730_v26  ;;  %v1686_v40 = vmul.f32 2.1237322e-06, %v2732_v27  ;;  %v1697_v41 = vmul.f32 3.8918573e-05, %v2732_v27 }
  0x96   :  { %v1607_v54 = vadd.f32 0.00028619796, %v1606_v35  ;;  %v1618_v55 = vadd.f32 0.001143296, %v1617_v36  ;;  %v1647_v61 = vadd.f32 0.00028619796, %v1646_v37 }
  0x97   :  { %v1658_v2 = vadd.f32 0.001143296, %v1657_v39  ;;  %v1687_v8 = vadd.f32 0.00028619796, %v1686_v40  ;;  %v1698_v11 = vadd.f32 0.001143296, %v1697_v41 }
  0x98   :  { %v1608_v14 = vmul.f32 %v1607_v54, %v2728_v21  ;;  %v1619_v15 = vmul.f32 %v1618_v55, %v2728_v21  ;;  %v1648_v16 = vmul.f32 %v1647_v61, %v2730_v26  ;;  %v1726_v17 = vmul.f32 2.1237322e-06, %v2734_v28 }
  0x99   :  { %v1659_v18 = vmul.f32 %v1658_v2, %v2730_v26  ;;  %v1688_v19 = vmul.f32 %v1687_v8, %v2732_v27  ;;  %v1699_v35 = vmul.f32 %v1698_v11, %v2732_v27  ;;  %v1737_v36 = vmul.f32 3.8918573e-05, %v2734_v28 }
  0x9a   :  { %v1609_v37 = vadd.f32 0.0036580483, %v1608_v14  ;;  %v1620_v39 = vadd.f32 0.014752088, %v1619_v15  ;;  %v1649_v40 = vadd.f32 0.0036580483, %v1648_v16  ;;  %v510_v55 = vadd.f32 %v478_v62, %v406_v13 }
  0x9b   :  { %v1660_v34 = vadd.f32 0.014752088, %v1659_v18  ;;  %v1689_v41 = vadd.f32 0.0036580483, %v1688_v19  ;;  %v1700_v54 = vadd.f32 0.014752088, %v1699_v35 }
  0x9c   :  { %v1610_v61 = vmul.f32 %v1609_v37, %v2728_v21  ;;  %v1621_v53 = vmul.f32 %v1620_v39, %v2728_v21  ;;  %v1650_v2 = vmul.f32 %v1649_v40, %v2730_v26  ;;  %v1727_v8 = vadd.f32 0.00028619796, %v1726_v17 }
  0x9d   :  { %v1661_v11 = vmul.f32 %v1660_v34, %v2730_v26  ;;  %v1690_v14 = vmul.f32 %v1689_v41, %v2732_v27  ;;  %v1701_v20 = vmul.f32 %v1700_v54, %v2732_v27  ;;  %v1738_v38 = vadd.f32 0.001143296, %v1737_v36 }
  0x9e   :  { %v1611_v15 = vadd.f32 0.05243302, %v1610_v61  ;;  %v1622_v16 = vadd.f32 0.112945676, %v1621_v53  ;;  %v1651_v18 = vadd.f32 0.05243302, %v1650_v2  ;;  %v1728_v62 = vmul.f32 %v1727_v8, %v2734_v28 }
  0x9f   :  { %v1662_v13 = vadd.f32 0.112945676, %v1661_v11  ;;  %v1691_v19 = vadd.f32 0.05243302, %v1690_v14  ;;  %v1702_v35 = vadd.f32 0.112945676, %v1701_v20  ;;  %v1739_v37 = vmul.f32 %v1738_v38, %v2734_v28 }
  0xa0   :  { %v1612_v17 = vmul.f32 %v1611_v15, %v2728_v21  ;;  %v1623_v39 = vmul.f32 %v1622_v16, %v2728_v21  ;;  %v1652_v40 = vmul.f32 %v1651_v18, %v2730_v26  ;;  %v1729_v34 = vadd.f32 0.0036580483, %v1728_v62 }
  0xa1   :  { %v1663_v41 = vmul.f32 %v1662_v13, %v2730_v26  ;;  %v1692_v36 = vmul.f32 %v1691_v19, %v2732_v27  ;;  %v1703_v53 = vmul.f32 %v1702_v35, %v2732_v27  ;;  %v1740_v54 = vadd.f32 0.014752088, %v1739_v37  ;;  %v2782_v19 = vpop.permute.xlu2 %540 }
  0xa2   :  { %v1613_v61 = vadd.f32 0.18741608, %v1612_v17  ;;  %v1624_v2 = vadd.f32 0.4994258, %v1623_v39  ;;  %v1653_v8 = vadd.f32 0.18741608, %v1652_v40  ;;  %v1730_v11 = vmul.f32 %v1729_v34, %v2734_v28 }
  0xa3   :  { %v1664_v14 = vadd.f32 0.4994258, %v1663_v41  ;;  %v1693_v20 = vadd.f32 0.18741608, %v1692_v36  ;;  %v1704_v38 = vadd.f32 0.4994258, %v1703_v53  ;;  %v1741_v15 = vmul.f32 %v1740_v54, %v2734_v28  ;;  %v2795_v36 = vpop.permute.xlu1 %134 }
  0xa4   :  { %v1614_v16 = vmul.f32 %v1613_v61, %v2728_v21  ;;  %v1625_v18 = vmul.f32 %v1624_v2, %v2728_v21  ;;  %v1731_v62 = vadd.f32 0.05243302, %v1730_v11  ;;  %v199_v13 = vmul.f32 %v2618_v52, %v2610_v48  ;;  %4328 = vst [vmem:[#allocation16_spill] sm:$0xff] %v2795_v36 }
  0xa5   :  { %v1654_v35 = vmul.f32 %v1653_v8, %v2730_v26  ;;  %v1665_v37 = vmul.f32 %v1664_v14, %v2730_v26  ;;  %v1705_v17 = vmul.f32 %v1704_v38, %v2732_v27  ;;  %v1742_v39 = vadd.f32 0.112945676, %v1741_v15 }
  0xa6   :  { %v2788_v40 = vmul.f32 0.5, %v2687_v56  ;;  %v2790_v34 = vadd.f32 1.0, %v1625_v18  ;;  %v1694_v21 = vmul.f32 %v1693_v20, %v2732_v27  ;;  %v271_v41 = vmul.f32 %v2608_v47, %v2656_v1 }
  0xa7   :  { %v1615_v53 = vadd.f32 1.1283791, %v1614_v16  ;;  %v2798_v54 = vmul.f32 0.5, %v2690_v58  ;;  %v2800_v26 = vadd.f32 1.0, %v1665_v37  ;;  %v2802_v61 = vadd.f32 1.0, %v1705_v17 }
  0xa8   :  { %2344 = vrcp.f32 %v2790_v34  ;;  %v2806_v56 = vmul.f32 0.5, %v2693_v59  ;;  %v1732_v27 = vmul.f32 %v1731_v62, %v2734_v28  ;;  %v2811_v2 = vadd.f32 %v2782_v19, %v2746_v42 }
  0xa9   :  { %v1655_v8 = vadd.f32 1.1283791, %v1654_v35  ;;  %2346 = vrcp.f32 %v2800_v26  ;;  %v1743_v58 = vmul.f32 %v1742_v39, %v2734_v28  ;;  %v2817_v11 = vadd.f32 %v2782_v19, %v2758_v33 }
  0xaa   :  { %v1695_v14 = vadd.f32 1.1283791, %v1694_v21  ;;  %v2820_v20 = vadd.f32 %v2782_v19, %v510_v55  ;;  %v2822_v59 = vadd.f32 %v271_v41, %v199_v13  ;;  %v2826_v38 = vmul.f32 %v2644_v6, %v2590_v31 }
  0xab   :  { %v2829_v42 = vmul.f32 %v1615_v53, %v2701_v63  ;;  %v1636_v15 = vand.u32 2147483647, %v2790_v34  ;;  %v1638_v16 = vand.u32 2147483648, %v2790_v34  ;;  %2348 = vrcp.f32 %v2802_v61  ;;  %v2867_v29 = vpop.permute.xlu1 %321 }
  0xac   :  { %v1676_v33 = vand.u32 2147483647, %v2800_v26  ;;  %v1678_v55 = vand.u32 2147483648, %v2800_v26  ;;  %v1718_v18 = vand.u32 2147483648, %v2802_v61  ;;  %v1733_v62 = vadd.f32 0.18741608, %v1732_v27 }
  0xad   :  { %vm1632_vm12 = vweird.f32 %v2790_v34  ;;  %v2839_v13 = vmul.f32 %v1655_v8, %v2704_v0  ;;  %v1744_v63 = vadd.f32 0.4994258, %v1743_v58  ;;  %v2842_v35 = vmul.f32 0.70710677, %v2811_v2  ;;  %4333 = vst [vmem:[#allocation17_spill] sm:$0xff] %v2867_v29 }
  0xae   :  { %v2345_v37 = vpop.eup %2344  ;;  %vm1672_vm13 = vweird.f32 %v2800_v26  ;;  %v2846_v17 = vmul.f32 %v1695_v14, %v2709_v9  ;;  %v1716_v39 = vand.u32 2147483647, %v2802_v61  ;;  %v1734_v21 = vmul.f32 %v1733_v62, %v2734_v28 }
  0xaf   :  { %v2851_v41 = vmul.f32 0.70710677, %v2817_v11  ;;  %v2347_v53 = vpop.eup %2346  ;;  %v1628_v0 = vmul.f32 %v2345_v37, %v2790_v34  ;;  %vm2854_vm14 = vcmp.eq.f32.partialorder %v1636_v15, 8.507059e+37  ;;  %v1639_v8 = vor.u32 1.1754944e-38, %v1638_v16 }
  0xb0   :  { %v1745_v58 = vmul.f32 %v1744_v63, %v2734_v28  ;;  %v1284_v9 = vmul.f32 %v2842_v35, %v2842_v35  ;;  %v1668_v14 = vmul.f32 %v2347_v53, %v2800_v26  ;;  %vm2862_vm15 = vcmp.eq.f32.partialorder %v1676_v33, 8.507059e+37 }
  0xb1   :  { %v1679_v31 = vor.u32 1.1754944e-38, %v1678_v55  ;;  %vm1712_vm0 = vweird.f32 %v2802_v61  ;;  %v1719_v1 = vor.u32 1.1754944e-38, %v1718_v18  ;;  %v1735_v15 = vadd.f32 1.1283791, %v1734_v21  ;;  %v2349_v48 = vpop.eup %2348 }
  0xb2   :  { %v1629_v16 = vsub.f32 1.0, %v1628_v0  ;;  %v2869_v57 = vadd.f32 1.0, %v1745_v58  ;;  %v2871_v28 = vmin.f32 %v1284_v9, 16.0  ;;  %v1324_v63 = vmul.f32 %v2851_v41, %v2851_v41 }
  0xb3   :  { %vm1633_vm1 = vweird.f32 %v2345_v37  ;;  %v1669_v33 = vsub.f32 1.0, %v1668_v14  ;;  %vm1673_vm2 = vweird.f32 %v2347_v53  ;;  %v1708_v55 = vmul.f32 %v2349_v48, %v2802_v61 }
  0xb4   :  { %vm2876_vm3 = vcmp.eq.f32.partialorder %v1716_v39, 8.507059e+37  ;;  %v1630_v18 = vmul.f32 %v2345_v37, %v1629_v16  ;;  %vm1713_vm4 = vweird.f32 %v2349_v48  ;;  %v2881_v21 = vmul.f32 %v1735_v15, %v2712_v10  ;;  %vm1634_vm5 = vmor %vm1632_vm12, %vm1633_vm1 }
  0xb5   :  { %2350 = vrcp.f32 %v2869_v57  ;;  %v1670_v0 = vmul.f32 %v2347_v53, %v1669_v33  ;;  %v1709_v58 = vsub.f32 1.0, %v1708_v55  ;;  %v1758_v9 = vand.u32 2147483648, %v2869_v57  ;;  %vm1674_vm6 = vmor %vm1672_vm13, %vm1673_vm2 }
  0xb6   :  { %v1286_v14 = vmul.f32 2.1237322e-06, %v2871_v28  ;;  %v1631_v43 = vadd.f32 %v2345_v37, %v1630_v18  ;;  %v1756_v36 = vand.u32 2147483647, %v2869_v57  ;;  %v1297_v39 = vmul.f32 3.8918573e-05, %v2871_v28  ;;  %vm1714_vm8 = vmor %vm1712_vm0, %vm1713_vm4 }
  0xb7   :  { %v2888_v6 = vmin.f32 %v1324_v63, 16.0  ;;  %v1671_v10 = vadd.f32 %v2347_v53, %v1670_v0  ;;  %v1710_v15 = vmul.f32 %v2349_v48, %v1709_v58  ;;  %v1759_v16 = vor.u32 1.1754944e-38, %v1758_v9  ;;  %v2898_v63 = vpop.permute.xlu2 %2005 }
  0xb8   :  { %v1287_v33 = vadd.f32 0.00028619796, %v1286_v14  ;;  %v1635_v55 = vsel %vm1634_vm5, %v2345_v37, %v1631_v43  ;;  %v1298_v18 = vadd.f32 0.001143296, %v1297_v39  ;;  %vm1752_vm7 = vweird.f32 %v2869_v57 }
  0xb9   :  { %v1326_v52 = vmul.f32 2.1237322e-06, %v2888_v6  ;;  %v1337_v47 = vmul.f32 3.8918573e-05, %v2888_v6  ;;  %v1640_v34 = vsel %vm2854_vm14, %v1639_v8, %v1635_v55  ;;  %v1675_v23 = vsel %vm1674_vm6, %v2347_v53, %v1671_v10 }
  0xba   :  { %v1711_v0 = vadd.f32 %v2349_v48, %v1710_v15  ;;  %v1288_v43 = vmul.f32 %v1287_v33, %v2871_v28  ;;  %v1641_v26 = vmul.f32 %v1640_v34, %v2829_v42  ;;  %v1680_v58 = vsel %vm2862_vm15, %v1679_v31, %v1675_v23  ;;  %v2917_v42 = vpop.permute.xlu1 %425 }
  0xbb   :  { %v2351_v37 = vpop.eup %2350  ;;  %v1299_v9 = vmul.f32 %v1298_v18, %v2871_v28  ;;  %v1327_v27 = vadd.f32 0.00028619796, %v1326_v52  ;;  %v1681_v53 = vmul.f32 %v1680_v58, %v2839_v13  ;;  %vm2913_vm10 = vcmp.eq.f32.partialorder %v1756_v36, 8.507059e+37 }
  0xbc   :  { %v1715_v8 = vsel %vm1714_vm8, %v2349_v48, %v1711_v0  ;;  %v1748_v14 = vmul.f32 %v2351_v37, %v2869_v57  ;;  %vm1753_vm9 = vweird.f32 %v2351_v37  ;;  %v2299_v31 = vclamps-f32 %v1641_v26, 1.0 }
  0xbd   :  { %v1720_v23 = vsel %vm2876_vm3, %v1719_v1, %v1715_v8  ;;  %v1289_v61 = vadd.f32 0.0036580483, %v1288_v43  ;;  %v1300_v62 = vadd.f32 0.014752088, %v1299_v9  ;;  %v2300_v10 = vclamps-f32 %v1681_v53, 1.0  ;;  %vm1754_vm11 = vmor %vm1752_vm7, %vm1753_vm9 }
  0xbe   :  { %v1721_v52 = vmul.f32 %v1720_v23, %v2846_v17  ;;  %v1749_v13 = vsub.f32 1.0, %v1748_v14  ;;  %v1328_v48 = vmul.f32 %v1327_v27, %v2888_v6  ;;  %v1948_v15 = vadd.f32 1.0, %v2299_v31 }
  0xbf   :  { %v1290_v36 = vmul.f32 %v1289_v61, %v2871_v28  ;;  %v1301_v33 = vmul.f32 %v1300_v62, %v2871_v28  ;;  %v1338_v55 = vadd.f32 0.001143296, %v1337_v47  ;;  %v1949_v18 = vadd.f32 1.0, %v2300_v10  ;;  %v2935_v31 = vpop.permute.xlu2 %2057 }
  0xc0   :  { %v2301_v34 = vclamps-f32 %v1721_v52, 1.0  ;;  %v1750_v0 = vmul.f32 %v2351_v37, %v1749_v13  ;;  %v1329_v26 = vadd.f32 0.0036580483, %v1328_v48  ;;  %v1980_v32 = vmul.f32 %v1948_v15, %v2788_v40 }
  0xc1   :  { %v1291_v1 = vadd.f32 0.05243302, %v1290_v36  ;;  %v1302_v43 = vadd.f32 0.112945676, %v1301_v33  ;;  %v1339_v58 = vmul.f32 %v1338_v55, %v2888_v6  ;;  %v1981_v17 = vmul.f32 %v1949_v18, %v2798_v54 }
  0xc2   :  { %v1950_v9 = vadd.f32 1.0, %v2301_v34  ;;  %v1751_v27 = vadd.f32 %v2351_v37, %v1750_v0  ;;  %v1330_v53 = vmul.f32 %v1329_v26, %v2888_v6  ;;  %v2032_v8 = vmul.f32 %v2898_v63, %v1980_v32  ;;  %v2946_v55 = vpop.permute.xlu1 %421 }
  0xc3   :  { %v1292_v47 = vmul.f32 %v1291_v1, %v2871_v28  ;;  %v1303_v40 = vmul.f32 %v1302_v43, %v2871_v28  ;;  %v1340_v14 = vadd.f32 0.014752088, %v1339_v58  ;;  %v2033_v23 = vmul.f32 %v2898_v63, %v1981_v17  ;;  %4338 = vst [vmem:[#allocation18_spill] sm:$0xff] %v2946_v55 }
  0xc4   :  { %v1982_v54 = vmul.f32 %v1950_v9, %v2806_v56  ;;  %v1755_v61 = vsel %vm1754_vm11, %v2351_v37, %v1751_v27  ;;  %v1331_v62 = vadd.f32 0.05243302, %v1330_v53  ;;  %v2084_v10 = vadd.f32 %v2935_v31, %v2032_v8 }
  0xc5   :  { %v1760_v52 = vsel %vm2913_vm10, %v1759_v16, %v1755_v61  ;;  %v1293_v57 = vadd.f32 0.18741608, %v1292_v47  ;;  %v1304_v13 = vadd.f32 0.4994258, %v1303_v40  ;;  %v2085_v48 = vadd.f32 %v2935_v31, %v2033_v23  ;;  %v2980_v23 = vpop.permute.xlu0 %317 }
  0xc6   :  { %v2034_v15 = vmul.f32 %v2898_v63, %v1982_v54  ;;  %v1761_v36 = vmul.f32 %v1760_v52, %v2881_v21  ;;  %v1332_v33 = vmul.f32 %v1331_v62, %v2888_v6  ;;  %2115 = vmatpush.msra.mxu0 %v2084_v10  ;;  %v1341_v39 = vmul.f32 %v1340_v14, %v2888_v6 }
  0xc7   :  { %v1294_v56 = vmul.f32 %v1293_v57, %v2871_v28  ;;  %v1305_v37 = vmul.f32 %v1304_v13, %v2871_v28  ;;  %v2952_v16 = vmul.f32 0.70710677, %v2820_v20  ;;  %2135 = vmatpush.msra.mxu1 %v2085_v48  ;;  %v407_v1 = vadd.f32 %v2826_v38, %v2822_v59  ;;  %4339 = vst [vmem:[#allocation19_spill] sm:$0xff] %v2980_v23 }
  0xc8   :  { %v2086_v18 = vadd.f32 %v2935_v31, %v2034_v15  ;;  %v2302_v34 = vclamps-f32 %v1761_v36, 1.0  ;;  %v1333_v0 = vadd.f32 0.18741608, %v1332_v33  ;;  %v1342_v26 = vadd.f32 0.112945676, %v1341_v39 }
  0xc9   :  { %v2955_v21 = vadd.f32 1.0, %v1305_v37  ;;  %v1364_v32 = vmul.f32 %v2952_v16, %v2952_v16  ;;  %v607_v28 = vmul.f32 0.5, %v2696_v60  ;;  %v1295_v58 = vadd.f32 1.1283791, %v1294_v56 }
  0xca   :  { %2155 = vmatpush.msra.mxu2 %v2086_v18  ;;  %v1951_v43 = vadd.f32 1.0, %v2302_v34  ;;  %v479_v17 = vmul.f32 %v2664_v24, %v2646_v7  ;;  %v2966_v27 = vmul.f32 0.5, %v2811_v2  ;;  %v1343_v53 = vmul.f32 %v1342_v26, %v2888_v6  ;;  %v2993_v15 = vpop.permute.xlu1 %530 }
  0xcb   :  { %2352 = vrcp.f32 %v2955_v21  ;;  %v1334_v8 = vmul.f32 %v1333_v0, %v2888_v6  ;;  %v2970_v47 = vmin.f32 %v1364_v32, 16.0  ;;  %v260_v60 = vmul.f32 %v2602_v44, %v2763_v25  ;;  %4340 = vst [vmem:[#allocation20_spill] sm:$0xff] %v2993_v15 }
  0xcc   :  { %v1983_v9 = vmul.f32 %v1951_v43, %v607_v28  ;;  %v511_v59 = vadd.f32 %v479_v17, %v407_v1  ;;  %v2976_v40 = vmul.f32 %v1295_v58, %v2842_v35  ;;  %v1344_v14 = vadd.f32 0.4994258, %v1343_v53 }
  0xcd   :  { %v188_v2 = vmul.f32 %v2612_v49, %v2588_v30  ;;  %v1316_v54 = vand.u32 2147483647, %v2955_v21  ;;  %v1366_v61 = vmul.f32 2.1237322e-06, %v2970_v47  ;;  %v1377_v62 = vmul.f32 3.8918573e-05, %v2970_v47 }
  0xce   :  { %v2035_v38 = vmul.f32 %v2898_v63, %v1983_v9  ;;  %v2986_v10 = vadd.f32 %v2782_v19, %v511_v59  ;;  %v1318_v35 = vand.u32 2147483648, %v2955_v21  ;;  %v1345_v57 = vmul.f32 %v1344_v14, %v2888_v6 }
  0xcf   :  { %v364_v13 = vmul.f32 %v2638_v3, %v2867_v29  ;;  %vm1312_vm12 = vweird.f32 %v2955_v21  ;;  %v1367_v36 = vadd.f32 0.00028619796, %v1366_v61  ;;  %v1378_v33 = vadd.f32 0.001143296, %v1377_v62 }
  0xd0   :  { %v2087_v52 = vadd.f32 %v2935_v31, %v2035_v38  ;;  %v292_v56 = vadd.f32 %v260_v60, %v188_v2  ;;  %v2997_v39 = vadd.f32 1.0, %v1345_v57  ;;  %v3000_v18 = vmul.f32 0.70710677, %v2986_v10  ;;  %v3016_v38 = vpop.permute.xlu0 %535 }
  0xd1   :  { %v2353_v48 = vpop.eup %2352  ;;  %v468_v6 = vmul.f32 %v2658_v12, %v2917_v42  ;;  %vm3004_vm13 = vcmp.eq.f32.partialorder %v1316_v54, 8.507059e+37  ;;  %v1335_v0 = vadd.f32 1.1283791, %v1334_v8  ;;  %v1368_v26 = vmul.f32 %v1367_v36, %v2970_v47 }
  0xd2   :  { %2175 = vmatpush.msra.mxu3 %v2087_v52  ;;  %v1308_v37 = vmul.f32 %v2353_v48, %v2955_v21  ;;  %v1379_v32 = vmul.f32 %v1378_v33, %v2970_v47  ;;  %v1319_v28 = vor.u32 1.1754944e-38, %v1318_v35  ;;  %2354 = vrcp.f32 %v2997_v39 }
  0xd3   :  { %v396_v43 = vadd.f32 %v364_v13, %v292_v56  ;;  %v1369_v58 = vadd.f32 0.0036580483, %v1368_v26  ;;  %v1404_v9 = vmul.f32 %v3000_v18, %v3000_v18  ;;  %v261_v53 = vmul.f32 %v2604_v45, %v2763_v25 }
  0xd4   :  { %v1309_v1 = vsub.f32 1.0, %v1308_v37  ;;  %v1380_v17 = vadd.f32 0.014752088, %v1379_v32  ;;  %vm1313_vm14 = vweird.f32 %v2353_v48  ;;  %v1358_v8 = vand.u32 2147483648, %v2997_v39  ;;  %v3037_v32 = vpop.permute.xlu1 %2000 }
  0xd5   :  { %v500_v60 = vadd.f32 %v468_v6, %v396_v43  ;;  %v1370_v14 = vmul.f32 %v1369_v58, %v2970_v47  ;;  %v3020_v54 = vmin.f32 %v1404_v9, 16.0  ;;  %v189_v61 = vmul.f32 %v2614_v50, %v2588_v30  ;;  %vm1314_vm15 = vmor %vm1312_vm12, %vm1313_vm14 }
  0xd6   :  { %v1310_v59 = vmul.f32 %v2353_v48, %v1309_v1  ;;  %v1381_v2 = vmul.f32 %v1380_v17, %v2970_v47  ;;  %v1336_v52 = vmul.f32 %v1335_v0, %v2851_v41  ;;  %v1356_v35 = vand.u32 2147483647, %v2997_v39 }
  0xd7   :  { %v3027_v57 = vadd.f32 %v3016_v38, %v500_v60  ;;  %vm1352_vm0 = vweird.f32 %v2997_v39  ;;  %v1371_v13 = vadd.f32 0.05243302, %v1370_v14  ;;  %v1406_v33 = vmul.f32 2.1237322e-06, %v3020_v54 }
  0xd8   :  { %v1311_v62 = vadd.f32 %v2353_v48, %v1310_v59  ;;  %v1382_v36 = vadd.f32 0.112945676, %v1381_v2  ;;  %v293_v56 = vadd.f32 %v261_v53, %v189_v61  ;;  %v2355_v37 = vpop.eup %2354  ;;  %v1359_v26 = vor.u32 1.1754944e-38, %v1358_v8 }
  0xd9   :  { %v1417_v41 = vmul.f32 3.8918573e-05, %v3020_v54  ;;  %v3035_v0 = vmul.f32 0.70710677, %v3027_v57  ;;  %v1348_v1 = vmul.f32 %v2355_v37, %v2997_v39  ;;  %v1372_v43 = vmul.f32 %v1371_v13, %v2970_v47 }
  0xda   :  { %v1315_v6 = vsel %vm1314_vm15, %v2353_v48, %v1311_v62  ;;  %v365_v58 = vmul.f32 %v2640_v4, %v2867_v29  ;;  %v1383_v17 = vmul.f32 %v1382_v36, %v2970_v47  ;;  %v1407_v9 = vadd.f32 0.00028619796, %v1406_v33 }
  0xdb   :  { %v1320_v21 = vsel %vm3004_vm13, %v1319_v28, %v1315_v6  ;;  %v1418_v53 = vadd.f32 0.001143296, %v1417_v41  ;;  %v1349_v59 = vsub.f32 1.0, %v1348_v1  ;;  %v1373_v8 = vadd.f32 0.18741608, %v1372_v43 }
  0xdc   :  { %v1321_v48 = vmul.f32 %v1320_v21, %v2976_v40  ;;  %v964_v60 = vmul.f32 %v3035_v0, %v3035_v0  ;;  %v469_v34 = vmul.f32 %v2660_v22, %v2917_v42  ;;  %v1384_v14 = vadd.f32 0.4994258, %v1383_v17 }
  0xdd   :  { %v1408_v2 = vmul.f32 %v1407_v9, %v3020_v54  ;;  %v1419_v61 = vmul.f32 %v1418_v53, %v3020_v54  ;;  %v1350_v62 = vmul.f32 %v2355_v37, %v1349_v59  ;;  %vm1353_vm1 = vweird.f32 %v2355_v37 }
  0xde   :  { %v2291_v28 = vclamps-f32 %v1321_v48, 1.0  ;;  %v3053_v40 = vmin.f32 %v964_v60, 16.0  ;;  %v397_v13 = vadd.f32 %v365_v58, %v293_v56  ;;  %v1385_v33 = vmul.f32 %v1384_v14, %v2970_v47  ;;  %vm1354_vm2 = vmor %vm1352_vm0, %vm1353_vm1 }
  0xdf   :  { %v1409_v6 = vadd.f32 0.0036580483, %v1408_v2  ;;  %v1420_v41 = vadd.f32 0.014752088, %v1419_v61  ;;  %v1351_v21 = vadd.f32 %v2355_v37, %v1350_v62  ;;  %v1374_v1 = vmul.f32 %v1373_v8, %v2970_v47 }
  0xe0   :  { %v1940_v36 = vadd.f32 1.0, %v2291_v28  ;;  %v966_v43 = vmul.f32 2.1237322e-06, %v3053_v40  ;;  %v977_v48 = vmul.f32 3.8918573e-05, %v3053_v40  ;;  %v3062_v9 = vadd.f32 1.0, %v1385_v33 }
  0xe1   :  { %v1410_v56 = vmul.f32 %v1409_v6, %v3020_v54  ;;  %v1421_v58 = vmul.f32 %v1420_v41, %v3020_v54  ;;  %v1355_v53 = vsel %vm1354_vm2, %v2355_v37, %v1351_v21  ;;  %vm1357_vm3 = vcmp.eq.f32.partialorder %v1356_v35, 8.507059e+37 }
  0xe2   :  { %v1972_v17 = vmul.f32 %v1940_v36, %v2966_v27  ;;  %v967_v59 = vadd.f32 0.00028619796, %v966_v43  ;;  %v978_v60 = vadd.f32 0.001143296, %v977_v48  ;;  %v1360_v8 = vsel %vm1357_vm3, %v1359_v26, %v1355_v53  ;;  %v3068_v27 = vpop.permute.xlu1 %2052 }
  0xe3   :  { %2356 = vrcp.f32 %v3062_v9  ;;  %v501_v28 = vadd.f32 %v469_v34, %v397_v13  ;;  %4343 = vst [vmem:[#allocation21_spill] sm:$0xff] %v3068_v27  ;;  %v597_v39 = vmul.f32 0.5, %v2817_v11  ;;  %v1361_v14 = vmul.f32 %v1360_v8, %v1336_v52 }
  0xe4   :  { %v2024_v47 = vmul.f32 %v3037_v32, %v1972_v17  ;;  %v1375_v2 = vadd.f32 1.1283791, %v1374_v1  ;;  %v1411_v61 = vadd.f32 0.05243302, %v1410_v56  ;;  %v1422_v36 = vadd.f32 0.112945676, %v1421_v58 }
  0xe5   :  { %v968_v35 = vmul.f32 %v967_v59, %v3053_v40  ;;  %v979_v37 = vmul.f32 %v978_v60, %v3053_v40  ;;  %v2292_v33 = vclamps-f32 %v1361_v14, 1.0  ;;  %v3075_v26 = vmul.f32 0.5, %v2820_v20 }
  0xe6   :  { %v2076_v62 = vadd.f32 %v3068_v27, %v2024_v47  ;;  %v3078_v34 = vmul.f32 0.5, %v2986_v10  ;;  %v1412_v13 = vmul.f32 %v1411_v61, %v3020_v54  ;;  %v1423_v11 = vmul.f32 %v1422_v36, %v3020_v54 }
  0xe7   :  { %v969_v52 = vadd.f32 0.0036580483, %v968_v35  ;;  %v980_v6 = vadd.f32 0.014752088, %v979_v37  ;;  %v3083_v41 = vadd.f32 %v3016_v38, %v501_v28  ;;  %v1941_v21 = vadd.f32 1.0, %v2292_v33 }
  0xe8   :  { %2116 = vmatpush.msra.mxu0 %v2076_v62  ;;  %v1376_v1 = vmul.f32 %v1375_v2, %v2952_v16  ;;  %v1413_v43 = vadd.f32 0.18741608, %v1412_v13  ;;  %v190_v20 = vmul.f32 %v2616_v51, %v2588_v30  ;;  %v1396_v10 = vand.u32 2147483647, %v3062_v9 }
  0xe9   :  { %v2357_v48 = vpop.eup %2356  ;;  %v1424_v17 = vadd.f32 0.4994258, %v1423_v11  ;;  %v970_v56 = vmul.f32 %v969_v52, %v3053_v40  ;;  %v981_v58 = vmul.f32 %v980_v6, %v3053_v40  ;;  %v1973_v53 = vmul.f32 %v1941_v21, %v597_v39 }
  0xea   :  { %v1388_v59 = vmul.f32 %v2357_v48, %v3062_v9  ;;  %v1414_v60 = vmul.f32 %v1413_v43, %v3020_v54  ;;  %v262_v16 = vmul.f32 %v2606_v46, %v2763_v25  ;;  %v3097_v14 = vmul.f32 0.70710677, %v3083_v41 }
  0xeb   :  { %v1425_v47 = vmul.f32 %v1424_v17, %v3020_v54  ;;  %v971_v8 = vadd.f32 0.05243302, %v970_v56  ;;  %v982_v28 = vadd.f32 0.112945676, %v981_v58  ;;  %v2025_v2 = vmul.f32 %v3037_v32, %v1973_v53 }
  0xec   :  { %v1389_v61 = vsub.f32 1.0, %v1388_v59  ;;  %v1398_v62 = vand.u32 2147483648, %v3062_v9  ;;  %v366_v39 = vmul.f32 %v2642_v5, %v2867_v29  ;;  %v1004_v54 = vmul.f32 %v3097_v14, %v3097_v14 }
  0xed   :  { %v3103_v36 = vadd.f32 1.0, %v1425_v47  ;;  %v972_v35 = vmul.f32 %v971_v8, %v3053_v40  ;;  %v983_v37 = vmul.f32 %v982_v28, %v3053_v40  ;;  %v2077_v33 = vadd.f32 %v3068_v27, %v2025_v2 }
  0xee   :  { %v1390_v13 = vmul.f32 %v2357_v48, %v1389_v61  ;;  %vm1392_vm4 = vweird.f32 %v3062_v9  ;;  %vm1393_vm5 = vweird.f32 %v2357_v48  ;;  %vm3111_vm6 = vcmp.eq.f32.partialorder %v1396_v10, 8.507059e+37  ;;  %v4346_v10 = vld [vmem:[#allocation13_spill] sm:$0xff] }
  0xef   :  { %v1415_v52 = vadd.f32 1.1283791, %v1414_v60  ;;  %2358 = vrcp.f32 %v3103_v36  ;;  %v294_v6 = vadd.f32 %v262_v16, %v190_v20  ;;  %2136 = vmatpush.msra.mxu1 %v2077_v33  ;;  %v973_v43 = vadd.f32 0.18741608, %v972_v35  ;;  %vm1394_vm7 = vmor %vm1392_vm4, %vm1393_vm5 }
  0xf0   :  { %v1391_v21 = vadd.f32 %v2357_v48, %v1390_v13  ;;  %v984_v17 = vadd.f32 0.4994258, %v983_v37  ;;  %v3116_v56 = vmin.f32 %v1004_v54, 16.0  ;;  %v1399_v58 = vor.u32 1.1754944e-38, %v1398_v62  ;;  %v4347_v13 = vld [vmem:[#allocation7_spill] sm:$0xff] }
  0xf1   :  { %v1436_v53 = vand.u32 2147483647, %v3103_v36  ;;  %v398_v9 = vadd.f32 %v366_v39, %v294_v6  ;;  %v470_v59 = vmul.f32 %v4346_v10, %v2917_v42  ;;  %v1438_v60 = vand.u32 2147483648, %v3103_v36 }
  0xf2   :  { %v1395_v47 = vsel %vm1394_vm7, %v2357_v48, %v1391_v21  ;;  %v985_v8 = vmul.f32 %v984_v17, %v3053_v40  ;;  %v1006_v20 = vmul.f32 2.1237322e-06, %v3116_v56  ;;  %v974_v28 = vmul.f32 %v973_v43, %v3053_v40  ;;  %v4350_v21 = vld [vmem:[#allocation9_spill] sm:$0xff]  ;;  %v4351_v17 = vld [vmem:[#allocation11_spill] sm:$0xff] }
  0xf3   :  { %v1400_v16 = vsel %vm3111_vm6, %v1399_v58, %v1395_v47  ;;  %v1017_v2 = vmul.f32 3.8918573e-05, %v3116_v56  ;;  %v502_v61 = vadd.f32 %v470_v59, %v398_v9  ;;  %v1416_v39 = vmul.f32 %v1415_v52, %v3000_v18 }
  0xf4   :  { %v1401_v62 = vmul.f32 %v1400_v16, %v1376_v1  ;;  %v3129_v35 = vadd.f32 1.0, %v985_v8  ;;  %v1007_v48 = vadd.f32 0.00028619796, %v1006_v20  ;;  %vm1432_vm8 = vweird.f32 %v3103_v36 }
  0xf5   :  { %v2359_v37 = vpop.eup %2358  ;;  %v1018_v54 = vadd.f32 0.001143296, %v1017_v2  ;;  %v3133_v33 = vadd.f32 %v3016_v38, %v502_v61  ;;  %v263_v11 = vmul.f32 %v4347_v13, %v2763_v25  ;;  %vm3138_vm9 = vcmp.eq.f32.partialorder %v1436_v53, 8.507059e+37 }
  0xf6   :  { %v2293_v40 = vclamps-f32 %v1401_v62, 1.0  ;;  %v1428_v6 = vmul.f32 %v2359_v37, %v3103_v36  ;;  %v1439_v18 = vor.u32 1.1754944e-38, %v1438_v60  ;;  %v975_v52 = vadd.f32 1.1283791, %v974_v28 }
  0xf7   :  { %2360 = vrcp.f32 %v3129_v35  ;;  %v191_v43 = vmul.f32 %v4350_v21, %v2588_v30  ;;  %v367_v58 = vmul.f32 %v4351_v17, %v2867_v29  ;;  %v1008_v47 = vmul.f32 %v1007_v48, %v3116_v56 }
  0xf8   :  { %v1942_v9 = vadd.f32 1.0, %v2293_v40  ;;  %v1429_v59 = vsub.f32 1.0, %v1428_v6  ;;  %v1019_v8 = vmul.f32 %v1018_v54, %v3116_v56  ;;  %vm1433_vm10 = vweird.f32 %v2359_v37 }
  0xf9   :  { %v996_v53 = vand.u32 2147483647, %v3129_v35  ;;  %v3151_v60 = vmul.f32 0.70710677, %v3133_v33  ;;  %v295_v20 = vadd.f32 %v263_v11, %v191_v43  ;;  %v1009_v2 = vadd.f32 0.0036580483, %v1008_v47  ;;  %vm1434_vm11 = vmor %vm1432_vm8, %vm1433_vm10 }
  0xfa   :  { %v1974_v16 = vmul.f32 %v1942_v9, %v3075_v26  ;;  %v1430_v28 = vmul.f32 %v2359_v37, %v1429_v59  ;;  %v1020_v61 = vadd.f32 0.014752088, %v1019_v8  ;;  %v976_v62 = vmul.f32 %v975_v52, %v3035_v0  ;;  %v4354_v8 = vld [vmem:[#allocation16_spill] sm:$0xff] }
  0xfb   :  { %v1044_v40 = vmul.f32 %v3151_v60, %v3151_v60  ;;  %v399_v48 = vadd.f32 %v367_v58, %v295_v20  ;;  %v471_v54 = vmul.f32 %v2664_v24, %v2917_v42  ;;  %v1010_v30 = vmul.f32 %v1009_v2, %v3116_v56 }
  0xfc   :  { %v2026_v6 = vmul.f32 %v3037_v32, %v1974_v16  ;;  %v1431_v29 = vadd.f32 %v2359_v37, %v1430_v28  ;;  %v1021_v11 = vmul.f32 %v1020_v61, %v3116_v56  ;;  %vm992_vm12 = vweird.f32 %v3129_v35 }
  0xfd   :  { %v2361_v26 = vpop.eup %2360  ;;  %v998_v0 = vand.u32 2147483648, %v3129_v35  ;;  %v3167_v52 = vmin.f32 %v1044_v40, 16.0  ;;  %v503_v43 = vadd.f32 %v471_v54, %v399_v48  ;;  %vm3171_vm13 = vcmp.eq.f32.partialorder %v996_v53, 8.507059e+37 }
  0xfe   :  { %v2078_v58 = vadd.f32 %v3068_v27, %v2026_v6  ;;  %v1435_v9 = vsel %vm1434_vm11, %v2359_v37, %v1431_v29  ;;  %v988_v59 = vmul.f32 %v2361_v26, %v3129_v35  ;;  %v180_v36 = vmul.f32 %v2612_v49, %v4354_v8  ;;  %v4355_v49 = vld [vmem:[#allocation6_spill] sm:$0xff] }
  0xff   :  { %v1440_v20 = vsel %vm3138_vm9, %v1439_v18, %v1435_v9  ;;  %v1011_v16 = vadd.f32 0.05243302, %v1010_v30  ;;  %v1022_v28 = vadd.f32 0.112945676, %v1021_v11  ;;  %v1046_v2 = vmul.f32 2.1237322e-06, %v3167_v52 }
 0x100   :  { %2156 = vmatpush.msra.mxu2 %v2078_v58  ;;  %v1441_v61 = vmul.f32 %v1440_v20, %v1416_v39  ;;  %v989_v40 = vsub.f32 1.0, %v988_v59  ;;  %v1057_v29 = vmul.f32 3.8918573e-05, %v3167_v52  ;;  %v3182_v37 = vadd.f32 %v3016_v38, %v503_v43 }
 0x101   :  { %vm993_vm14 = vweird.f32 %v2361_v26  ;;  %v1023_v53 = vmul.f32 %v1022_v28, %v3116_v56  ;;  %v1047_v48 = vadd.f32 0.00028619796, %v1046_v2  ;;  %v252_v1 = vmul.f32 %v2602_v44, %v4355_v49 }
 0x102   :  { %v2294_v18 = vclamps-f32 %v1441_v61, 1.0  ;;  %v990_v30 = vmul.f32 %v2361_v26, %v989_v40  ;;  %v1012_v54 = vmul.f32 %v1011_v16, %v3116_v56  ;;  %v1058_v6 = vadd.f32 0.001143296, %v1057_v29  ;;  %vm994_vm15 = vmor %vm992_vm12, %vm993_vm14 }
 0x103   :  { %v999_v11 = vor.u32 1.1754944e-38, %v998_v0  ;;  %v1024_v39 = vadd.f32 0.4994258, %v1023_v53  ;;  %v1048_v58 = vmul.f32 %v1047_v48, %v3167_v52  ;;  %v3190_v9 = vmul.f32 0.70710677, %v3182_v37  ;;  %v3202_v48 = vpop.permute.xlu0 %1995 }
 0x104   :  { %v1943_v43 = vadd.f32 1.0, %v2294_v18  ;;  %v991_v59 = vadd.f32 %v2361_v26, %v990_v30  ;;  %v1059_v20 = vmul.f32 %v1058_v6, %v3167_v52  ;;  %v356_v28 = vmul.f32 %v2638_v3, %v2980_v23  ;;  %4356 = vst [vmem:[#allocation13_spill] sm:$0xff] %v3202_v48 }
 0x105   :  { %v1025_v44 = vmul.f32 %v1024_v39, %v3116_v56  ;;  %v1049_v0 = vadd.f32 0.0036580483, %v1048_v58  ;;  %v1084_v16 = vmul.f32 %v3190_v9, %v3190_v9  ;;  %v284_v2 = vadd.f32 %v252_v1, %v180_v36 }
 0x106   :  { %v1975_v61 = vmul.f32 %v1943_v43, %v3078_v34  ;;  %v995_v40 = vsel %vm994_vm15, %v2361_v26, %v991_v59  ;;  %v1013_v29 = vadd.f32 0.18741608, %v1012_v54  ;;  %v1060_v53 = vadd.f32 0.014752088, %v1059_v20 }
 0x107   :  { %v1000_v3 = vsel %vm3171_vm13, %v999_v11, %v995_v40  ;;  %v3206_v18 = vadd.f32 1.0, %v1025_v44  ;;  %v1050_v35 = vmul.f32 %v1049_v0, %v3167_v52  ;;  %v460_v30 = vmul.f32 %v2658_v12, %v2946_v55 }
 0x108   :  { %v2027_v6 = vmul.f32 %v3037_v32, %v1975_v61  ;;  %v1001_v36 = vmul.f32 %v1000_v3, %v976_v62  ;;  %v1061_v34 = vmul.f32 %v1060_v53, %v3167_v52  ;;  %v3213_v26 = vmin.f32 %v1084_v16, 16.0 }
 0x109   :  { %v588_v1 = vmul.f32 0.5, %v3027_v57  ;;  %2362 = vrcp.f32 %v3206_v18  ;;  %v388_v47 = vadd.f32 %v356_v28, %v284_v2  ;;  %v3219_v39 = vmul.f32 0.5, %v3083_v41 }
 0x10a   :  { %v2079_v54 = vadd.f32 %v3068_v27, %v2027_v6  ;;  %v2283_v11 = vclamps-f32 %v1001_v36, 1.0  ;;  %v1051_v58 = vadd.f32 0.05243302, %v1050_v35  ;;  %v1014_v12 = vmul.f32 %v1013_v29, %v3116_v56  ;;  %v4375_v27 = vld [vmem:[#allocation4_spill] sm:$0xff] }
 0x10b   :  { %v1062_v43 = vadd.f32 0.112945676, %v1061_v34  ;;  %v1086_v62 = vmul.f32 2.1237322e-06, %v3213_v26  ;;  %v492_v59 = vadd.f32 %v460_v30, %v388_v47  ;;  %v3224_v57 = vmul.f32 0.5, %v3133_v33 }
 0x10c   :  { %2176 = vmatpush.msra.mxu3 %v2079_v54  ;;  %v1932_v20 = vadd.f32 1.0, %v2283_v11  ;;  %v1052_v28 = vmul.f32 %v1051_v58, %v3167_v52  ;;  %v1097_v44 = vmul.f32 3.8918573e-05, %v3213_v26  ;;  %v181_v56 = vmul.f32 %v2614_v50, %v4354_v8 }
 0x10d   :  { %v1063_v0 = vmul.f32 %v1062_v43, %v3167_v52  ;;  %v1087_v41 = vadd.f32 0.00028619796, %v1086_v62  ;;  %v3230_v16 = vadd.f32 %v2993_v15, %v492_v59  ;;  %v253_v33 = vmul.f32 %v2604_v45, %v4355_v49 }
 0x10e   :  { %v1964_v2 = vmul.f32 %v1932_v20, %v588_v1  ;;  %v1053_v61 = vadd.f32 0.18741608, %v1052_v28  ;;  %v1098_v40 = vadd.f32 0.001143296, %v1097_v44  ;;  %v1015_v53 = vadd.f32 1.1283791, %v1014_v12  ;;  %v3244_v1 = vpop.permute.xlu0 %2047 }
 0x10f   :  { %v2363_v29 = vpop.eup %2362  ;;  %v1064_v3 = vadd.f32 0.4994258, %v1063_v0  ;;  %v1088_v35 = vmul.f32 %v1087_v41, %v3213_v26  ;;  %v3238_v30 = vmul.f32 0.70710677, %v3230_v16  ;;  %v1036_v50 = vand.u32 2147483647, %v3206_v18 }
 0x110   :  { %v2016_v6 = vmul.f32 %v3202_v48, %v1964_v2  ;;  %v1028_v36 = vmul.f32 %v2363_v29, %v3206_v18  ;;  %v1038_v34 = vand.u32 2147483648, %v3206_v18  ;;  %4357 = vst [vmem:[#allocation7_spill] sm:$0xff] %v3244_v1  ;;  %v1099_v54 = vmul.f32 %v1098_v40, %v3213_v26 }
 0x111   :  { %v1065_v45 = vmul.f32 %v1064_v3, %v3167_v52  ;;  %v1089_v47 = vadd.f32 0.0036580483, %v1088_v35  ;;  %v644_v11 = vmul.f32 %v3238_v30, %v3238_v30  ;;  %v1054_v43 = vmul.f32 %v1053_v61, %v3167_v52 }
 0x112   :  { %v2068_v58 = vadd.f32 %v3244_v1, %v2016_v6  ;;  %v1029_v12 = vsub.f32 1.0, %v1028_v36  ;;  %v285_v62 = vadd.f32 %v253_v33, %v181_v56  ;;  %v1100_v28 = vadd.f32 0.014752088, %v1099_v54 }
 0x113   :  { %v3252_v59 = vadd.f32 1.0, %v1065_v45  ;;  %v1090_v20 = vmul.f32 %v1089_v47, %v3213_v26  ;;  %v3255_v44 = vmin.f32 %v644_v11, 16.0  ;;  %v1016_v0 = vmul.f32 %v1015_v53, %v3097_v14 }
 0x114   :  { %2117 = vmatpush.msra.mxu0 %v2068_v58  ;;  %v1030_v41 = vmul.f32 %v2363_v29, %v1029_v12  ;;  %vm1033_vm0 = vweird.f32 %v2363_v29  ;;  %v357_v2 = vmul.f32 %v2640_v4, %v2980_v23  ;;  %vm1032_vm1 = vweird.f32 %v3206_v18 }
 0x115   :  { %vm3261_vm2 = vcmp.eq.f32.partialorder %v1036_v50, 8.507059e+37  ;;  %2364 = vrcp.f32 %v3252_v59  ;;  %v461_v56 = vmul.f32 %v2660_v22, %v2946_v55  ;;  %v1091_v40 = vadd.f32 0.05243302, %v1090_v20  ;;  %vm1034_vm3 = vmor %vm1032_vm1, %vm1033_vm0 }
 0x116   :  { %v1031_v61 = vadd.f32 %v2363_v29, %v1030_v41  ;;  %v1101_v14 = vmul.f32 %v1100_v28, %v3213_v26  ;;  %v646_v33 = vmul.f32 2.1237322e-06, %v3255_v44  ;;  %v1039_v53 = vor.u32 1.1754944e-38, %v1038_v34 }
 0x117   :  { %v1055_v4 = vadd.f32 1.1283791, %v1054_v43  ;;  %v657_v18 = vmul.f32 3.8918573e-05, %v3255_v44  ;;  %v389_v3 = vadd.f32 %v357_v2, %v285_v62  ;;  %v1092_v6 = vmul.f32 %v1091_v40, %v3213_v26 }
 0x118   :  { %v1035_v35 = vsel %vm1034_vm3, %v2363_v29, %v1031_v61  ;;  %v1102_v36 = vadd.f32 0.112945676, %v1101_v14  ;;  %v647_v50 = vadd.f32 0.00028619796, %v646_v33  ;;  %v182_v54 = vmul.f32 %v2616_v51, %v4354_v8 }
 0x119   :  { %v1040_v22 = vsel %vm3261_vm2, %v1039_v53, %v1035_v35  ;;  %v658_v45 = vadd.f32 0.001143296, %v657_v18  ;;  %v493_v47 = vadd.f32 %v461_v56, %v389_v3  ;;  %v1093_v58 = vadd.f32 0.18741608, %v1092_v6 }
 0x11a   :  { %v1041_v11 = vmul.f32 %v1040_v22, %v1016_v0  ;;  %v1103_v34 = vmul.f32 %v1102_v36, %v3213_v26  ;;  %v648_v12 = vmul.f32 %v647_v50, %v3255_v44  ;;  %v1056_v29 = vmul.f32 %v1055_v4, %v3151_v60 }
 0x11b   :  { %v2365_v43 = vpop.eup %2364  ;;  %v659_v62 = vmul.f32 %v658_v45, %v3255_v44  ;;  %v3281_v20 = vadd.f32 %v2993_v15, %v493_v47  ;;  %v254_v28 = vmul.f32 %v2606_v46, %v4355_v49  ;;  %v1076_v0 = vand.u32 2147483647, %v3252_v59 }
 0x11c   :  { %v2284_v41 = vclamps-f32 %v1041_v11, 1.0  ;;  %v1068_v51 = vmul.f32 %v2365_v43, %v3252_v59  ;;  %v1078_v2 = vand.u32 2147483648, %v3252_v59  ;;  %v1104_v52 = vadd.f32 0.4994258, %v1103_v34 }
 0x11d   :  { %v649_v56 = vadd.f32 0.0036580483, %v648_v12  ;;  %v660_v61 = vadd.f32 0.014752088, %v659_v62  ;;  %v358_v60 = vmul.f32 %v2642_v5, %v2980_v23  ;;  %v1094_v33 = vmul.f32 %v1093_v58, %v3213_v26 }
 0x11e   :  { %v1933_v40 = vadd.f32 1.0, %v2284_v41  ;;  %v1069_v14 = vsub.f32 1.0, %v1068_v51  ;;  %v286_v53 = vadd.f32 %v254_v28, %v182_v54  ;;  %v1105_v46 = vmul.f32 %v1104_v52, %v3213_v26 }
 0x11f   :  { %v650_v4 = vmul.f32 %v649_v56, %v3255_v44  ;;  %v661_v18 = vmul.f32 %v660_v61, %v3255_v44  ;;  %v3295_v3 = vmul.f32 0.70710677, %v3281_v20  ;;  %vm1072_vm4 = vweird.f32 %v3252_v59 }
 0x120   :  { %v1965_v35 = vmul.f32 %v1933_v40, %v3219_v39  ;;  %v1070_v6 = vmul.f32 %v2365_v43, %v1069_v14  ;;  %vm1073_vm5 = vweird.f32 %v2365_v43  ;;  %v3299_v5 = vadd.f32 1.0, %v1105_v46 }
 0x121   :  { %v651_v36 = vadd.f32 0.05243302, %v650_v4  ;;  %v662_v50 = vadd.f32 0.112945676, %v661_v18  ;;  %v684_v26 = vmul.f32 %v3295_v3, %v3295_v3  ;;  %vm1077_vm6 = vcmp.eq.f32.partialorder %v1076_v0, 8.507059e+37  ;;  %vm1074_vm7 = vmor %vm1072_vm4, %vm1073_vm5 }
 0x122   :  { %v2017_v22 = vmul.f32 %v3202_v48, %v1965_v35  ;;  %v1071_v45 = vadd.f32 %v2365_v43, %v1070_v6  ;;  %v462_v47 = vmul.f32 %v4346_v10, %v2946_v55  ;;  %v1079_v39 = vor.u32 1.1754944e-38, %v1078_v2 }
 0x123   :  { %v1095_v54 = vadd.f32 1.1283791, %v1094_v33  ;;  %2366 = vrcp.f32 %v3299_v5  ;;  %v390_v59 = vadd.f32 %v358_v60, %v286_v53  ;;  %v652_v34 = vmul.f32 %v651_v36, %v3255_v44 }
 0x124   :  { %v2069_v11 = vadd.f32 %v3244_v1, %v2017_v22  ;;  %v1075_v58 = vsel %vm1074_vm7, %v2365_v43, %v1071_v45  ;;  %v663_v12 = vmul.f32 %v662_v50, %v3255_v44  ;;  %v3311_v28 = vmul.f32 0.5, %v3182_v37 }
 0x125   :  { %v1080_v62 = vsel %vm1077_vm6, %v1079_v39, %v1075_v58  ;;  %v3314_v41 = vmul.f32 0.5, %v3230_v16  ;;  %v3316_v10 = vmin.f32 %v684_v26, 16.0  ;;  %v653_v0 = vadd.f32 0.18741608, %v652_v34 }
 0x126   :  { %2137 = vmatpush.msra.mxu1 %v2069_v11  ;;  %v1081_v51 = vmul.f32 %v1080_v62, %v1056_v29  ;;  %v664_v2 = vadd.f32 0.4994258, %v663_v12  ;;  %v494_v52 = vadd.f32 %v462_v47, %v390_v59  ;;  %v183_v61 = vmul.f32 %v4350_v21, %v4354_v8 }
 0x127   :  { %v686_v43 = vmul.f32 2.1237322e-06, %v3316_v10  ;;  %v697_v56 = vmul.f32 3.8918573e-05, %v3316_v10  ;;  %v255_v37 = vmul.f32 %v4347_v13, %v4355_v49  ;;  %v1096_v16 = vmul.f32 %v1095_v54, %v3190_v9 }
 0x128   :  { %v2285_v60 = vclamps-f32 %v1081_v51, 1.0  ;;  %v665_v40 = vmul.f32 %v664_v2, %v3255_v44  ;;  %v3327_v29 = vadd.f32 %v2993_v15, %v494_v52  ;;  %vm1112_vm8 = vweird.f32 %v3299_v5 }
 0x129   :  { %v2367_v14 = vpop.eup %2366  ;;  %v654_v33 = vmul.f32 %v653_v0, %v3255_v44  ;;  %v687_v53 = vadd.f32 0.00028619796, %v686_v43  ;;  %v698_v46 = vadd.f32 0.001143296, %v697_v56  ;;  %v1116_v13 = vand.u32 2147483647, %v3299_v5 }
 0x12a   :  { %v1934_v4 = vadd.f32 1.0, %v2285_v60  ;;  %v1108_v21 = vmul.f32 %v2367_v14, %v3299_v5  ;;  %v359_v9 = vmul.f32 %v4351_v17, %v2980_v23  ;;  %v3335_v18 = vadd.f32 1.0, %v665_v40 }
 0x12b   :  { %v688_v35 = vmul.f32 %v687_v53, %v3316_v10  ;;  %v699_v6 = vmul.f32 %v698_v46, %v3316_v10  ;;  %v287_v36 = vadd.f32 %v255_v37, %v183_v61  ;;  %v1118_v26 = vand.u32 2147483648, %v3299_v5 }
 0x12c   :  { %v1966_v50 = vmul.f32 %v1934_v4, %v3224_v57  ;;  %v1109_v44 = vsub.f32 1.0, %v1108_v21  ;;  %v3342_v22 = vmul.f32 0.70710677, %v3327_v29  ;;  %vm1113_vm9 = vweird.f32 %v2367_v14  ;;  %v4365_v4 = vld [vmem:[#allocation10_spill] sm:$0xff] }
 0x12d   :  { %v655_v45 = vadd.f32 1.1283791, %v654_v33  ;;  %2368 = vrcp.f32 %v3335_v18  ;;  %v463_v17 = vmul.f32 %v2664_v24, %v2946_v55  ;;  %v689_v54 = vadd.f32 0.0036580483, %v688_v35  ;;  %vm1114_vm11 = vmor %vm1112_vm8, %vm1113_vm9 }
 0x12e   :  { %v2018_v47 = vmul.f32 %v3202_v48, %v1966_v50  ;;  %v1110_v39 = vmul.f32 %v2367_v14, %v1109_v44  ;;  %v700_v59 = vadd.f32 0.014752088, %v699_v6  ;;  %vm3348_vm10 = vcmp.eq.f32.partialorder %v1116_v13, 8.507059e+37  ;;  %v3382_v13 = vld [vmem:[%s4263_s0 + $0x10] sm:$0xff] }
 0x12f   :  { %v676_v11 = vand.u32 2147483647, %v3335_v18  ;;  %v724_v58 = vmul.f32 %v3342_v22, %v3342_v22  ;;  %v391_v34 = vadd.f32 %v359_v9, %v287_v36  ;;  %v690_v24 = vmul.f32 %v689_v54, %v3316_v10 }
 0x130   :  { %v2070_v12 = vadd.f32 %v3244_v1, %v2018_v47  ;;  %v1111_v62 = vadd.f32 %v2367_v14, %v1110_v39  ;;  %v701_v51 = vmul.f32 %v700_v59, %v3316_v10  ;;  %v1119_v0 = vor.u32 1.1754944e-38, %v1118_v26 }
 0x131   :  { %v656_v2 = vmul.f32 %v655_v45, %v3238_v30  ;;  %v3362_v52 = vmin.f32 %v724_v58, 16.0  ;;  %v495_v43 = vadd.f32 %v463_v17, %v391_v34  ;;  %vm672_vm12 = vweird.f32 %v3335_v18 }
 0x132   :  { %2157 = vmatpush.msra.mxu2 %v2070_v12  ;;  %v1115_v56 = vsel %vm1114_vm11, %v2367_v14, %v1111_v62  ;;  %v678_v61 = vand.u32 2147483648, %v3335_v18  ;;  %v691_v37 = vadd.f32 0.05243302, %v690_v24  ;;  %v702_v60 = vadd.f32 0.112945676, %v701_v51 }
 0x133   :  { %v2369_v40 = vpop.eup %2368  ;;  %v1120_v33 = vsel %vm3348_vm10, %v1119_v0, %v1115_v56  ;;  %v726_v5 = vmul.f32 2.1237322e-06, %v3362_v52  ;;  %v737_v53 = vmul.f32 3.8918573e-05, %v3362_v52  ;;  %v3371_v30 = vadd.f32 %v2993_v15, %v495_v43 }
 0x134   :  { %v1121_v46 = vmul.f32 %v1120_v33, %v1096_v16  ;;  %v668_v14 = vmul.f32 %v2369_v40, %v3335_v18  ;;  %vm3374_vm13 = vcmp.eq.f32.partialorder %v676_v11, 8.507059e+37  ;;  %v692_v21 = vmul.f32 %v691_v37, %v3316_v10 }
 0x135   :  { %v703_v9 = vmul.f32 %v702_v60, %v3316_v10  ;;  %v727_v35 = vadd.f32 0.00028619796, %v726_v5  ;;  %v738_v6 = vadd.f32 0.001143296, %v737_v53  ;;  %v232_v36 = vperm.slane %v3382_v13, 1 }
 0x136   :  { %v2286_v16 = vclamps-f32 %v1121_v46, 1.0  ;;  %v669_v50 = vsub.f32 1.0, %v668_v14  ;;  %v693_v44 = vadd.f32 0.18741608, %v692_v21  ;;  %v3387_v26 = vmul.f32 0.70710677, %v3371_v30 }
 0x137   :  { %vm673_vm14 = vweird.f32 %v2369_v40  ;;  %v704_v45 = vadd.f32 0.4994258, %v703_v9  ;;  %v728_v17 = vmul.f32 %v727_v35, %v3362_v52  ;;  %v739_v47 = vmul.f32 %v738_v6, %v3362_v52  ;;  %v4364_v6 = vld [vmem:[#allocation5_spill] sm:$0xff] }
 0x138   :  { %v1935_v39 = vadd.f32 1.0, %v2286_v16  ;;  %v670_v54 = vmul.f32 %v2369_v40, %v669_v50  ;;  %v694_v59 = vmul.f32 %v693_v44, %v3316_v10  ;;  %v764_v57 = vmul.f32 %v3387_v26, %v3387_v26  ;;  %vm674_vm15 = vmor %vm672_vm12, %vm673_vm14 }
 0x139   :  { %v705_v11 = vmul.f32 %v704_v45, %v3316_v10  ;;  %v729_v58 = vadd.f32 0.0036580483, %v728_v17  ;;  %v740_v34 = vadd.f32 0.014752088, %v739_v47  ;;  %v160_v12 = vperm.slane %v3382_v13, 0 }
 0x13a   :  { %v1967_v62 = vmul.f32 %v1935_v39, %v3311_v28  ;;  %v671_v24 = vadd.f32 %v2369_v40, %v670_v54  ;;  %v679_v51 = vor.u32 1.1754944e-38, %v678_v61  ;;  %v3397_v0 = vmin.f32 %v764_v57, 16.0 }
 0x13b   :  { %v3402_v43 = vadd.f32 1.0, %v705_v11  ;;  %v730_v56 = vmul.f32 %v729_v58, %v3362_v52  ;;  %v741_v10 = vmul.f32 %v740_v34, %v3362_v52  ;;  %v3406_v37 = vperm.slane %v232_v36, 1 }
 0x13c   :  { %v2019_v60 = vmul.f32 %v3202_v48, %v1967_v62  ;;  %v675_v33 = vsel %vm674_vm15, %v2369_v40, %v671_v24  ;;  %v695_v28 = vadd.f32 1.1283791, %v694_v59  ;;  %v766_v61 = vmul.f32 2.1237322e-06, %v3397_v0 }
 0x13d   :  { %v680_v5 = vsel %vm3374_vm13, %v679_v51, %v675_v33  ;;  %2370 = vrcp.f32 %v3402_v43  ;;  %v3413_v18 = vperm.slane %v160_v12, 0  ;;  %v336_v53 = vperm.slane %v3382_v13, 2  ;;  %v3439_v33 = vpop.permute.xlu2 %1990 }
 0x13e   :  { %v2071_v46 = vadd.f32 %v3244_v1, %v2019_v60  ;;  %v681_v14 = vmul.f32 %v680_v5, %v656_v2  ;;  %v3418_v21 = vmul.f32 0.5, %v3281_v20  ;;  %v731_v9 = vadd.f32 0.05243302, %v730_v56  ;;  %4367 = vst [vmem:[#allocation9_spill] sm:$0xff] %v3439_v33 }
 0x13f   :  { %v742_v40 = vadd.f32 0.112945676, %v741_v10  ;;  %v767_v35 = vadd.f32 0.00028619796, %v766_v61  ;;  %v208_v36 = vmul.f32 %v3413_v18, %v4364_v6  ;;  %v280_v16 = vmul.f32 %v3406_v37, %v4365_v4  ;;  %v4366_v10 = vld [vmem:[#allocation2_spill] sm:$0xff] }
 0x140   :  { %2177 = vmatpush.msra.mxu3 %v2071_v46  ;;  %v2275_v50 = vclamps-f32 %v681_v14, 1.0  ;;  %v696_v44 = vmul.f32 %v695_v28, %v3295_v3  ;;  %v732_v45 = vmul.f32 %v731_v9, %v3362_v52  ;;  %v777_v2 = vmul.f32 3.8918573e-05, %v3397_v0 }
 0x141   :  { %v716_v20 = vand.u32 2147483647, %v3402_v43  ;;  %v743_v17 = vmul.f32 %v742_v40, %v3362_v52  ;;  %v768_v47 = vmul.f32 %v767_v35, %v3397_v0  ;;  %v3430_v39 = vperm.slane %v336_v53, 2  ;;  %v3448_v40 = vpop.permute.xlu1 %2042 }
 0x142   :  { %v1924_v54 = vadd.f32 1.0, %v2275_v50  ;;  %v733_v59 = vadd.f32 0.18741608, %v732_v45  ;;  %v778_v57 = vadd.f32 0.001143296, %v777_v2  ;;  %v440_v11 = vperm.slane %v3382_v13, 3 }
 0x143   :  { %v2371_v58 = vpop.eup %2370  ;;  %v718_v3 = vand.u32 2147483648, %v3402_v43  ;;  %v744_v34 = vadd.f32 0.4994258, %v743_v17  ;;  %v769_v12 = vadd.f32 0.0036580483, %v768_v47  ;;  %v312_v62 = vadd.f32 %v280_v16, %v208_v36  ;;  %4368 = vst [vmem:[#allocation11_spill] sm:$0xff] %v3448_v40 }
 0x144   :  { %v1956_v24 = vmul.f32 %v1924_v54, %v3314_v41  ;;  %v708_v51 = vmul.f32 %v2371_v58, %v3402_v43  ;;  %v734_v56 = vmul.f32 %v733_v59, %v3362_v52  ;;  %v384_v60 = vmul.f32 %v3430_v39, %v4366_v10  ;;  %v4369_v2 = vld [vmem:[#allocation14_spill] sm:$0xff] }
 0x145   :  { %v745_v28 = vmul.f32 %v744_v34, %v3362_v52  ;;  %v770_v61 = vmul.f32 %v769_v12, %v3397_v0  ;;  %v779_v5 = vmul.f32 %v778_v57, %v3397_v0  ;;  %v161_v53 = vperm.slane %v3382_v13, 4 }
 0x146   :  { %v2008_v46 = vmul.f32 %v3439_v33, %v1956_v24  ;;  %v709_v41 = vsub.f32 1.0, %v708_v51  ;;  %v735_v14 = vadd.f32 1.1283791, %v734_v56  ;;  %v3446_v9 = vperm.slane %v440_v11, 3 }
 0x147   :  { %vm713_vm0 = vweird.f32 %v2371_v58  ;;  %v3450_v35 = vadd.f32 1.0, %v745_v28  ;;  %v771_v36 = vadd.f32 0.05243302, %v770_v61  ;;  %v780_v16 = vadd.f32 0.014752088, %v779_v5 }
 0x148   :  { %v2060_v52 = vadd.f32 %v3448_v40, %v2008_v46  ;;  %v710_v50 = vmul.f32 %v2371_v58, %v709_v41  ;;  %v416_v45 = vadd.f32 %v384_v60, %v312_v62  ;;  %v488_v17 = vmul.f32 %v3446_v9, %v4369_v2  ;;  %v4372_v60 = vld [vmem:[#allocation15_spill] sm:$0xff] }
 0x149   :  { %vm712_vm1 = vweird.f32 %v3402_v43  ;;  %vm3456_vm2 = vcmp.eq.f32.partialorder %v716_v20, 8.507059e+37  ;;  %2372 = vrcp.f32 %v3450_v35  ;;  %v3461_v54 = vperm.slane %v161_v53, 0 }
 0x14a   :  { %2118 = vmatpush.msra.mxu0 %v2060_v52  ;;  %v711_v59 = vadd.f32 %v2371_v58, %v710_v50  ;;  %v772_v57 = vmul.f32 %v771_v36, %v3397_v0  ;;  %v781_v11 = vmul.f32 %v780_v16, %v3397_v0  ;;  %v520_v34 = vadd.f32 %v488_v17, %v416_v45  ;;  %vm714_vm3 = vmor %vm712_vm1, %vm713_vm0  ;;  %v3499_v17 = vld [vmem:[%s4263_s0 + $0x18] sm:$0xff] }
 0x14b   :  { %v719_v12 = vor.u32 1.1754944e-38, %v718_v3  ;;  %v3467_v43 = vmul.f32 %v735_v14, %v3342_v22  ;;  %v209_v20 = vmul.f32 %v3461_v54, %v4364_v6  ;;  %v233_v62 = vperm.slane %v3382_v13, 5 }
 0x14c   :  { %v715_v24 = vsel %vm714_vm3, %v2371_v58, %v711_v59  ;;  %v773_v51 = vadd.f32 0.18741608, %v772_v57  ;;  %v782_v56 = vadd.f32 0.112945676, %v781_v11  ;;  %v3473_v28 = vadd.f32 %v4372_v60, %v520_v34 }
 0x14d   :  { %v720_v61 = vsel %vm3456_vm2, %v719_v12, %v715_v24  ;;  %v3477_v5 = vperm.slane %v233_v62, 1  ;;  %v337_v3 = vperm.slane %v3382_v13, 6  ;;  %v441_v22 = vperm.slane %v3382_v13, 7 }
 0x14e   :  { %v721_v53 = vmul.f32 %v720_v61, %v696_v44  ;;  %vm752_vm4 = vweird.f32 %v3450_v35  ;;  %v756_v46 = vand.u32 2147483647, %v3450_v35  ;;  %v783_v58 = vmul.f32 %v782_v56, %v3397_v0 }
 0x14f   :  { %v2373_v41 = vpop.eup %2372  ;;  %v758_v14 = vand.u32 2147483648, %v3450_v35  ;;  %v3486_v36 = vmul.f32 0.70710677, %v3473_v28  ;;  %v281_v16 = vmul.f32 %v3477_v5, %v4365_v4  ;;  %v3490_v52 = vperm.slane %v337_v3, 2 }
 0x150   :  { %v2276_v50 = vclamps-f32 %v721_v53, 1.0  ;;  %v748_v13 = vmul.f32 %v2373_v41, %v3450_v35  ;;  %v774_v44 = vmul.f32 %v773_v51, %v3397_v0  ;;  %v3494_v45 = vperm.slane %v441_v22, 3 }
 0x151   :  { %v784_v47 = vadd.f32 0.4994258, %v783_v58  ;;  %v1764_v59 = vmul.f32 %v3486_v36, %v3486_v36  ;;  %v313_v57 = vadd.f32 %v281_v16, %v209_v20  ;;  %v385_v11 = vmul.f32 %v3490_v52, %v4366_v10  ;;  %v3515_v20 = vld [vmem:[%s4264_s7] sm:$0xff] }
 0x152   :  { %v1925_v34 = vadd.f32 1.0, %v2276_v50  ;;  %v749_v12 = vsub.f32 1.0, %v748_v13  ;;  %vm753_vm5 = vweird.f32 %v2373_v41  ;;  %v489_v62 = vmul.f32 %v3494_v45, %v4369_v2 }
 0x153   :  { %v785_v24 = vmul.f32 %v784_v47, %v3397_v0  ;;  %v3508_v51 = vmin.f32 %v1764_v59, 16.0  ;;  %v417_v56 = vadd.f32 %v385_v11, %v313_v57  ;;  %v162_v61 = vperm.slane %v3499_v17, 0  ;;  %vm754_vm8 = vmor %vm752_vm4, %vm753_vm5 }
 0x154   :  { %v1957_v3 = vmul.f32 %v1925_v34, %v3418_v21  ;;  %v750_v22 = vmul.f32 %v2373_v41, %v749_v12  ;;  %vm2099_vm6 = vcmask 261120   ;;  %v234_v53 = vperm.slane %v3499_v17, 1 }
 0x155   :  { %v3518_v58 = vadd.f32 1.0, %v785_v24  ;;  %2307 = vmatmul.msk.f32.vlgmr.msra.gmra.mxu0 %vm2099_vm6, %v3515_v20  ;;  %v1766_v0 = vmul.f32 2.1237322e-06, %v3508_v51  ;;  %v1777_v16 = vmul.f32 3.8918573e-05, %v3508_v51  ;;  %v521_v50 = vadd.f32 %v489_v62, %v417_v56 }
 0x156   :  { %v2009_v21 = vmul.f32 %v3439_v33, %v1957_v3  ;;  %v751_v13 = vadd.f32 %v2373_v41, %v750_v22  ;;  %vm757_vm7 = vcmp.eq.f32.partialorder %v756_v46, 8.507059e+37  ;;  %v759_v47 = vor.u32 1.1754944e-38, %v758_v14 }
 0x157   :  { %v775_v59 = vadd.f32 1.1283791, %v774_v44  ;;  %2374 = vrcp.f32 %v3518_v58  ;;  %v3529_v57 = vperm.slane %v162_v61, 0  ;;  %v3531_v11 = vperm.slane %v234_v53, 1 }
 0x158   :  { %v2061_v34 = vadd.f32 %v3448_v40, %v2009_v21  ;;  %v755_v12 = vsel %vm754_vm8, %v2373_v41, %v751_v13  ;;  %v1767_v62 = vadd.f32 0.00028619796, %v1766_v0  ;;  %v1778_v24 = vadd.f32 0.001143296, %v1777_v16 }
 0x159   :  { %v582_v56 = vmul.f32 0.5, %v3327_v29  ;;  %v760_v46 = vsel %vm757_vm7, %v759_v47, %v755_v12  ;;  %v798_v14 = vand.u32 2147483648, %v3518_v58  ;;  %v3537_v35 = vadd.f32 %v4372_v60, %v521_v50 }
 0x15a   :  { %2138 = vmatpush.msra.mxu1 %v2061_v34  ;;  %v761_v44 = vmul.f32 %v760_v46, %v3467_v43  ;;  %v1768_v61 = vmul.f32 %v1767_v62, %v3508_v51  ;;  %v1779_v3 = vmul.f32 %v1778_v24, %v3508_v51  ;;  %v210_v41 = vmul.f32 %v3529_v57, %v4364_v6 }
 0x15b   :  { %v776_v22 = vmul.f32 %v775_v59, %v3387_v26  ;;  %2308 = vmatmul.msk.f32.vlgmr.msra.gmra.mxu1 %vm2099_vm6, %v3515_v20  ;;  %v3548_v29 = vmul.f32 0.70710677, %v3537_v35  ;;  %v282_v53 = vmul.f32 %v3531_v11, %v4365_v4  ;;  %v338_v43 = vperm.slane %v3499_v17, 2 }
 0x15c   :  { %v2277_v0 = vclamps-f32 %v761_v44, 1.0  ;;  %vm792_vm9 = vweird.f32 %v3518_v58  ;;  %v1769_v16 = vadd.f32 0.0036580483, %v1768_v61  ;;  %v1780_v50 = vadd.f32 0.014752088, %v1779_v3 }
 0x15d   :  { %v442_v21 = vperm.slane %v3499_v17, 3  ;;  %v2375_v13 = vpop.eup %2374  ;;  %v796_v26 = vand.u32 2147483647, %v3518_v58  ;;  %v1804_v47 = vmul.f32 %v3548_v29, %v3548_v29  ;;  %v314_v59 = vadd.f32 %v282_v53, %v210_v41 }
 0x15e   :  { %v3558_v34 = vperm.slane %v338_v43, 2  ;;  %v1926_v12 = vadd.f32 1.0, %v2277_v0  ;;  %v788_v62 = vmul.f32 %v2375_v13, %v3518_v58  ;;  %v799_v24 = vor.u32 1.1754944e-38, %v798_v14 }
 0x15f   :  { %v1770_v46 = vmul.f32 %v1769_v16, %v3508_v51  ;;  %vm793_vm10 = vweird.f32 %v2375_v13  ;;  %v1781_v44 = vmul.f32 %v1780_v50, %v3508_v51  ;;  %v3563_v61 = vmin.f32 %v1804_v47, 16.0 }
 0x160   :  { %v386_v3 = vmul.f32 %v3558_v34, %v4366_v10  ;;  %v1958_v1 = vmul.f32 %v1926_v12, %v582_v56  ;;  %v789_v48 = vsub.f32 1.0, %v788_v62  ;;  %v3567_v41 = vperm.slane %v442_v21, 3  ;;  %vm794_vm11 = vmor %vm792_vm9, %vm793_vm10 }
 0x161   :  { %v1771_v15 = vadd.f32 0.05243302, %v1770_v46  ;;  %v1782_v53 = vadd.f32 0.112945676, %v1781_v44  ;;  %v1806_v43 = vmul.f32 2.1237322e-06, %v3563_v61 }
 0x162   :  { %v1817_v14 = vmul.f32 3.8918573e-05, %v3563_v61  ;;  %v418_v0 = vadd.f32 %v386_v3, %v314_v59  ;;  %v2010_v16 = vmul.f32 %v3439_v33, %v1958_v1  ;;  %v790_v55 = vmul.f32 %v2375_v13, %v789_v48 }
 0x163   :  { %v1772_v50 = vmul.f32 %v1771_v15, %v3508_v51  ;;  %v490_v47 = vmul.f32 %v3567_v41, %v4369_v2  ;;  %v1783_v56 = vmul.f32 %v1782_v53, %v3508_v51  ;;  %v1807_v12 = vadd.f32 0.00028619796, %v1806_v43 }
 0x164   :  { %v1818_v62 = vadd.f32 0.001143296, %v1817_v14  ;;  %v163_v21 = vperm.slane %v3499_v17, 4  ;;  %v2062_v46 = vadd.f32 %v3448_v40, %v2010_v16  ;;  %v791_v44 = vadd.f32 %v2375_v13, %v790_v55 }
 0x165   :  { %v1773_v23 = vadd.f32 0.18741608, %v1772_v50  ;;  %v522_v49 = vadd.f32 %v490_v47, %v418_v0  ;;  %v1784_v48 = vadd.f32 0.4994258, %v1783_v56  ;;  %v1808_v15 = vmul.f32 %v1807_v12, %v3563_v61 }
 0x166   :  { %v1819_v1 = vmul.f32 %v1818_v62, %v3563_v61  ;;  %v235_v59 = vperm.slane %v3499_v17, 5  ;;  %2158 = vmatpush.msra.mxu2 %v2062_v46  ;;  %v795_v3 = vsel %vm794_vm11, %v2375_v13, %v791_v44  ;;  %vm797_vm12 = vcmp.eq.f32.partialorder %v796_v26, 8.507059e+37 }
 0x167   :  { %v3585_v53 = vadd.f32 %v4372_v60, %v522_v49  ;;  %v339_v55 = vperm.slane %v3499_v17, 6  ;;  %v800_v43 = vsel %vm797_vm12, %v799_v24, %v795_v3  ;;  %2309 = vmatmul.msk.f32.vlgmr.msra.gmra.mxu2 %vm2099_vm6, %v3515_v20  ;;  %v1785_v58 = vmul.f32 %v1784_v48, %v3508_v51 }
 0x168   :  { %v1809_v14 = vadd.f32 0.0036580483, %v1808_v15  ;;  %v1820_v0 = vadd.f32 0.014752088, %v1819_v1  ;;  %v801_v16 = vmul.f32 %v800_v43, %v776_v22  ;;  %v1774_v50 = vmul.f32 %v1773_v23, %v3508_v51 }
 0x169   :  { %v3593_v47 = vmul.f32 0.70710677, %v3585_v53  ;;  %v3595_v13 = vperm.slane %v163_v21, 0  ;;  %v3597_v49 = vadd.f32 1.0, %v1785_v58  ;;  %v3601_v56 = vperm.slane %v235_v59, 1 }
 0x16a   :  { %v1810_v26 = vmul.f32 %v1809_v14, %v3563_v61  ;;  %v1821_v24 = vmul.f32 %v1820_v0, %v3563_v61  ;;  %v583_v12 = vmul.f32 0.5, %v3371_v30  ;;  %v2278_v62 = vclamps-f32 %v801_v16, 1.0 }
 0x16b   :  { %v1844_v22 = vmul.f32 %v3593_v47, %v3593_v47  ;;  %v3607_v23 = vmul.f32 0.5, %v3473_v28  ;;  %2376 = vrcp.f32 %v3597_v49  ;;  %v211_v51 = vmul.f32 %v3595_v13, %v4364_v6 }
 0x16c   :  { %v3612_v21 = vperm.slane %v339_v55, 2  ;;  %v1927_v46 = vadd.f32 1.0, %v2278_v62  ;;  %v1811_v44 = vadd.f32 0.05243302, %v1810_v26  ;;  %v1822_v48 = vadd.f32 0.112945676, %v1821_v24 }
 0x16d   :  { %v3614_v15 = vmin.f32 %v1844_v22, 16.0  ;;  %v1775_v30 = vadd.f32 1.1283791, %v1774_v50  ;;  %v1796_v1 = vand.u32 2147483647, %v3597_v49  ;;  %v1798_v59 = vand.u32 2147483648, %v3597_v49 }
 0x16e   :  { %v283_v28 = vmul.f32 %v3601_v56, %v4365_v4  ;;  %v1959_v3 = vmul.f32 %v1927_v46, %v583_v12  ;;  %v1812_v43 = vmul.f32 %v1811_v44, %v3563_v61  ;;  %v1823_v6 = vmul.f32 %v1822_v48, %v3563_v61  ;;  %v4373_v46 = vld [vmem:[#allocation8_spill] sm:$0xff] }
 0x16f   :  { %v1846_v55 = vmul.f32 2.1237322e-06, %v3614_v15  ;;  %v1857_v58 = vmul.f32 3.8918573e-05, %v3614_v15  ;;  %v387_v0 = vmul.f32 %v3612_v21, %v4366_v10  ;;  %v443_v16 = vperm.slane %v3499_v17, 7  ;;  %v4374_v48 = vld [vmem:[#allocation12_spill] sm:$0xff] }
 0x170   :  { %v315_v14 = vadd.f32 %v283_v28, %v211_v51  ;;  %v2011_v50 = vmul.f32 %v3439_v33, %v1959_v3  ;;  %v1813_v26 = vadd.f32 0.18741608, %v1812_v43  ;;  %v1824_v24 = vadd.f32 0.4994258, %v1823_v6 }
 0x171   :  { %v1847_v4 = vadd.f32 0.00028619796, %v1846_v55  ;;  %v2377_v12 = vpop.eup %2376  ;;  %v1858_v62 = vadd.f32 0.001143296, %v1857_v58  ;;  %v3628_v22 = vperm.slane %v443_v16, 3  ;;  %v200_v44 = vmul.f32 %v3413_v18, %v4373_v46 }
 0x172   :  { %v272_v51 = vmul.f32 %v3406_v37, %v4374_v48  ;;  %v2063_v28 = vadd.f32 %v3448_v40, %v2011_v50  ;;  %v1788_v10 = vmul.f32 %v2377_v12, %v3597_v49  ;;  %v1814_v17 = vmul.f32 %v1813_v26, %v3563_v61 }
 0x173   :  { %v419_v3 = vadd.f32 %v387_v0, %v315_v14  ;;  %v1825_v43 = vmul.f32 %v1824_v24, %v3563_v61  ;;  %v1848_v6 = vmul.f32 %v1847_v4, %v3614_v15  ;;  %v1859_v55 = vmul.f32 %v1858_v62, %v3614_v15 }
 0x174   :  { %v491_v58 = vmul.f32 %v3628_v22, %v4369_v2  ;;  %2178 = vmatpush.msra.mxu3 %v2063_v28  ;;  %v1789_v16 = vsub.f32 1.0, %v1788_v10  ;;  %v1815_v33 = vadd.f32 1.1283791, %v1814_v17  ;;  %v304_v8 = vadd.f32 %v272_v51, %v200_v44 }
 0x175   :  { %v376_v50 = vmul.f32 %v3430_v39, %v4375_v27  ;;  %2310 = vmatmul.msk.f32.vlgmr.msra.gmra.mxu3 %vm2099_vm6, %v3515_v20  ;;  %v3646_v14 = vadd.f32 1.0, %v1825_v43  ;;  %v1849_v61 = vadd.f32 0.0036580483, %v1848_v6  ;;  %v1860_v0 = vadd.f32 0.014752088, %v1859_v55 }
 0x176   :  { %v523_v26 = vadd.f32 %v491_v58, %v419_v3  ;;  %v1790_v24 = vmul.f32 %v2377_v12, %v1789_v16  ;;  %vm1793_vm13 = vweird.f32 %v2377_v12  ;;  %v480_v2 = vmul.f32 %v3446_v9, %v2646_v7 }
 0x177   :  { %v408_v4 = vadd.f32 %v376_v50, %v304_v8  ;;  %v1776_v62 = vmul.f32 %v1775_v30, %v3486_v36  ;;  %vm1792_vm14 = vweird.f32 %v3597_v49  ;;  %v3653_v44 = vmul.f32 0.5, %v3537_v35 }
 0x178   :  { %2378 = vrcp.f32 %v3646_v14  ;;  %v1791_v20 = vadd.f32 %v2377_v12, %v1790_v24  ;;  %v1850_v51 = vmul.f32 %v1849_v61, %v3614_v15  ;;  %v1861_v28 = vmul.f32 %v1860_v0, %v3614_v15  ;;  %vm1794_vm15 = vmor %vm1792_vm14, %vm1793_vm13 }
 0x179   :  { %v3659_v10 = vadd.f32 %v4372_v60, %v523_v26  ;;  %vm1797_vm0 = vcmp.eq.f32.partialorder %v1796_v1, 8.507059e+37  ;;  %v1799_v8 = vor.u32 1.1754944e-38, %v1798_v59  ;;  %v1816_v36 = vmul.f32 %v1815_v33, %v3548_v29 }
 0x17a   :  { %v512_v30 = vadd.f32 %v480_v2, %v408_v4  ;;  %v1795_v49 = vsel %vm1794_vm15, %v2377_v12, %v1791_v20  ;;  %v1851_v17 = vadd.f32 0.05243302, %v1850_v51  ;;  %v1862_v35 = vadd.f32 0.112945676, %v1861_v28 }
 0x17b   :  { %v201_v3 = vmul.f32 %v3461_v54, %v4373_v46  ;;  %v1800_v43 = vsel %vm1797_vm0, %v1799_v8, %v1795_v49  ;;  %v3665_v6 = vmul.f32 0.70710677, %v3659_v10  ;;  %v273_v60 = vmul.f32 %v3477_v5, %v4374_v48 }
 0x17c   :  { %v3668_v55 = vadd.f32 %v2782_v19, %v512_v30  ;;  %v1801_v1 = vmul.f32 %v1800_v43, %v1776_v62  ;;  %v1852_v33 = vmul.f32 %v1851_v17, %v3614_v15  ;;  %v1863_v29 = vmul.f32 %v1862_v35, %v3614_v15 }
 0x17d   :  { %v377_v59 = vmul.f32 %v3490_v52, %v4375_v27  ;;  %v1836_v58 = vand.u32 2147483647, %v3646_v14  ;;  %v1884_v16 = vmul.f32 %v3665_v6, %v3665_v6  ;;  %v305_v61 = vadd.f32 %v273_v60, %v201_v3 }
 0x17e   :  { %v2379_v12 = vpop.eup %2378  ;;  %v3680_v50 = vmul.f32 0.70710677, %v3668_v55  ;;  %v2303_v0 = vclamps-f32 %v1801_v1, 1.0  ;;  %v1838_v24 = vand.u32 2147483648, %v3646_v14  ;;  %v1853_v4 = vadd.f32 0.18741608, %v1852_v33 }
 0x17f   :  { %v1828_v26 = vmul.f32 %v2379_v12, %v3646_v14  ;;  %v1864_v2 = vadd.f32 0.4994258, %v1863_v29  ;;  %v3684_v62 = vmin.f32 %v1884_v16, 16.0  ;;  %v409_v51 = vadd.f32 %v377_v59, %v305_v61 }
 0x180   :  { %v1444_v20 = vmul.f32 %v3680_v50, %v3680_v50  ;;  %v1952_v28 = vadd.f32 1.0, %v2303_v0  ;;  %v1854_v30 = vmul.f32 %v1853_v4, %v3614_v15  ;;  %v481_v49 = vmul.f32 %v3494_v45, %v2646_v7 }
 0x181   :  { %v1829_v8 = vsub.f32 1.0, %v1828_v26  ;;  %v1865_v17 = vmul.f32 %v1864_v2, %v3614_v15  ;;  %v1886_v35 = vmul.f32 2.1237322e-06, %v3684_v62  ;;  %v1897_v3 = vmul.f32 3.8918573e-05, %v3684_v62 }
 0x182   :  { %v3694_v43 = vmin.f32 %v1444_v20, 16.0  ;;  %v1984_v60 = vmul.f32 %v1952_v28, %v3607_v23  ;;  %vm1833_vm1 = vweird.f32 %v2379_v12  ;;  %v1855_v33 = vadd.f32 1.1283791, %v1854_v30 }
 0x183   :  { %v1830_v1 = vmul.f32 %v2379_v12, %v1829_v8  ;;  %vm1832_vm2 = vweird.f32 %v3646_v14  ;;  %v3698_v29 = vadd.f32 1.0, %v1865_v17  ;;  %v1887_v59 = vadd.f32 0.00028619796, %v1886_v35 }
 0x184   :  { %v1898_v16 = vadd.f32 0.001143296, %v1897_v3  ;;  %v2036_v61 = vmul.f32 %v2898_v63, %v1984_v60  ;;  %vm1837_vm3 = vcmp.eq.f32.partialorder %v1836_v58, 8.507059e+37  ;;  %v1446_v0 = vmul.f32 2.1237322e-06, %v3694_v43  ;;  %vm1834_vm4 = vmor %vm1832_vm2, %vm1833_vm1 }
 0x185   :  { %v1831_v15 = vadd.f32 %v2379_v12, %v1830_v1  ;;  %v1839_v26 = vor.u32 1.1754944e-38, %v1838_v24  ;;  %2380 = vrcp.f32 %v3698_v29  ;;  %v513_v23 = vadd.f32 %v481_v49, %v409_v51 }
 0x186   :  { %v202_v4 = vmul.f32 %v3529_v57, %v4373_v46  ;;  %v2088_v14 = vadd.f32 %v2935_v31, %v2036_v61  ;;  %v1888_v20 = vmul.f32 %v1887_v59, %v3684_v62  ;;  %v1899_v28 = vmul.f32 %v1898_v16, %v3684_v62 }
 0x187   :  { %v1835_v2 = vsel %vm1834_vm4, %v2379_v12, %v1831_v15  ;;  %v3709_v58 = vmul.f32 %v1855_v33, %v3593_v47  ;;  %v1878_v30 = vand.u32 2147483648, %v3698_v29  ;;  %v1447_v24 = vadd.f32 0.00028619796, %v1446_v0 }
 0x188   :  { %v1840_v8 = vsel %vm1837_vm3, %v1839_v26, %v1835_v2  ;;  %2195 = vmatpush.msrb.mxu0 %v2088_v14  ;;  %v1889_v51 = vadd.f32 0.0036580483, %v1888_v20  ;;  %v1900_v49 = vadd.f32 0.014752088, %v1899_v28  ;;  %v1457_v35 = vmul.f32 3.8918573e-05, %v3694_v43 }
 0x189   :  { %v1841_v17 = vmul.f32 %v1840_v8, %v1816_v36  ;;  %v1876_v3 = vand.u32 2147483647, %v3698_v29  ;;  %v1448_v12 = vmul.f32 %v1447_v24, %v3694_v43  ;;  %v3716_v60 = vadd.f32 %v2782_v19, %v513_v23 }
 0x18a   :  { %v274_v47 = vmul.f32 %v3531_v11, %v4374_v48  ;;  %vm1872_vm5 = vweird.f32 %v3698_v29  ;;  %v1890_v33 = vmul.f32 %v1889_v51, %v3684_v62  ;;  %v1901_v36 = vmul.f32 %v1900_v49, %v3684_v62 }
 0x18b   :  { %v2304_v1 = vclamps-f32 %v1841_v17, 1.0  ;;  %v1458_v59 = vadd.f32 0.001143296, %v1457_v35  ;;  %v2381_v16 = vpop.eup %2380  ;;  %v1879_v61 = vor.u32 1.1754944e-38, %v1878_v30  ;;  %v1449_v15 = vadd.f32 0.0036580483, %v1448_v12 }
 0x18c   :  { %v3724_v0 = vmul.f32 0.70710677, %v3716_v60  ;;  %v378_v26 = vmul.f32 %v3558_v34, %v4375_v27  ;;  %v1868_v14 = vmul.f32 %v2381_v16, %v3698_v29  ;;  %v1891_v2 = vadd.f32 0.05243302, %v1890_v33 }
 0x18d   :  { %v1953_v23 = vadd.f32 1.0, %v2304_v1  ;;  %v306_v20 = vadd.f32 %v274_v47, %v202_v4  ;;  %v1902_v28 = vadd.f32 0.112945676, %v1901_v36  ;;  %v1450_v8 = vmul.f32 %v1449_v15, %v3694_v43 }
 0x18e   :  { %v1459_v24 = vmul.f32 %v1458_v59, %v3694_v43  ;;  %v1484_v30 = vmul.f32 %v3724_v0, %v3724_v0  ;;  %v1869_v51 = vsub.f32 1.0, %v1868_v14  ;;  %vm1873_vm7 = vweird.f32 %v2381_v16 }
 0x18f   :  { %v1985_v17 = vmul.f32 %v1953_v23, %v3653_v44  ;;  %v1892_v49 = vmul.f32 %v1891_v2, %v3684_v62  ;;  %v1903_v35 = vmul.f32 %v1902_v28, %v3684_v62  ;;  %v1451_v12 = vadd.f32 0.05243302, %v1450_v8  ;;  %vm1874_vm8 = vmor %vm1872_vm5, %vm1873_vm7 }
 0x190   :  { %v1460_v1 = vadd.f32 0.014752088, %v1459_v24  ;;  %v3736_v33 = vmin.f32 %v1484_v30, 16.0  ;;  %v1870_v47 = vmul.f32 %v2381_v16, %v1869_v51  ;;  %v410_v59 = vadd.f32 %v378_v26, %v306_v20 }
 0x191   :  { %v2037_v4 = vmul.f32 %v2898_v63, %v1985_v17  ;;  %v1893_v36 = vadd.f32 0.18741608, %v1892_v49  ;;  %v1904_v15 = vadd.f32 0.4994258, %v1903_v35  ;;  %v1452_v40 = vmul.f32 %v1451_v12, %v3694_v43 }
 0x192   :  { %v1461_v44 = vmul.f32 %v1460_v1, %v3694_v43  ;;  %v1486_v23 = vmul.f32 2.1237322e-06, %v3736_v33  ;;  %v1871_v2 = vadd.f32 %v2381_v16, %v1870_v47  ;;  %v1497_v28 = vmul.f32 3.8918573e-05, %v3736_v33 }
 0x193   :  { %v2089_v14 = vadd.f32 %v2935_v31, %v2037_v4  ;;  %v482_v8 = vmul.f32 %v3567_v41, %v2646_v7  ;;  %v1894_v26 = vmul.f32 %v1893_v36, %v3684_v62  ;;  %v1905_v20 = vmul.f32 %v1904_v15, %v3684_v62 }
 0x194   :  { %v1462_v24 = vadd.f32 0.112945676, %v1461_v44  ;;  %v1487_v30 = vadd.f32 0.00028619796, %v1486_v23  ;;  %v1875_v17 = vsel %vm1874_vm8, %v2381_v16, %v1871_v2  ;;  %vm1877_vm9 = vcmp.eq.f32.partialorder %v1876_v3, 8.507059e+37 }
 0x195   :  { %2215 = vmatpush.msrb.mxu1 %v2089_v14  ;;  %v1453_v51 = vadd.f32 0.18741608, %v1452_v40  ;;  %v1498_v49 = vadd.f32 0.001143296, %v1497_v28  ;;  %v1880_v35 = vsel %vm1877_vm9, %v1879_v61, %v1875_v17  ;;  %v3751_v12 = vadd.f32 1.0, %v1905_v20 }
 0x196   :  { %v1463_v1 = vmul.f32 %v1462_v24, %v3694_v43  ;;  %v1881_v4 = vmul.f32 %v1880_v35, %v3709_v58  ;;  %v1488_v29 = vmul.f32 %v1487_v30, %v3736_v33  ;;  %v514_v36 = vadd.f32 %v482_v8, %v410_v59 }
 0x197   :  { %v1499_v47 = vmul.f32 %v1498_v49, %v3736_v33  ;;  %v610_v62 = vmul.f32 0.5, %v3585_v53  ;;  %v1895_v15 = vadd.f32 1.1283791, %v1894_v26  ;;  %2382 = vrcp.f32 %v3751_v12 }
 0x198   :  { %v2305_v3 = vclamps-f32 %v1881_v4, 1.0  ;;  %v1454_v40 = vmul.f32 %v1453_v51, %v3694_v43  ;;  %v1464_v16 = vadd.f32 0.4994258, %v1463_v1  ;;  %v3761_v61 = vadd.f32 %v2782_v19, %v514_v36 }
 0x199   :  { %v3764_v44 = vmul.f32 0.5, %v3659_v10  ;;  %v3767_v58 = vmul.f32 0.5, %v3668_v55  ;;  %v1489_v23 = vadd.f32 0.0036580483, %v1488_v29  ;;  %v1500_v59 = vadd.f32 0.014752088, %v1499_v47 }
 0x19a   :  { %v1954_v14 = vadd.f32 1.0, %v2305_v3  ;;  %v1916_v53 = vand.u32 2147483647, %v3751_v12  ;;  %v1918_v2 = vand.u32 2147483648, %v3751_v12  ;;  %v1465_v28 = vmul.f32 %v1464_v16, %v3694_v43 }
 0x19b   :  { %v1896_v8 = vmul.f32 %v1895_v15, %v3665_v6  ;;  %v1490_v26 = vmul.f32 %v1489_v23, %v3736_v33  ;;  %v1501_v20 = vmul.f32 %v1500_v59, %v3736_v33  ;;  %v3776_v10 = vmul.f32 0.70710677, %v3761_v61 }
 0x19c   :  { %v1986_v55 = vmul.f32 %v1954_v14, %v610_v62  ;;  %vm1912_vm10 = vweird.f32 %v3751_v12  ;;  %v1455_v24 = vadd.f32 1.1283791, %v1454_v40  ;;  %v3779_v30 = vadd.f32 1.0, %v1465_v28 }
 0x19d   :  { %v2383_v17 = vpop.eup %2382  ;;  %v1491_v51 = vadd.f32 0.05243302, %v1490_v26  ;;  %v1502_v49 = vadd.f32 0.112945676, %v1501_v20  ;;  %v1524_v43 = vmul.f32 %v3776_v10, %v3776_v10  ;;  %v275_v6 = vmul.f32 %v3601_v56, %v4374_v48 }
 0x19e   :  { %v2038_v35 = vmul.f32 %v2898_v63, %v1986_v55  ;;  %v1908_v1 = vmul.f32 %v2383_v17, %v3751_v12  ;;  %vm3787_vm11 = vcmp.eq.f32.partialorder %v1916_v53, 8.507059e+37  ;;  %v1919_v29 = vor.u32 1.1754944e-38, %v1918_v2 }
 0x19f   :  { %2384 = vrcp.f32 %v3779_v30  ;;  %v1492_v47 = vmul.f32 %v1491_v51, %v3736_v33  ;;  %v203_v36 = vmul.f32 %v3595_v13, %v4373_v46  ;;  %v379_v62 = vmul.f32 %v3612_v21, %v4375_v27 }
 0x1a0   :  { %v483_v48 = vmul.f32 %v3628_v22, %v2646_v7  ;;  %v2090_v15 = vadd.f32 %v2935_v31, %v2038_v35  ;;  %v1909_v3 = vsub.f32 1.0, %v1908_v1  ;;  %v1503_v40 = vmul.f32 %v1502_v49, %v3736_v33 }
 0x1a1   :  { %v3801_v16 = vmin.f32 %v1524_v43, 16.0  ;;  %vm1913_vm12 = vweird.f32 %v2383_v17  ;;  %v1476_v23 = vand.u32 2147483647, %v3779_v30  ;;  %v1493_v59 = vadd.f32 0.18741608, %v1492_v47 }
 0x1a2   :  { %v307_v14 = vadd.f32 %v275_v6, %v203_v36  ;;  %2235 = vmatpush.msrb.mxu2 %v2090_v15  ;;  %v1910_v46 = vmul.f32 %v2383_v17, %v1909_v3  ;;  %v1504_v53 = vadd.f32 0.4994258, %v1503_v40  ;;  %v1456_v7 = vmul.f32 %v1455_v24, %v3680_v50  ;;  %vm1914_vm14 = vmor %vm1912_vm10, %vm1913_vm12 }
 0x1a3   :  { %v1526_v27 = vmul.f32 2.1237322e-06, %v3801_v16  ;;  %v1537_v2 = vmul.f32 3.8918573e-05, %v3801_v16  ;;  %vm1472_vm13 = vweird.f32 %v3779_v30  ;;  %v1478_v28 = vand.u32 2147483648, %v3779_v30 }
 0x1a4   :  { %v411_v26 = vadd.f32 %v379_v62, %v307_v14  ;;  %v1911_v55 = vadd.f32 %v2383_v17, %v1910_v46  ;;  %v1505_v51 = vmul.f32 %v1504_v53, %v3736_v33  ;;  %vm3814_vm15 = vcmp.eq.f32.partialorder %v1476_v23, 8.507059e+37  ;;  %v4380_v53 = vld [vmem:[#allocation3_spill] sm:$0xff] }
 0x1a5   :  { %v2385_v20 = vpop.eup %2384  ;;  %v1527_v49 = vadd.f32 0.00028619796, %v1526_v27  ;;  %v1538_v43 = vadd.f32 0.001143296, %v1537_v2  ;;  %v1494_v50 = vmul.f32 %v1493_v59, %v3736_v33  ;;  %v1479_v3 = vor.u32 1.1754944e-38, %v1478_v28 }
 0x1a6   :  { %v1468_v6 = vmul.f32 %v2385_v20, %v3779_v30  ;;  %v515_v24 = vadd.f32 %v483_v48, %v411_v26  ;;  %v1915_v1 = vsel %vm1914_vm14, %v2383_v17, %v1911_v55  ;;  %v3819_v47 = vadd.f32 1.0, %v1505_v51 }
 0x1a7   :  { %v1528_v36 = vmul.f32 %v1527_v49, %v3801_v16  ;;  %v1539_v62 = vmul.f32 %v1538_v43, %v3801_v16  ;;  %v1920_v12 = vsel %vm3787_vm11, %v1919_v29, %v1915_v1  ;;  %vm1473_vm0 = vweird.f32 %v2385_v20  ;;  %v4381_v49 = vld [vmem:[#allocation17_spill] sm:$0xff] }
 0x1a8   :  { %v1469_v15 = vsub.f32 1.0, %v1468_v6  ;;  %v3826_v40 = vadd.f32 %v2782_v19, %v515_v24  ;;  %v1921_v23 = vmul.f32 %v1920_v12, %v1896_v8  ;;  %2386 = vrcp.f32 %v3819_v47  ;;  %vm1474_vm1 = vmor %vm1472_vm13, %vm1473_vm0 }
 0x1a9   :  { %v264_v33 = vmul.f32 %v3406_v37, %v2763_v25  ;;  %v1495_v48 = vadd.f32 1.1283791, %v1494_v50  ;;  %v1529_v59 = vadd.f32 0.0036580483, %v1528_v36  ;;  %v1540_v14 = vadd.f32 0.014752088, %v1539_v62 }
 0x1aa   :  { %v1470_v17 = vmul.f32 %v2385_v20, %v1469_v15  ;;  %v2306_v46 = vclamps-f32 %v1921_v23, 1.0  ;;  %v1516_v4 = vand.u32 2147483647, %v3819_v47  ;;  %v3833_v29 = vmul.f32 0.70710677, %v3826_v40 }
 0x1ab   :  { %v192_v19 = vmul.f32 %v3413_v18, %v4380_v53  ;;  %v1518_v27 = vand.u32 2147483648, %v3819_v47  ;;  %v1530_v2 = vmul.f32 %v1529_v59, %v3801_v16  ;;  %v1541_v28 = vmul.f32 %v1540_v14, %v3801_v16 }
 0x1ac   :  { %v1471_v8 = vadd.f32 %v2385_v20, %v1470_v17  ;;  %v1955_v26 = vadd.f32 1.0, %v2306_v46  ;;  %v1564_v55 = vmul.f32 %v3833_v29, %v3833_v29  ;;  %v368_v43 = vmul.f32 %v3430_v39, %v4381_v49 }
 0x1ad   :  { %v296_v51 = vadd.f32 %v264_v33, %v192_v19  ;;  %v1531_v50 = vadd.f32 0.05243302, %v1530_v2  ;;  %v1542_v24 = vadd.f32 0.112945676, %v1541_v28  ;;  %v472_v1 = vmul.f32 %v3446_v9, %v2917_v42 }
 0x1ae   :  { %v1475_v6 = vsel %vm1474_vm1, %v2385_v20, %v1471_v8  ;;  %v2387_v36 = vpop.eup %2386  ;;  %v1987_v62 = vmul.f32 %v1955_v26, %v3764_v44  ;;  %v3852_v12 = vmin.f32 %v1564_v55, 16.0  ;;  %vm1512_vm3 = vweird.f32 %v3819_v47 }
 0x1af   :  { %v1480_v30 = vsel %vm3814_vm15, %v1479_v3, %v1475_v6  ;;  %v400_v15 = vadd.f32 %v368_v43, %v296_v51  ;;  %v1508_v33 = vmul.f32 %v2387_v36, %v3819_v47  ;;  %vm1513_vm2 = vweird.f32 %v2387_v36  ;;  %v4382_v47 = vld [vmem:[#allocation21_spill] sm:$0xff] }
 0x1b0   :  { %v1481_v23 = vmul.f32 %v1480_v30, %v1456_v7  ;;  %v1532_v20 = vmul.f32 %v1531_v50, %v3801_v16  ;;  %v2039_v17 = vmul.f32 %v2898_v63, %v1987_v62  ;;  %v1543_v59 = vmul.f32 %v1542_v24, %v3801_v16  ;;  %vm1514_vm4 = vmor %vm1512_vm3, %vm1513_vm2 }
 0x1b1   :  { %v1566_v14 = vmul.f32 2.1237322e-06, %v3852_v12  ;;  %v1577_v44 = vmul.f32 3.8918573e-05, %v3852_v12  ;;  %v1509_v35 = vsub.f32 1.0, %v1508_v33  ;;  %v504_v19 = vadd.f32 %v472_v1, %v400_v15 }
 0x1b2   :  { %v2295_v46 = vclamps-f32 %v1481_v23, 1.0  ;;  %v1533_v3 = vadd.f32 0.18741608, %v1532_v20  ;;  %v2091_v8 = vadd.f32 %v2935_v31, %v2039_v17  ;;  %v1544_v7 = vadd.f32 0.4994258, %v1543_v59 }
 0x1b3   :  { %v1567_v2 = vadd.f32 0.00028619796, %v1566_v14  ;;  %v1578_v28 = vadd.f32 0.001143296, %v1577_v44  ;;  %v1510_v55 = vmul.f32 %v2387_v36, %v1509_v35  ;;  %v3863_v63 = vadd.f32 %v3016_v38, %v504_v19 }
 0x1b4   :  { %v1944_v26 = vadd.f32 1.0, %v2295_v46  ;;  %v1534_v51 = vmul.f32 %v1533_v3, %v3801_v16  ;;  %2255 = vmatpush.msrb.mxu3 %v2091_v8  ;;  %v1496_v43 = vmul.f32 %v1495_v48, %v3724_v0  ;;  %v1545_v6 = vmul.f32 %v1544_v7, %v3801_v16 }
 0x1b5   :  { %v1568_v50 = vmul.f32 %v1567_v2, %v3852_v12  ;;  %v1579_v24 = vmul.f32 %v1578_v28, %v3852_v12  ;;  %v1511_v1 = vadd.f32 %v2387_v36, %v1510_v55  ;;  %v1519_v30 = vor.u32 1.1754944e-38, %v1518_v27 }
 0x1b6   :  { %v1976_v31 = vmul.f32 %v1944_v26, %v3767_v58  ;;  %v1535_v62 = vadd.f32 1.1283791, %v1534_v51  ;;  %v3872_v15 = vadd.f32 1.0, %v1545_v6  ;;  %vm1517_vm5 = vcmp.eq.f32.partialorder %v1516_v4, 8.507059e+37 }
 0x1b7   :  { %v1569_v23 = vadd.f32 0.0036580483, %v1568_v50  ;;  %v1580_v33 = vadd.f32 0.014752088, %v1579_v24  ;;  %v1515_v16 = vsel %vm1514_vm4, %v2387_v36, %v1511_v1  ;;  %v3876_v48 = vmul.f32 0.70710677, %v3863_v63 }
 0x1b8   :  { %v2028_v0 = vmul.f32 %v3037_v32, %v1976_v31  ;;  %v1520_v20 = vsel %vm1517_vm5, %v1519_v30, %v1515_v16  ;;  %2388 = vrcp.f32 %v3872_v15  ;;  %v265_v58 = vmul.f32 %v3477_v5, %v2763_v25 }
 0x1b9   :  { %v601_v27 = vmul.f32 0.5, %v3716_v60  ;;  %v1521_v59 = vmul.f32 %v1520_v20, %v1496_v43  ;;  %v1570_v14 = vmul.f32 %v1569_v23, %v3852_v12  ;;  %v1536_v44 = vmul.f32 %v1535_v62, %v3776_v10 }
 0x1ba   :  { %v2080_v17 = vadd.f32 %v4382_v47, %v2028_v0  ;;  %v1581_v4 = vmul.f32 %v1580_v33, %v3852_v12  ;;  %v1124_v36 = vmul.f32 %v3876_v48, %v3876_v48  ;;  %v193_v46 = vmul.f32 %v3461_v54, %v4380_v53 }
 0x1bb   :  { %v2296_v35 = vclamps-f32 %v1521_v59, 1.0  ;;  %v1556_v3 = vand.u32 2147483647, %v3872_v15  ;;  %v1571_v19 = vadd.f32 0.05243302, %v1570_v14  ;;  %v369_v60 = vmul.f32 %v3490_v52, %v4381_v49 }
 0x1bc   :  { %2196 = vmatpush.msrb.mxu0 %v2080_v17  ;;  %v1582_v8 = vadd.f32 0.112945676, %v1581_v4  ;;  %v3893_v7 = vmin.f32 %v1124_v36, 16.0  ;;  %v297_v10 = vadd.f32 %v265_v58, %v193_v46  ;;  %v473_v2 = vmul.f32 %v3494_v45, %v2917_v42 }
 0x1bd   :  { %v1945_v28 = vadd.f32 1.0, %v2296_v35  ;;  %v1558_v26 = vand.u32 2147483648, %v3872_v15  ;;  %v1572_v55 = vmul.f32 %v1571_v19, %v3852_v12  ;;  %v194_v51 = vmul.f32 %v3529_v57, %v4380_v53 }
 0x1be   :  { %v2389_v43 = vpop.eup %2388  ;;  %v1583_v6 = vmul.f32 %v1582_v8, %v3852_v12  ;;  %v1126_v50 = vmul.f32 2.1237322e-06, %v3893_v7  ;;  %v1137_v24 = vmul.f32 3.8918573e-05, %v3893_v7  ;;  %v401_v31 = vadd.f32 %v369_v60, %v297_v10 }
 0x1bf   :  { %v1977_v1 = vmul.f32 %v1945_v28, %v601_v27  ;;  %v1548_v62 = vmul.f32 %v2389_v43, %v3872_v15  ;;  %v1573_v30 = vadd.f32 0.18741608, %v1572_v55  ;;  %v266_v23 = vmul.f32 %v3531_v11, %v2763_v25 }
 0x1c0   :  { %v1584_v33 = vadd.f32 0.4994258, %v1583_v6  ;;  %v1127_v0 = vadd.f32 0.00028619796, %v1126_v50  ;;  %v1138_v16 = vadd.f32 0.001143296, %v1137_v24  ;;  %v505_v20 = vadd.f32 %v473_v2, %v401_v31 }
 0x1c1   :  { %v2029_v58 = vmul.f32 %v3037_v32, %v1977_v1  ;;  %v1549_v17 = vsub.f32 1.0, %v1548_v62  ;;  %v1574_v59 = vmul.f32 %v1573_v30, %v3852_v12  ;;  %v370_v14 = vmul.f32 %v3558_v34, %v4381_v49 }
 0x1c2   :  { %v1585_v27 = vmul.f32 %v1584_v33, %v3852_v12  ;;  %v1128_v4 = vmul.f32 %v1127_v0, %v3893_v7  ;;  %v1139_v36 = vmul.f32 %v1138_v16, %v3893_v7  ;;  %v3915_v46 = vadd.f32 %v3016_v38, %v505_v20 }
 0x1c3   :  { %v2081_v35 = vadd.f32 %v4382_v47, %v2029_v58  ;;  %v1550_v19 = vmul.f32 %v2389_v43, %v1549_v17  ;;  %vm1552_vm7 = vweird.f32 %v3872_v15  ;;  %vm1553_vm8 = vweird.f32 %v2389_v43 }
 0x1c4   :  { %v3919_v60 = vadd.f32 1.0, %v1585_v27  ;;  %v1129_v8 = vadd.f32 0.0036580483, %v1128_v4  ;;  %v1140_v10 = vadd.f32 0.014752088, %v1139_v36  ;;  %v298_v2 = vadd.f32 %v266_v23, %v194_v51  ;;  %vm1554_vm10 = vmor %vm1552_vm7, %vm1553_vm8 }
 0x1c5   :  { %2216 = vmatpush.msrb.mxu1 %v2081_v35  ;;  %v1551_v12 = vadd.f32 %v2389_v43, %v1550_v19  ;;  %vm1557_vm9 = vcmp.eq.f32.partialorder %v1556_v3, 8.507059e+37  ;;  %v3922_v28 = vmul.f32 0.70710677, %v3915_v46  ;;  %v474_v55 = vmul.f32 %v3567_v41, %v2917_v42 }
 0x1c6   :  { %v1559_v6 = vor.u32 1.1754944e-38, %v1558_v26  ;;  %v1575_v50 = vadd.f32 1.1283791, %v1574_v59  ;;  %2390 = vrcp.f32 %v3919_v60  ;;  %v402_v15 = vadd.f32 %v370_v14, %v298_v2 }
 0x1c7   :  { %v1555_v24 = vsel %vm1554_vm10, %v2389_v43, %v1551_v12  ;;  %v1130_v31 = vmul.f32 %v1129_v8, %v3893_v7  ;;  %v1141_v51 = vmul.f32 %v1140_v10, %v3893_v7  ;;  %v1164_v3 = vmul.f32 %v3922_v28, %v3922_v28 }
 0x1c8   :  { %v1560_v1 = vsel %vm1557_vm9, %v1559_v6, %v1555_v24  ;;  %v506_v62 = vadd.f32 %v474_v55, %v402_v15  ;;  %v602_v26 = vmul.f32 0.5, %v3761_v61  ;;  %v3935_v16 = vmul.f32 0.5, %v3826_v40 }
 0x1c9   :  { %v1561_v30 = vmul.f32 %v1560_v1, %v1536_v44  ;;  %v1131_v23 = vadd.f32 0.05243302, %v1130_v31  ;;  %v1142_v33 = vadd.f32 0.112945676, %v1141_v51  ;;  %v3931_v0 = vmin.f32 %v1164_v3, 16.0 }
 0x1ca   :  { %v1576_v43 = vmul.f32 %v1575_v50, %v3833_v29  ;;  %v3939_v20 = vadd.f32 %v3016_v38, %v506_v62  ;;  %vm1592_vm11 = vweird.f32 %v3919_v60  ;;  %v1596_v61 = vand.u32 2147483647, %v3919_v60 }
 0x1cb   :  { %v2297_v58 = vclamps-f32 %v1561_v30, 1.0  ;;  %v1132_v17 = vmul.f32 %v1131_v23, %v3893_v7  ;;  %v1143_v59 = vmul.f32 %v1142_v33, %v3893_v7  ;;  %v1166_v44 = vmul.f32 2.1237322e-06, %v3931_v0 }
 0x1cc   :  { %v2391_v14 = vpop.eup %2390  ;;  %v1177_v40 = vmul.f32 3.8918573e-05, %v3931_v0  ;;  %v3948_v27 = vmul.f32 0.70710677, %v3939_v20  ;;  %v1598_v36 = vand.u32 2147483648, %v3919_v60  ;;  %v195_v6 = vmul.f32 %v3595_v13, %v4380_v53 }
 0x1cd   :  { %v1946_v29 = vadd.f32 1.0, %v2297_v58  ;;  %v1588_v4 = vmul.f32 %v2391_v14, %v3919_v60  ;;  %v1133_v35 = vadd.f32 0.18741608, %v1132_v17  ;;  %v1144_v19 = vadd.f32 0.4994258, %v1143_v59 }
 0x1ce   :  { %v1167_v8 = vadd.f32 0.00028619796, %v1166_v44  ;;  %v1178_v10 = vadd.f32 0.001143296, %v1177_v40  ;;  %v1204_v2 = vmul.f32 %v3948_v27, %v3948_v27  ;;  %v267_v50 = vmul.f32 %v3601_v56, %v2763_v25 }
 0x1cf   :  { %v1978_v12 = vmul.f32 %v1946_v29, %v602_v26  ;;  %v1589_v55 = vsub.f32 1.0, %v1588_v4  ;;  %v1145_v15 = vmul.f32 %v1144_v19, %v3893_v7  ;;  %vm1593_vm12 = vweird.f32 %v2391_v14 }
 0x1d0   :  { %v1168_v24 = vmul.f32 %v1167_v8, %v3931_v0  ;;  %v1179_v31 = vmul.f32 %v1178_v10, %v3931_v0  ;;  %v3961_v51 = vmin.f32 %v1204_v2, 16.0  ;;  %v371_v62 = vmul.f32 %v3612_v21, %v4381_v49  ;;  %vm1594_vm14 = vmor %vm1592_vm11, %vm1593_vm12 }
 0x1d1   :  { %v2030_v3 = vmul.f32 %v3037_v32, %v1978_v12  ;;  %v1590_v1 = vmul.f32 %v2391_v14, %v1589_v55  ;;  %v1134_v53 = vmul.f32 %v1133_v35, %v3893_v7  ;;  %v3967_v30 = vadd.f32 1.0, %v1145_v15  ;;  %v4384_v55 = vld [vmem:[#allocation6_spill] sm:$0xff] }
 0x1d2   :  { %v1169_v25 = vadd.f32 0.0036580483, %v1168_v24  ;;  %v1180_v23 = vadd.f32 0.014752088, %v1179_v31  ;;  %vm1597_vm13 = vcmp.eq.f32.partialorder %v1596_v61, 8.507059e+37  ;;  %v1599_v17 = vor.u32 1.1754944e-38, %v1598_v36 }
 0x1d3   :  { %v2082_v33 = vadd.f32 %v4382_v47, %v2030_v3  ;;  %v1591_v26 = vadd.f32 %v2391_v14, %v1590_v1  ;;  %v1206_v58 = vmul.f32 2.1237322e-06, %v3961_v51  ;;  %2392 = vrcp.f32 %v3967_v30 }
 0x1d4   :  { %v299_v59 = vadd.f32 %v267_v50, %v195_v6  ;;  %v475_v49 = vmul.f32 %v3628_v22, %v2917_v42  ;;  %v1170_v44 = vmul.f32 %v1169_v25, %v3931_v0  ;;  %v1181_v40 = vmul.f32 %v1180_v23, %v3931_v0  ;;  %v4383_v42 = vld [vmem:[#allocation16_spill] sm:$0xff] }
 0x1d5   :  { %2236 = vmatpush.msrb.mxu2 %v2082_v33  ;;  %v1595_v7 = vsel %vm1594_vm14, %v2391_v14, %v1591_v26  ;;  %v1207_v29 = vadd.f32 0.00028619796, %v1206_v58  ;;  %v1135_v4 = vadd.f32 1.1283791, %v1134_v53  ;;  %v1217_v35 = vmul.f32 3.8918573e-05, %v3961_v51 }
 0x1d6   :  { %v1600_v61 = vsel %vm1597_vm13, %v1599_v17, %v1595_v7  ;;  %v403_v60 = vadd.f32 %v371_v62, %v299_v59  ;;  %v1171_v36 = vadd.f32 0.05243302, %v1170_v44  ;;  %v1182_v8 = vadd.f32 0.112945676, %v1181_v40  ;;  %v4385_v17 = vld [vmem:[#allocation19_spill] sm:$0xff] }
 0x1d7   :  { %v1601_v19 = vmul.f32 %v1600_v61, %v1576_v43  ;;  %v1208_v10 = vmul.f32 %v1207_v29, %v3961_v51  ;;  %v1218_v2 = vadd.f32 0.001143296, %v1217_v35  ;;  %v184_v14 = vmul.f32 %v3413_v18, %v4383_v42 }
 0x1d8   :  { %v507_v12 = vadd.f32 %v475_v49, %v403_v60  ;;  %v256_v6 = vmul.f32 %v3406_v37, %v4384_v55  ;;  %v1172_v15 = vmul.f32 %v1171_v36, %v3931_v0  ;;  %v1183_v24 = vmul.f32 %v1182_v8, %v3931_v0  ;;  %v4386_v36 = vld [vmem:[#allocation18_spill] sm:$0xff] }
 0x1d9   :  { %v2298_v50 = vclamps-f32 %v1601_v19, 1.0  ;;  %v1209_v31 = vadd.f32 0.0036580483, %v1208_v10  ;;  %v2393_v3 = vpop.eup %2392  ;;  %v1136_v43 = vmul.f32 %v1135_v4, %v3876_v48  ;;  %v1156_v1 = vand.u32 2147483647, %v3967_v30 }
 0x1da   :  { %v1219_v62 = vmul.f32 %v1218_v2, %v3961_v51  ;;  %v3990_v53 = vadd.f32 %v3016_v38, %v507_v12  ;;  %v1148_v25 = vmul.f32 %v2393_v3, %v3967_v30  ;;  %v1158_v37 = vand.u32 2147483648, %v3967_v30 }
 0x1db   :  { %v1947_v18 = vadd.f32 1.0, %v2298_v50  ;;  %v1173_v23 = vadd.f32 0.18741608, %v1172_v15  ;;  %v1184_v33 = vadd.f32 0.4994258, %v1183_v24  ;;  %v1210_v26 = vmul.f32 %v1209_v31, %v3961_v51 }
 0x1dc   :  { %v1220_v58 = vadd.f32 0.014752088, %v1219_v62  ;;  %v360_v48 = vmul.f32 %v3430_v39, %v4385_v17  ;;  %v1149_v49 = vsub.f32 1.0, %v1148_v25  ;;  %v3999_v7 = vmul.f32 0.70710677, %v3990_v53 }
 0x1dd   :  { %v1979_v59 = vmul.f32 %v1947_v18, %v3935_v16  ;;  %v288_v38 = vadd.f32 %v256_v6, %v184_v14  ;;  %vm1153_vm15 = vweird.f32 %v2393_v3  ;;  %v1185_v44 = vmul.f32 %v1184_v33, %v3931_v0 }
 0x1de   :  { %v1211_v40 = vadd.f32 0.05243302, %v1210_v26  ;;  %v1221_v29 = vmul.f32 %v1220_v58, %v3961_v51  ;;  %v1150_v4 = vmul.f32 %v2393_v3, %v1149_v49  ;;  %v1174_v35 = vmul.f32 %v1173_v23, %v3931_v0 }
 0x1df   :  { %v2031_v61 = vmul.f32 %v3037_v32, %v1979_v59  ;;  %v1244_v39 = vmul.f32 %v3999_v7, %v3999_v7  ;;  %v4007_v16 = vadd.f32 1.0, %v1185_v44  ;;  %v464_v8 = vmul.f32 %v3446_v9, %v4386_v36 }
 0x1e0   :  { %v1212_v60 = vmul.f32 %v1211_v40, %v3961_v51  ;;  %v1222_v19 = vadd.f32 0.112945676, %v1221_v29  ;;  %v1151_v2 = vadd.f32 %v2393_v3, %v1150_v4  ;;  %vm1152_vm0 = vweird.f32 %v3967_v30 }
 0x1e1   :  { %v2083_v10 = vadd.f32 %v4382_v47, %v2031_v61  ;;  %v4014_v32 = vmin.f32 %v1244_v39, 16.0  ;;  %vm1154_vm1 = vmor %vm1152_vm0, %vm1153_vm15  ;;  %vm1157_vm2 = vcmp.eq.f32.partialorder %v1156_v1, 8.507059e+37  ;;  %v1159_v0 = vor.u32 1.1754944e-38, %v1158_v37  ;;  %v4387_v37 = vld [vmem:[#allocation20_spill] sm:$0xff] }
 0x1e2   :  { %2394 = vrcp.f32 %v4007_v16  ;;  %v392_v12 = vadd.f32 %v360_v48, %v288_v38  ;;  %v1155_v14 = vsel %vm1154_vm1, %v2393_v3, %v1151_v2  ;;  %v1175_v6 = vadd.f32 1.1283791, %v1174_v35 }
 0x1e3   :  { %2256 = vmatpush.msrb.mxu3 %v2083_v10  ;;  %v1223_v50 = vmul.f32 %v1222_v19, %v3961_v51  ;;  %v1246_v9 = vmul.f32 2.1237322e-06, %v4014_v32  ;;  %v1160_v47 = vsel %vm1157_vm2, %v1159_v0, %v1155_v14  ;;  %v1213_v15 = vadd.f32 0.18741608, %v1212_v60  ;;  %v4388_v10 = vld [vmem:[#allocation13_spill] sm:$0xff] }
 0x1e4   :  { %v1257_v30 = vmul.f32 3.8918573e-05, %v4014_v32  ;;  %v496_v24 = vadd.f32 %v464_v8, %v392_v12  ;;  %v592_v31 = vmul.f32 0.5, %v3863_v63  ;;  %v1161_v62 = vmul.f32 %v1160_v47, %v1136_v43 }
 0x1e5   :  { %v1224_v1 = vadd.f32 0.4994258, %v1223_v50  ;;  %v1247_v18 = vadd.f32 0.00028619796, %v1246_v9  ;;  %v185_v3 = vmul.f32 %v3461_v54, %v4383_v42  ;;  %v257_v33 = vmul.f32 %v3477_v5, %v4384_v55  ;;  %v4391_v9 = vld [vmem:[#allocation7_spill] sm:$0xff] }
 0x1e6   :  { %v1258_v25 = vadd.f32 0.001143296, %v1257_v30  ;;  %v4023_v23 = vadd.f32 %v4387_v37, %v496_v24  ;;  %v2287_v26 = vclamps-f32 %v1161_v62, 1.0  ;;  %v4030_v58 = vmul.f32 0.5, %v3915_v46 }
 0x1e7   :  { %v1225_v48 = vmul.f32 %v1224_v1, %v3961_v51  ;;  %v1248_v63 = vmul.f32 %v1247_v18, %v4014_v32  ;;  %v1176_v59 = vmul.f32 %v1175_v6, %v3922_v28  ;;  %v1214_v49 = vmul.f32 %v1213_v15, %v3961_v51 }
 0x1e8   :  { %v2395_v43 = vpop.eup %2394  ;;  %v1259_v38 = vmul.f32 %v1258_v25, %v4014_v32  ;;  %v4038_v54 = vmul.f32 0.70710677, %v4023_v23  ;;  %v1936_v44 = vadd.f32 1.0, %v2287_v26  ;;  %v1196_v46 = vand.u32 2147483647, %v4007_v16 }
 0x1e9   :  { %v1188_v5 = vmul.f32 %v2395_v43, %v4007_v16  ;;  %v289_v40 = vadd.f32 %v257_v33, %v185_v3  ;;  %v4042_v29 = vadd.f32 1.0, %v1225_v48  ;;  %v1249_v61 = vadd.f32 0.0036580483, %v1248_v63 }
 0x1ea   :  { %v1260_v4 = vadd.f32 0.014752088, %v1259_v38  ;;  %v804_v28 = vmul.f32 %v4038_v54, %v4038_v54  ;;  %v1968_v35 = vmul.f32 %v1936_v44, %v592_v31  ;;  %v1198_v39 = vand.u32 2147483648, %v4007_v16 }
 0x1eb   :  { %v1189_v51 = vsub.f32 1.0, %v1188_v5  ;;  %v361_v60 = vmul.f32 %v3490_v52, %v4385_v17  ;;  %vm1193_vm3 = vweird.f32 %v2395_v43  ;;  %v1215_v19 = vadd.f32 1.1283791, %v1214_v49 }
 0x1ec   :  { %2396 = vrcp.f32 %v4042_v29  ;;  %v465_v8 = vmul.f32 %v3494_v45, %v4386_v36  ;;  %v2020_v2 = vmul.f32 %v4388_v10, %v1968_v35  ;;  %v1250_v12 = vmul.f32 %v1249_v61, %v4014_v32 }
 0x1ed   :  { %v1190_v0 = vmul.f32 %v2395_v43, %v1189_v51  ;;  %v1261_v14 = vmul.f32 %v1260_v4, %v4014_v32  ;;  %vm1192_vm4 = vweird.f32 %v4007_v16  ;;  %vm4056_vm5 = vcmp.eq.f32.partialorder %v1196_v46, 8.507059e+37 }
 0x1ee   :  { %v4060_v52 = vmin.f32 %v804_v28, 16.0  ;;  %v393_v50 = vadd.f32 %v361_v60, %v289_v40  ;;  %v2072_v47 = vadd.f32 %v4391_v9, %v2020_v2  ;;  %v1199_v45 = vor.u32 1.1754944e-38, %v1198_v39  ;;  %vm1194_vm7 = vmor %vm1192_vm4, %vm1193_vm3 }
 0x1ef   :  { %v1191_v15 = vadd.f32 %v2395_v43, %v1190_v0  ;;  %v1262_v30 = vadd.f32 0.112945676, %v1261_v14  ;;  %v1216_v24 = vmul.f32 %v1215_v19, %v3948_v27  ;;  %vm1232_vm8 = vweird.f32 %v4042_v29 }
 0x1f0   :  { %v806_v31 = vmul.f32 2.1237322e-06, %v4060_v52  ;;  %v817_v16 = vmul.f32 3.8918573e-05, %v4060_v52  ;;  %v497_v62 = vadd.f32 %v465_v8, %v393_v50  ;;  %2197 = vmatpush.msrb.mxu0 %v2072_v47  ;;  %v1251_v18 = vadd.f32 0.05243302, %v1250_v12 }
 0x1f1   :  { %v1195_v1 = vsel %vm1194_vm7, %v2395_v43, %v1191_v15  ;;  %v1263_v25 = vmul.f32 %v1262_v30, %v4014_v32  ;;  %v1236_v38 = vand.u32 2147483647, %v4042_v29  ;;  %v1238_v43 = vand.u32 2147483648, %v4042_v29 }
 0x1f2   :  { %v2397_v3 = vpop.eup %2396  ;;  %v1200_v33 = vsel %vm4056_vm5, %v1199_v45, %v1195_v1  ;;  %v807_v26 = vadd.f32 0.00028619796, %v806_v31  ;;  %v818_v48 = vadd.f32 0.001143296, %v817_v16  ;;  %v4072_v27 = vadd.f32 %v4387_v37, %v497_v62 }
 0x1f3   :  { %v1201_v63 = vmul.f32 %v1200_v33, %v1176_v59  ;;  %v1228_v49 = vmul.f32 %v2397_v3, %v4042_v29  ;;  %v1264_v44 = vadd.f32 0.4994258, %v1263_v25  ;;  %v186_v40 = vmul.f32 %v3529_v57, %v4383_v42 }
 0x1f4   :  { %v808_v5 = vmul.f32 %v807_v26, %v4060_v52  ;;  %v819_v46 = vmul.f32 %v818_v48, %v4060_v52  ;;  %v1252_v28 = vmul.f32 %v1251_v18, %v4014_v32  ;;  %v4083_v59 = vmul.f32 0.70710677, %v4072_v27 }
 0x1f5   :  { %v2288_v61 = vclamps-f32 %v1201_v63, 1.0  ;;  %v1229_v4 = vsub.f32 1.0, %v1228_v49  ;;  %v1265_v35 = vmul.f32 %v1264_v44, %v4014_v32  ;;  %v258_v60 = vmul.f32 %v3531_v11, %v4384_v55 }
 0x1f6   :  { %v809_v51 = vadd.f32 0.0036580483, %v808_v5  ;;  %v820_v39 = vadd.f32 0.014752088, %v819_v46  ;;  %vm1233_vm9 = vweird.f32 %v2397_v3  ;;  %v844_v57 = vmul.f32 %v4083_v59, %v4083_v59 }
 0x1f7   :  { %v1937_v19 = vadd.f32 1.0, %v2288_v61  ;;  %v1230_v8 = vmul.f32 %v2397_v3, %v1229_v4  ;;  %vm4090_vm10 = vcmp.eq.f32.partialorder %v1236_v38, 8.507059e+37  ;;  %v4094_v0 = vadd.f32 1.0, %v1265_v35  ;;  %vm1234_vm11 = vmor %vm1232_vm8, %vm1233_vm9 }
 0x1f8   :  { %v810_v12 = vmul.f32 %v809_v51, %v4060_v52  ;;  %v821_v14 = vmul.f32 %v820_v39, %v4060_v52  ;;  %v1253_v11 = vadd.f32 0.18741608, %v1252_v28  ;;  %v4099_v47 = vmin.f32 %v844_v57, 16.0 }
 0x1f9   :  { %v1969_v6 = vmul.f32 %v1937_v19, %v4030_v58  ;;  %v1231_v50 = vadd.f32 %v2397_v3, %v1230_v8  ;;  %v1239_v15 = vor.u32 1.1754944e-38, %v1238_v43  ;;  %2398 = vrcp.f32 %v4094_v0 }
 0x1fa   :  { %v290_v45 = vadd.f32 %v258_v60, %v186_v40  ;;  %v362_v30 = vmul.f32 %v3558_v34, %v4385_v17  ;;  %v811_v62 = vadd.f32 0.05243302, %v810_v12  ;;  %v822_v1 = vadd.f32 0.112945676, %v821_v14 }
 0x1fb   :  { %v2021_v31 = vmul.f32 %v4388_v10, %v1969_v6  ;;  %v1235_v16 = vsel %vm1234_vm11, %v2397_v3, %v1231_v50  ;;  %v846_v18 = vmul.f32 2.1237322e-06, %v4099_v47  ;;  %v1254_v33 = vmul.f32 %v1253_v11, %v4014_v32 }
 0x1fc   :  { %v1240_v58 = vsel %vm4090_vm10, %v1239_v15, %v1235_v16  ;;  %v823_v26 = vmul.f32 %v822_v1, %v4060_v52  ;;  %v857_v34 = vmul.f32 3.8918573e-05, %v4099_v47  ;;  %v394_v63 = vadd.f32 %v362_v30, %v290_v45 }
 0x1fd   :  { %v2073_v29 = vadd.f32 %v4391_v9, %v2021_v31  ;;  %v1241_v25 = vmul.f32 %v1240_v58, %v1216_v24  ;;  %v847_v48 = vadd.f32 0.00028619796, %v846_v18  ;;  %v466_v3 = vmul.f32 %v3567_v41, %v4386_v36 }
 0x1fe   :  { %v812_v38 = vmul.f32 %v811_v62, %v4060_v52  ;;  %v824_v43 = vadd.f32 0.4994258, %v823_v26  ;;  %v594_v5 = vmul.f32 0.5, %v3939_v20  ;;  %v858_v32 = vadd.f32 0.001143296, %v857_v34 }
 0x1ff   :  { %2217 = vmatpush.msrb.mxu1 %v2073_v29  ;;  %v2289_v49 = vclamps-f32 %v1241_v25, 1.0  ;;  %v2399_v44 = vpop.eup %2398  ;;  %v848_v24 = vmul.f32 %v847_v48, %v4099_v47  ;;  %v498_v46 = vadd.f32 %v466_v3, %v394_v63  ;;  %v1255_v61 = vadd.f32 1.1283791, %v1254_v33 }
 0x200   :  { %v1268_v4 = vmul.f32 %v2399_v44, %v4094_v0  ;;  %v187_v28 = vmul.f32 %v3595_v13, %v4383_v42  ;;  %v825_v41 = vmul.f32 %v824_v43, %v4060_v52  ;;  %v859_v35 = vmul.f32 %v858_v32, %v4099_v47 }
 0x201   :  { %v1938_v40 = vadd.f32 1.0, %v2289_v49  ;;  %v4125_v51 = vadd.f32 %v4387_v37, %v498_v46  ;;  %v259_v20 = vmul.f32 %v3601_v56, %v4384_v55  ;;  %v1276_v19 = vand.u32 2147483647, %v4094_v0 }
 0x202   :  { %v1269_v60 = vsub.f32 1.0, %v1268_v4  ;;  %v813_v8 = vadd.f32 0.18741608, %v812_v38  ;;  %v1278_v57 = vand.u32 2147483648, %v4094_v0  ;;  %v4131_v2 = vadd.f32 1.0, %v825_v41 }
 0x203   :  { %v1970_v39 = vmul.f32 %v1938_v40, %v594_v5  ;;  %v849_v13 = vadd.f32 0.0036580483, %v848_v24  ;;  %v860_v42 = vadd.f32 0.014752088, %v859_v35  ;;  %vm1273_vm12 = vweird.f32 %v2399_v44 }
 0x204   :  { %v1270_v14 = vmul.f32 %v2399_v44, %v1269_v60  ;;  %v4135_v6 = vmul.f32 0.70710677, %v4125_v51  ;;  %v1256_v56 = vmul.f32 %v1255_v61, %v3999_v7  ;;  %vm1272_vm13 = vweird.f32 %v4094_v0 }
 0x205   :  { %v2022_v12 = vmul.f32 %v4388_v10, %v1970_v39  ;;  %2400 = vrcp.f32 %v4131_v2  ;;  %v291_v55 = vadd.f32 %v259_v20, %v187_v28  ;;  %vm1277_vm14 = vcmp.eq.f32.partialorder %v1276_v19, 8.507059e+37  ;;  %vm1274_vm15 = vmor %vm1272_vm13, %vm1273_vm12 }
 0x206   :  { %v1271_v11 = vadd.f32 %v2399_v44, %v1270_v14  ;;  %v861_v15 = vmul.f32 %v860_v42, %v4099_v47  ;;  %v1279_v45 = vor.u32 1.1754944e-38, %v1278_v57  ;;  %v850_v30 = vmul.f32 %v849_v13, %v4099_v47 }
 0x207   :  { %v2074_v50 = vadd.f32 %v4391_v9, %v2022_v12  ;;  %v884_v31 = vmul.f32 %v4135_v6, %v4135_v6  ;;  %v363_v7 = vmul.f32 %v3612_v21, %v4385_v17  ;;  %v814_v16 = vmul.f32 %v813_v8, %v4060_v52 }
 0x208   :  { %v1275_v0 = vsel %vm1274_vm15, %v2399_v44, %v1271_v11  ;;  %v862_v62 = vadd.f32 0.112945676, %v861_v15  ;;  %v467_v1 = vmul.f32 %v3628_v22, %v4386_v36  ;;  %v851_v48 = vadd.f32 0.05243302, %v850_v30 }
 0x209   :  { %2237 = vmatpush.msrb.mxu2 %v2074_v50  ;;  %v1280_v58 = vsel %vm1277_vm14, %v1279_v45, %v1275_v0  ;;  %v4150_v18 = vmin.f32 %v884_v31, 16.0  ;;  %v395_v29 = vadd.f32 %v363_v7, %v291_v55  ;;  %v595_v52 = vmul.f32 0.5, %v3990_v53 }
 0x20a   :  { %v1281_v25 = vmul.f32 %v1280_v58, %v1256_v56  ;;  %v863_v33 = vmul.f32 %v862_v62, %v4099_v47  ;;  %v815_v3 = vadd.f32 1.1283791, %v814_v16  ;;  %v836_v24 = vand.u32 2147483647, %v4131_v2 }
 0x20b   :  { %v2401_v26 = vpop.eup %2400  ;;  %v886_v34 = vmul.f32 2.1237322e-06, %v4150_v18  ;;  %v897_v21 = vmul.f32 3.8918573e-05, %v4150_v18  ;;  %v499_v17 = vadd.f32 %v467_v1, %v395_v29  ;;  %v838_v32 = vand.u32 2147483648, %v4131_v2 }
 0x20c   :  { %v2290_v63 = vclamps-f32 %v1281_v25, 1.0  ;;  %v828_v22 = vmul.f32 %v2401_v26, %v4131_v2  ;;  %v864_v36 = vadd.f32 0.4994258, %v863_v33  ;;  %v852_v46 = vmul.f32 %v851_v48, %v4099_v47 }
 0x20d   :  { %v887_v49 = vadd.f32 0.00028619796, %v886_v34  ;;  %v898_v38 = vadd.f32 0.001143296, %v897_v21  ;;  %v4158_v43 = vadd.f32 %v4387_v37, %v499_v17  ;;  %vm833_vm0 = vweird.f32 %v2401_v26 }
 0x20e   :  { %v1939_v44 = vadd.f32 1.0, %v2290_v63  ;;  %v829_v5 = vsub.f32 1.0, %v828_v22  ;;  %v865_v53 = vmul.f32 %v864_v36, %v4099_v47  ;;  %vm832_vm1 = vweird.f32 %v4131_v2 }
 0x20f   :  { %v888_v40 = vmul.f32 %v887_v49, %v4150_v18  ;;  %v899_v61 = vmul.f32 %v898_v38, %v4150_v18  ;;  %v4167_v37 = vmul.f32 0.70710677, %v4158_v43  ;;  %v816_v8 = vmul.f32 %v815_v3, %v4038_v54  ;;  %vm834_vm2 = vmor %vm832_vm1, %vm833_vm0  ;;  %v4395_v38 = vld [vmem:[#allocation11_spill] sm:$0xff] }
 0x210   :  { %v1971_v4 = vmul.f32 %v1939_v44, %v595_v52  ;;  %v830_v28 = vmul.f32 %v2401_v26, %v829_v5  ;;  %v866_v41 = vadd.f32 1.0, %v865_v53  ;;  %vm837_vm3 = vcmp.eq.f32.partialorder %v836_v24, 8.507059e+37  ;;  %v4394_v52 = vld [vmem:[#allocation9_spill] sm:$0xff] }
 0x211   :  { %v900_v35 = vadd.f32 0.014752088, %v899_v61  ;;  %v889_v60 = vadd.f32 0.0036580483, %v888_v40  ;;  %v924_v19 = vmul.f32 %v4167_v37, %v4167_v37  ;;  %v839_v57 = vor.u32 1.1754944e-38, %v838_v32 }
 0x212   :  { %v2023_v20 = vmul.f32 %v4388_v10, %v1971_v4  ;;  %v831_v39 = vadd.f32 %v2401_v26, %v830_v28  ;;  %2402 = vrcp.f32 %v866_v41  ;;  %v853_v12 = vadd.f32 0.18741608, %v852_v46  ;;  %v4196_v28 = vld [vmem:[%s4264_s7] sm:$0xff] }
 0x213   :  { %v901_v2 = vmul.f32 %v900_v35, %v4150_v18  ;;  %v4176_v56 = vmin.f32 %v924_v19, 16.0  ;;  %v890_v55 = vmul.f32 %v889_v60, %v4150_v18  ;;  %v584_v0 = vmul.f32 0.5, %v4023_v23 }
 0x214   :  { %v2075_v13 = vadd.f32 %v4391_v9, %v2023_v20  ;;  %v835_v42 = vsel %vm834_vm2, %v2401_v26, %v831_v39  ;;  %v854_v45 = vmul.f32 %v853_v12, %v4099_v47  ;;  %v876_v34 = vand.u32 2147483647, %v866_v41  ;;  %v4204_v12 = vpop.permute.xlu2 %2096 }
 0x215   :  { %v840_v14 = vsel %vm837_vm3, %v839_v57, %v835_v42  ;;  %v902_v50 = vadd.f32 0.112945676, %v901_v2  ;;  %v926_v54 = vmul.f32 2.1237322e-06, %v4176_v56  ;;  %v937_v11 = vmul.f32 3.8918573e-05, %v4176_v56 }
 0x216   :  { %2257 = vmatpush.msrb.mxu3 %v2075_v13  ;;  %v841_v10 = vmul.f32 %v840_v14, %v816_v8  ;;  %v891_v1 = vadd.f32 0.05243302, %v890_v55  ;;  %v855_v26 = vadd.f32 1.1283791, %v854_v45  ;;  %v878_v47 = vand.u32 2147483648, %v866_v41 }
 0x217   :  { %v903_v9 = vmul.f32 %v902_v50, %v4150_v18  ;;  %v927_v31 = vadd.f32 0.00028619796, %v926_v54  ;;  %v938_v7 = vadd.f32 0.001143296, %v937_v11  ;;  %vm872_vm5 = vweird.f32 %v866_v41 }
 0x218   :  { %v2279_v15 = vclamps-f32 %v841_v10, 1.0  ;;  %v2403_v30 = vpop.eup %2402  ;;  %v892_v23 = vmul.f32 %v891_v1, %v4150_v18  ;;  %v856_v24 = vmul.f32 %v855_v26, %v4083_v59  ;;  %v879_v32 = vor.u32 1.1754944e-38, %v878_v47 }
 0x219   :  { %v868_v62 = vmul.f32 %v2403_v30, %v866_v41  ;;  %v904_v58 = vadd.f32 0.4994258, %v903_v9  ;;  %v928_v29 = vmul.f32 %v927_v31, %v4176_v56  ;;  %v939_v25 = vmul.f32 %v938_v7, %v4176_v56  ;;  %v2180_v31 = vpop.f32.mrf.mxu3 }
 0x21a   :  { %v1928_v16 = vadd.f32 1.0, %v2279_v15  ;;  %vm873_vm4 = vweird.f32 %v2403_v30  ;;  %vm877_vm8 = vcmp.eq.f32.partialorder %v876_v34, 8.507059e+37  ;;  %v893_v53 = vadd.f32 0.18741608, %v892_v23  ;;  %v2140_v15 = vpop.f32.mrf.mxu1 }
 0x21b   :  { %v869_v48 = vsub.f32 1.0, %v868_v62  ;;  %v905_v21 = vmul.f32 %v904_v58, %v4150_v18  ;;  %v940_v17 = vadd.f32 0.014752088, %v939_v25  ;;  %v929_v36 = vadd.f32 0.0036580483, %v928_v29  ;;  %vm874_vm7 = vmor %vm872_vm5, %vm873_vm4 }
 0x21c   :  { %v1960_v33 = vmul.f32 %v1928_v16, %v584_v0  ;;  %v894_v20 = vmul.f32 %v893_v53, %v4150_v18  ;;  %v585_v8 = vmul.f32 0.5, %v4072_v27  ;;  %v2120_v18 = vpop.f32.mrf.mxu0  ;;  %v2141_v16 = vadd.f32 %v2140_v15, %v4204_v12 }
 0x21d   :  { %v870_v3 = vmul.f32 %v2403_v30, %v869_v48  ;;  %v906_v22 = vadd.f32 1.0, %v905_v21  ;;  %v941_v49 = vmul.f32 %v940_v17, %v4176_v56  ;;  %v930_v4 = vmul.f32 %v929_v36, %v4176_v56 }
 0x21e   :  { %v2012_v63 = vmul.f32 %v4394_v52, %v1960_v33  ;;  %v895_v14 = vadd.f32 1.1283791, %v894_v20  ;;  %v2121_v27 = vadd.f32 %v2120_v18, %v4204_v12  ;;  %v2181_v29 = vadd.f32 %v2180_v31, %v4204_v12  ;;  %2264 = vst [vmem:[%s4265_s9 + $0x8] sm:$0xff] %v2141_v16 }
 0x21f   :  { %v871_v5 = vadd.f32 %v2403_v30, %v870_v3  ;;  %2404 = vrcp.f32 %v906_v22  ;;  %v942_v40 = vadd.f32 0.112945676, %v941_v49  ;;  %v931_v19 = vadd.f32 0.05243302, %v930_v4 }
 0x220   :  { %v2064_v44 = vadd.f32 %v4395_v38, %v2012_v63  ;;  %v916_v55 = vand.u32 2147483647, %v906_v22  ;;  %v918_v50 = vand.u32 2147483648, %v906_v22  ;;  %vm912_vm10 = vweird.f32 %v906_v22  ;;  %2263 = vst [vmem:[%s4265_s9] sm:$0xff] %v2121_v27 }
 0x221   :  { %v875_v46 = vsel %vm874_vm7, %v2403_v30, %v871_v5  ;;  %v943_v41 = vmul.f32 %v942_v40, %v4176_v56  ;;  %v932_v54 = vmul.f32 %v931_v19, %v4176_v56  ;;  %v2160_v30 = vpop.f32.mrf.mxu2  ;;  %v896_v25 = vmul.f32 %v895_v14, %v4135_v6  ;;  %2266 = vst [vmem:[%s4265_s9 + $0x18] sm:$0xff] %v2181_v29 }
 0x222   :  { %2198 = vmatpush.msrb.mxu0 %v2064_v44  ;;  %v880_v61 = vsel %vm877_vm8, %v879_v32, %v875_v46  ;;  %v2161_v62 = vadd.f32 %v2160_v30, %v4204_v12  ;;  %v919_v1 = vor.u32 1.1754944e-38, %v918_v50  ;;  %vm917_vm12 = vcmp.eq.f32.partialorder %v916_v55, 8.507059e+37 }
 0x223   :  { %2311 = vmatmul.msk.f32.vlgmr.msrb.gmra.mxu0 %vm2099_vm6, %v4196_v28  ;;  %v881_v59 = vmul.f32 %v880_v61, %v856_v24  ;;  %v944_v39 = vadd.f32 0.4994258, %v943_v41  ;;  %v933_v58 = vadd.f32 0.18741608, %v932_v54  ;;  %v586_v17 = vmul.f32 0.5, %v4125_v51 }
 0x224   :  { %2265 = vst [vmem:[%s4265_s9 + $0x10] sm:$0xff] %v2161_v62  ;;  %v587_v4 = vmul.f32 0.5, %v4158_v43 }
 0x225   :  { %v2280_v35 = vclamps-f32 %v881_v59, 1.0  ;;  %v2405_v60 = vpop.eup %2404  ;;  %v945_v42 = vmul.f32 %v944_v39, %v4176_v56  ;;  %v934_v34 = vmul.f32 %v933_v58, %v4176_v56 }
 0x226   :  { %v908_v13 = vmul.f32 %v2405_v60, %v906_v22  ;;  %vm913_vm9 = vweird.f32 %v2405_v60 }
 0x227   :  { %v1929_v57 = vadd.f32 1.0, %v2280_v35  ;;  %v946_v11 = vadd.f32 1.0, %v945_v42  ;;  %vm914_vm11 = vmor %vm912_vm10, %vm913_vm9  ;;  %v935_v23 = vadd.f32 1.1283791, %v934_v34 }
 0x228   :  { %v909_v10 = vsub.f32 1.0, %v908_v13 }
 0x229   :  { %v1961_v2 = vmul.f32 %v1929_v57, %v585_v8  ;;  %2406 = vrcp.f32 %v946_v11  ;;  %v958_v22 = vand.u32 2147483648, %v946_v11  ;;  %v956_v44 = vand.u32 2147483647, %v946_v11 }
 0x22a   :  { %v910_v9 = vmul.f32 %v2405_v60, %v909_v10  ;;  %vm952_vm14 = vweird.f32 %v946_v11  ;;  %v936_v46 = vmul.f32 %v935_v23, %v4167_v37 }
 0x22b   :  { %v2013_v45 = vmul.f32 %v4394_v52, %v1961_v2  ;;  %v959_v32 = vor.u32 1.1754944e-38, %v958_v22  ;;  %vm957_vm0 = vcmp.eq.f32.partialorder %v956_v44, 8.507059e+37 }
 0x22c   :  { %v911_v0 = vadd.f32 %v2405_v60, %v910_v9 }
 0x22d   :  { %v2065_v7 = vadd.f32 %v4395_v38, %v2013_v45 }
 0x22e   :  { %v915_v33 = vsel %vm914_vm11, %v2405_v60, %v911_v0 }
 0x22f   :  { %2218 = vmatpush.msrb.mxu1 %v2065_v7  ;;  %v920_v26 = vsel %vm917_vm12, %v919_v1, %v915_v33  ;;  %v2407_v6 = vpop.eup %2406 }
 0x230   :  { %2312 = vmatmul.msk.f32.vlgmr.msrb.gmra.mxu1 %vm2099_vm6, %v4196_v28  ;;  %v921_v48 = vmul.f32 %v920_v26, %v896_v25  ;;  %v948_v21 = vmul.f32 %v2407_v6, %v946_v11  ;;  %vm953_vm13 = vweird.f32 %v2407_v6 }
 0x231   :  { %vm954_vm15 = vmor %vm952_vm14, %vm953_vm13 }
 0x232   :  { %v2281_v47 = vclamps-f32 %v921_v48, 1.0  ;;  %v949_v3 = vsub.f32 1.0, %v948_v21 }
 0x234   :  { %v1930_v63 = vadd.f32 1.0, %v2281_v47  ;;  %v950_v49 = vmul.f32 %v2407_v6, %v949_v3 }
 0x236   :  { %v1962_v36 = vmul.f32 %v1930_v63, %v586_v17  ;;  %v951_v24 = vadd.f32 %v2407_v6, %v950_v49 }
 0x238   :  { %v2014_v5 = vmul.f32 %v4394_v52, %v1962_v36  ;;  %v955_v53 = vsel %vm954_vm15, %v2407_v6, %v951_v24 }
 0x239   :  { %v960_v51 = vsel %vm957_vm0, %v959_v32, %v955_v53 }
 0x23a   :  { %v2066_v56 = vadd.f32 %v4395_v38, %v2014_v5  ;;  %v961_v40 = vmul.f32 %v960_v51, %v936_v46 }
 0x23c   :  { %2238 = vmatpush.msrb.mxu2 %v2066_v56  ;;  %v2282_v61 = vclamps-f32 %v961_v40, 1.0 }
 0x23d   :  { %2313 = vmatmul.msk.f32.vlgmr.msrb.gmra.mxu2 %vm2099_vm6, %v4196_v28 }
 0x23e   :  { %v1931_v59 = vadd.f32 1.0, %v2282_v61 }
 0x240   :  { %v1963_v41 = vmul.f32 %v1931_v59, %v587_v4 }
 0x242   :  { %v2015_v35 = vmul.f32 %v4394_v52, %v1963_v41 }
 0x244   :  { %v2067_v20 = vadd.f32 %v4395_v38, %v2015_v35 }
 0x246   :  { %2258 = vmatpush.msrb.mxu3 %v2067_v20 }
 0x247   :  { %2314 = vmatmul.msk.f32.vlgmr.msrb.gmra.mxu3 %vm2099_vm6, %v4196_v28 }
 0x2a0   :  { %v2200_v37 = vpop.f32.mrf.mxu0 }
 0x2a1   :  { %v2201_v39 = vadd.f32 %v2200_v37, %v4204_v12 }
 0x2a3   :  { %2267 = vst [vmem:[%s4265_s9 + $0x20] sm:$0xff] %v2201_v39 }
 0x2ad   :  { %v2220_v60 = vpop.f32.mrf.mxu1 }
 0x2ae   :  { %v2221_v43 = vadd.f32 %v2220_v60, %v4204_v12 }
 0x2b0   :  { %2268 = vst [vmem:[%s4265_s9 + $0x28] sm:$0xff] %v2221_v43 }
 0x2c0   :  { %v2240_v52 = vpop.f32.mrf.mxu2 }
 0x2c1   :  { %v2241_v38 = vadd.f32 %v2240_v52, %v4204_v12 }
 0x2c3   :  { %2269 = vst [vmem:[%s4265_s9 + $0x30] sm:$0xff] %v2241_v38 }
 0x2ca   :  { %v2260_v28 = vpop.f32.mrf.mxu3 }
 0x2cb   :  { %v2261_v19 = vadd.f32 %v2260_v28, %v4204_v12 }
 0x2cd   :  { %2270 = vst [vmem:[%s4265_s9 + $0x38] sm:$0xff] %v2261_v19 }

</bundles_post_ra>
